<compile_context>
chip_gen: v6e
topology: v6e:2x2x1
jax: 0.10.0
libtpu: 0.0.40
codegen_flags: <defaults>
</compile_context>

<pallas_src>
import functools

import numpy as np
import jax
import jax.numpy as jnp
from jax.experimental import pallas as pl
from jax.experimental.pallas import tpu as pltpu


def _mixmodel_kernel(
    # activations (batch-blocked)
    q_in_ref,       # [B, Dm]      q = cat(src, zeros(edge_dim), src_t)
    k_in_ref,       # [B, N, Dm]   k = v = cat(seq, seq_e, seq_t)
    seq_x_ref,      # [N, B, Da]   GRU input cat(seq, seq_e), time-major
    tspan_ref,      # [B, N]       time deltas for the GRU
    mask_ref,       # [B, N]       1.0 == null position
    src_ref,        # [B, Df]
    # multi-head attention params
    wq_ref, wk_ref, wv_ref,        # [Dm, Dm] each
    fc_w_ref, fc_b_ref,            # [Dm, Dm], [1, Dm]
    ln_g_ref, ln_b_ref,            # [1, Dm], [1, Dm]
    # GRU params
    w_ih_ref, w_hh_ref,            # [Da, 3H], [H, 3H]
    b_i_ref, b_h_ref,              # [1, 3H], [1, 3H]
    # merger params (fc1 split by input block: attn | gru | src)
    w1a_ref, w1b_ref, w1c_ref, b1_ref,   # [Dm,Df], [H,Df], [Df,Df], [1,Df]
    w2_ref, b2_ref,                      # [Df, Df], [1, Df]
    out_ref,                             # [B, Df]
    *, n_head, d_k, d_v, gru_hidden,
):
    B, N, Dm = k_in_ref.shape
    f32 = jnp.float32
    inv_temp = float(1.0 / np.sqrt(d_k))          # fold temperature into a const multiply

    q_in = q_in_ref[...].astype(f32)
    k_in = k_in_ref[...].astype(f32)
    mask = mask_ref[...].astype(f32)

    # ---- multi-head scaled-dot-product attention (len_q == 1) ----
    # Fused full-width projections: one MXU matmul per weight, no per-head matmuls
    # and no [B*N, Dm] reshape (K/V projections contract the last dim of the 3-D tile).
    contract_last = (((2,), (0,)), ((), ()))
    q_all = jnp.dot(q_in, wq_ref[...], preferred_element_type=f32)                    # [B, Dm]
    k_all = jax.lax.dot_general(k_in, wk_ref[...], contract_last,
                                preferred_element_type=f32)                            # [B, N, Dm]
    v_all = jax.lax.dot_general(k_in, wv_ref[...], contract_last,
                                preferred_element_type=f32)                            # [B, N, Dm]

    mask_b = mask[:, None, :]                                                          # [B, 1, N]
    head_outs = []
    for h in range(n_head):                       # static, small; only slices + batched dots
        qh = q_all[:, None, h * d_k:(h + 1) * d_k]                                     # [B, 1, d_k]
        kh = k_all[:, :, h * d_k:(h + 1) * d_k]                                        # [B, N, d_k]
        vh = v_all[:, :, h * d_v:(h + 1) * d_v]                                        # [B, N, d_v]
        s = jnp.einsum('bqd,bkd->bqk', qh, kh, preferred_element_type=f32) * inv_temp  # [B, 1, N]
        s = jnp.where(mask_b > 0.0, -1e10, s)                                          # masked_fill
        m = jnp.max(s, axis=-1, keepdims=True)
        e = jnp.exp(s - m)
        attn = e * pl.reciprocal(jnp.sum(e, axis=-1, keepdims=True), approx=True)
        # attention dropout: inference mode -> identity
        out_h = jnp.einsum('bqk,bkd->bqd', attn, vh, preferred_element_type=f32)       # [B, 1, d_v]
        head_outs.append(out_h[:, 0, :])
    heads = jnp.concatenate(head_outs, axis=-1)                                        # [B, n_head*d_v]

    # single full-width output projection (head outputs are contiguous along last dim)
    fc_out = jnp.dot(heads, fc_w_ref[...], preferred_element_type=f32) + fc_b_ref[...]
    # output dropout: inference mode -> identity; use_res=False so no residual
    mu = jnp.mean(fc_out, axis=-1, keepdims=True)
    var = jnp.mean((fc_out - mu) ** 2, axis=-1, keepdims=True)
    attn_result = (fc_out - mu) * jax.lax.rsqrt(var + 1e-5)
    attn_result = attn_result * ln_g_ref[...] + ln_b_ref[...]                          # [B, Dm]

    # ---- time-aware GRU pool (LSTMPool) ----
    # TODO(synk): `TimeGRU` is not defined in the reference source; implemented as a
    # standard GRU cell with a 1/(1+dt) decay on the carried hidden state and masked
    # (null) steps carrying the previous hidden state through unchanged.
    H = gru_hidden
    seq_x = seq_x_ref[...].astype(f32)                                                 # [N, B, Da]
    # hoisted input projection: one matmul for all timesteps, bias folded in once
    gx_all = jax.lax.dot_general(seq_x, w_ih_ref[...], contract_last,
                                 preferred_element_type=f32) + b_i_ref[...]            # [N, B, 3H]
    w_hh = w_hh_ref[...]
    b_h_b = jnp.broadcast_to(b_h_ref[...], (B, 3 * H))                                 # hoisted
    decay = pl.reciprocal(1.0 + tspan_ref[...].astype(f32), approx=True)               # [B, N]

    h_state = jnp.zeros((B, H), f32)
    for t in range(N):                            # static unroll, N is small
        gx = gx_all[t]                            # [B, 3H]  (static leading-axis slice)
        h_prev = h_state * decay[:, t:t + 1]
        gh = jnp.dot(h_prev, w_hh, preferred_element_type=f32) + b_h_b                 # [B, 3H]
        r = jax.nn.sigmoid(gx[:, :H] + gh[:, :H])
        z = jax.nn.sigmoid(gx[:, H:2 * H] + gh[:, H:2 * H])
        n_g = jnp.tanh(gx[:, 2 * H:] + r * gh[:, 2 * H:])
        h_new = (1.0 - z) * n_g + z * h_prev
        h_state = jnp.where(mask[:, t:t + 1] > 0.0, h_state, h_new)
    lstm_result = h_state                                                              # [B, H]

    # ---- MergeLayer: fc2(relu(fc1(cat(attn_result, lstm_result, src)))) ----
    # concat expressed as a split matmul (W1 partitioned along its input dim).
    src = src_ref[...].astype(f32)
    h1 = (jnp.dot(attn_result, w1a_ref[...], preferred_element_type=f32)
          + jnp.dot(lstm_result, w1b_ref[...], preferred_element_type=f32)
          + jnp.dot(src, w1c_ref[...], preferred_element_type=f32)
          + b1_ref[...])
    h1 = jnp.maximum(h1, 0.0)
    out = jnp.dot(h1, w2_ref[...], preferred_element_type=f32) + b2_ref[...]
    out_ref[...] = out.astype(out_ref.dtype)


def _resident_spec(arr):
    """Full-array VMEM-resident BlockSpec (same block every grid step -> no re-DMA)."""
    nd = arr.ndim
    return pl.BlockSpec(arr.shape, lambda i, _nd=nd: (0,) * _nd)


def mixmodel_forward(src, src_t, seq, seq_t, seq_e, time_diff, mask, params, *,
                     n_head, max_block_b=128):
    B, feat_dim = src.shape
    N = seq.shape[1]
    edge_dim = seq_e.shape[2]
    time_dim = seq_t.shape[2]
    att_dim = feat_dim + edge_dim
    model_dim = feat_dim + edge_dim + time_dim
    d_k = d_v = model_dim // n_head
    gru_hidden = feat_dim

    # glue: concatenation / transposition / time-span construction in plain JAX
    q_in = jnp.concatenate(
        [src, jnp.zeros((B, edge_dim), src.dtype), src_t.reshape(B, time_dim)], axis=-1)
    k_in = jnp.concatenate([seq, seq_e, seq_t], axis=-1)                           # [B, N, Dm]
    seq_x = jnp.transpose(jnp.concatenate([seq, seq_e], axis=-1), (1, 0, 2))       # [N, B, Da]
    tspan = jnp.concatenate(
        [jnp.zeros((B, 1), jnp.float32),
         (time_diff[:, :-1] - time_diff[:, 1:]) / 5_000_000.0],                    # 'newAmazon'
        axis=1)
    mask_f = mask.astype(jnp.float32)
    src_f = src

    # pad batch to a multiple of 8 (sublane count); padded rows are fully masked
    Bp = int(-(-B // 8) * 8)
    pad = Bp - B
    if pad:
        q_in = jnp.pad(q_in, ((0, pad), (0, 0)))
        k_in = jnp.pad(k_in, ((0, pad), (0, 0), (0, 0)))
        seq_x = jnp.pad(seq_x, ((0, 0), (0, pad), (0, 0)))
        tspan = jnp.pad(tspan, ((0, pad), (0, 0)))
        mask_f = jnp.pad(mask_f, ((0, pad), (0, 0)), constant_values=1.0)
        src_f = jnp.pad(src_f, ((0, pad), (0, 0)))

    bb = min(max_block_b, Bp)                         # batch block (multiple of 8)
    grid = (pl.cdiv(Bp, bb),)

    kernel = functools.partial(_mixmodel_kernel, n_head=n_head, d_k=d_k, d_v=d_v,
                               gru_hidden=gru_hidden)

    weight_inputs = (
        params["wq"], params["wk"], params["wv"],
        params["fc_w"], params["fc_b"], params["ln_g"], params["ln_b"],
        params["w_ih"], params["w_hh"], params["b_i"], params["b_h"],
        params["w1a"], params["w1b"], params["w1c"], params["b1"],
        params["w2"], params["b2"],
    )
    act_inputs = (q_in, k_in, seq_x, tspan, mask_f, src_f)

    act_specs = [
        pl.BlockSpec((bb, model_dim), lambda i: (i, 0)),
        pl.BlockSpec((bb, N, model_dim), lambda i: (i, 0, 0)),
        pl.BlockSpec((N, bb, att_dim), lambda i: (0, i, 0)),
        pl.BlockSpec((bb, N), lambda i: (i, 0)),
        pl.BlockSpec((bb, N), lambda i: (i, 0)),
        pl.BlockSpec((bb, feat_dim), lambda i: (i, 0)),
    ]
    weight_specs = [_resident_spec(w) for w in weight_inputs]

    out = pl.pallas_call(
        kernel,
        out_shape=jax.ShapeDtypeStruct((Bp, feat_dim), jnp.float32),
        grid=grid,
        in_specs=act_specs + weight_specs,
        out_specs=pl.BlockSpec((bb, feat_dim), lambda i: (i, 0)),
        compiler_params=pltpu.CompilerParams(dimension_semantics=("parallel",)),
    )(*act_inputs, *weight_inputs)
    return out[:B]


def init_params(key, feat_dim, edge_dim, time_dim, n_head):
    model_dim = feat_dim + edge_dim + time_dim
    d_k = d_v = model_dim // n_head
    att_dim = feat_dim + edge_dim
    H = feat_dim
    ks = jax.random.split(key, 13)

    def nrm(k, shape, std):
        return std * jax.random.normal(k, shape, jnp.float32)

    def uni(k, shape, bound):
        return jax.random.uniform(k, shape, jnp.float32, -bound, bound)

    def xav(fi, fo):
        return float(np.sqrt(2.0 / (fi + fo)))

    qk_std = float(np.sqrt(2.0 / (model_dim + d_k)))
    v_std = float(np.sqrt(2.0 / (model_dim + d_v)))
    p = {
        "wq": nrm(ks[0], (model_dim, n_head * d_k), qk_std),
        "wk": nrm(ks[1], (model_dim, n_head * d_k), qk_std),
        "wv": nrm(ks[2], (model_dim, n_head * d_v), v_std),
        "fc_w": nrm(ks[3], (n_head * d_v, model_dim), xav(n_head * d_v, model_dim)),
        "fc_b": uni(ks[4], (1, model_dim), 1.0 / np.sqrt(n_head * d_v)),
        "ln_g": jnp.ones((1, model_dim), jnp.float32),
        "ln_b": jnp.zeros((1, model_dim), jnp.float32),
        "w_ih": uni(ks[5], (att_dim, 3 * H), 1.0 / np.sqrt(H)),
        "w_hh": uni(ks[6], (H, 3 * H), 1.0 / np.sqrt(H)),
        "b_i": uni(ks[7], (1, 3 * H), 1.0 / np.sqrt(H)),
        "b_h": uni(ks[8], (1, 3 * H), 1.0 / np.sqrt(H)),
    }
    dim1 = feat_dim * 2 + edge_dim + time_dim          # cat(attn_result, lstm_result)
    fc1_in = dim1 + feat_dim                           # + src
    fc1_w = nrm(ks[9], (fc1_in, feat_dim), xav(fc1_in, feat_dim))
    p["w1a"] = fc1_w[:model_dim, :]
    p["w1b"] = fc1_w[model_dim:model_dim + feat_dim, :]
    p["w1c"] = fc1_w[model_dim + feat_dim:, :]
    p["b1"] = uni(ks[10], (1, feat_dim), 1.0 / np.sqrt(fc1_in))
    p["w2"] = nrm(ks[11], (feat_dim, feat_dim), xav(feat_dim, feat_dim))
    p["b2"] = uni(ks[12], (1, feat_dim), 1.0 / np.sqrt(feat_dim))
    return p


if __name__ == "__main__":
    feat_dim, edge_dim, time_dim, n_head = 32, 16, 16, 2
    B, N = 4, 8

    key = jax.random.PRNGKey(0)
    k_data, k_par = jax.random.split(key)
    ks = jax.random.split(k_data, 6)

    src = jax.random.normal(ks[0], (B, feat_dim), jnp.float32)
    src_t = jax.random.normal(ks[1], (B, 1, time_dim), jnp.float32)
    seq = jax.random.normal(ks[2], (B, N, feat_dim), jnp.float32)
    seq_t = jax.random.normal(ks[3], (B, N, time_dim), jnp.float32)
    seq_e = jax.random.normal(ks[4], (B, N, edge_dim), jnp.float32)
    # decreasing, non-negative timestamps so the LSTMPool time-span assert semantics hold
    td = jax.random.uniform(ks[5], (B, N), jnp.float32, 0.0, 5.0e6)
    time_diff = jnp.sort(td, axis=1)[:, ::-1]
    lengths = jnp.array([8, 6, 5, 3])
    mask = jnp.arange(N)[None, :] >= lengths[:, None]       # True == null slot

    params = init_params(k_par, feat_dim, edge_dim, time_dim, n_head)

    out = mixmodel_forward(src, src_t, seq, seq_t, seq_e, time_diff, mask, params,
                           n_head=n_head)
    jax.block_until_ready(out)
    assert out.shape == (B, feat_dim)
    assert bool(jnp.all(jnp.isfinite(out)))
    print("KERNEL_OK")
</pallas_src>

<mosaic_0001>
module attributes {stable_mosaic.version = 11 : i64} {
  func.func @_mixmodel_kernel(%arg0: i32, %arg1: memref<8x64xf32, #tpu.memory_space<vmem>>, %arg2: memref<8x8x64xf32, #tpu.memory_space<vmem>>, %arg3: memref<8x8x48xf32, #tpu.memory_space<vmem>>, %arg4: memref<8x8xf32, #tpu.memory_space<vmem>>, %arg5: memref<8x8xf32, #tpu.memory_space<vmem>>, %arg6: memref<8x32xf32, #tpu.memory_space<vmem>>, %arg7: memref<64x64xf32, #tpu.memory_space<vmem>>, %arg8: memref<64x64xf32, #tpu.memory_space<vmem>>, %arg9: memref<64x64xf32, #tpu.memory_space<vmem>>, %arg10: memref<64x64xf32, #tpu.memory_space<vmem>>, %arg11: memref<1x64xf32, #tpu.memory_space<vmem>>, %arg12: memref<1x64xf32, #tpu.memory_space<vmem>>, %arg13: memref<1x64xf32, #tpu.memory_space<vmem>>, %arg14: memref<48x96xf32, #tpu.memory_space<vmem>>, %arg15: memref<32x96xf32, #tpu.memory_space<vmem>>, %arg16: memref<1x96xf32, #tpu.memory_space<vmem>>, %arg17: memref<1x96xf32, #tpu.memory_space<vmem>>, %arg18: memref<64x32xf32, #tpu.memory_space<vmem>>, %arg19: memref<32x32xf32, #tpu.memory_space<vmem>>, %arg20: memref<32x32xf32, #tpu.memory_space<vmem>>, %arg21: memref<1x32xf32, #tpu.memory_space<vmem>>, %arg22: memref<32x32xf32, #tpu.memory_space<vmem>>, %arg23: memref<1x32xf32, #tpu.memory_space<vmem>>, %arg24: memref<8x32xf32, #tpu.memory_space<vmem>>) attributes {dimension_semantics = [#tpu.dimension_semantics<parallel>], iteration_bounds = array<i64: 1>, scalar_prefetch = 0 : i64, scratch_operands = 0 : i64, tpu.core_type = #tpu.core_type<tc>, window_params = [{transform_indices = @transform_0, window_bounds = array<i64: 8, 64>}, {transform_indices = @transform_1, window_bounds = array<i64: 8, 8, 64>}, {transform_indices = @transform_2, window_bounds = array<i64: 8, 8, 48>}, {transform_indices = @transform_3, window_bounds = array<i64: 8, 8>}, {transform_indices = @transform_4, window_bounds = array<i64: 8, 8>}, {transform_indices = @transform_5, window_bounds = array<i64: 8, 32>}, {pipeline_mode = #tpu.pipeline_mode<synchronous>, transform_indices = @transform_6, window_bounds = array<i64: 64, 64>}, {pipeline_mode = #tpu.pipeline_mode<synchronous>, transform_indices = @transform_7, window_bounds = array<i64: 64, 64>}, {pipeline_mode = #tpu.pipeline_mode<synchronous>, transform_indices = @transform_8, window_bounds = array<i64: 64, 64>}, {pipeline_mode = #tpu.pipeline_mode<synchronous>, transform_indices = @transform_9, window_bounds = array<i64: 64, 64>}, {pipeline_mode = #tpu.pipeline_mode<synchronous>, transform_indices = @transform_10, window_bounds = array<i64: 1, 64>}, {pipeline_mode = #tpu.pipeline_mode<synchronous>, transform_indices = @transform_11, window_bounds = array<i64: 1, 64>}, {pipeline_mode = #tpu.pipeline_mode<synchronous>, transform_indices = @transform_12, window_bounds = array<i64: 1, 64>}, {pipeline_mode = #tpu.pipeline_mode<synchronous>, transform_indices = @transform_13, window_bounds = array<i64: 48, 96>}, {pipeline_mode = #tpu.pipeline_mode<synchronous>, transform_indices = @transform_14, window_bounds = array<i64: 32, 96>}, {pipeline_mode = #tpu.pipeline_mode<synchronous>, transform_indices = @transform_15, window_bounds = array<i64: 1, 96>}, {pipeline_mode = #tpu.pipeline_mode<synchronous>, transform_indices = @transform_16, window_bounds = array<i64: 1, 96>}, {pipeline_mode = #tpu.pipeline_mode<synchronous>, transform_indices = @transform_17, window_bounds = array<i64: 64, 32>}, {pipeline_mode = #tpu.pipeline_mode<synchronous>, transform_indices = @transform_18, window_bounds = array<i64: 32, 32>}, {pipeline_mode = #tpu.pipeline_mode<synchronous>, transform_indices = @transform_19, window_bounds = array<i64: 32, 32>}, {pipeline_mode = #tpu.pipeline_mode<synchronous>, transform_indices = @transform_20, window_bounds = array<i64: 1, 32>}, {pipeline_mode = #tpu.pipeline_mode<synchronous>, transform_indices = @transform_21, window_bounds = array<i64: 32, 32>}, {pipeline_mode = #tpu.pipeline_mode<synchronous>, transform_indices = @transform_22, window_bounds = array<i64: 1, 32>}, {transform_indices = @transform_23, window_bounds = array<i64: 8, 32>}]} {
    %c0 = arith.constant 0 : index
    %c0_0 = arith.constant 0 : index
    %0 = vector.load %arg1[%c0, %c0_0] : memref<8x64xf32, #tpu.memory_space<vmem>>, vector<8x64xf32>
    %c0_1 = arith.constant 0 : index
    %c0_2 = arith.constant 0 : index
    %c0_3 = arith.constant 0 : index
    %1 = vector.load %arg2[%c0_1, %c0_2, %c0_3] : memref<8x8x64xf32, #tpu.memory_space<vmem>>, vector<8x8x64xf32>
    %c0_4 = arith.constant 0 : index
    %c0_5 = arith.constant 0 : index
    %2 = vector.load %arg5[%c0_4, %c0_5] : memref<8x8xf32, #tpu.memory_space<vmem>>, vector<8x8xf32>
    %c0_6 = arith.constant 0 : index
    %c0_7 = arith.constant 0 : index
    %3 = vector.load %arg7[%c0_6, %c0_7] : memref<64x64xf32, #tpu.memory_space<vmem>>, vector<64x64xf32>
    %cst = arith.constant dense<0.000000e+00> : vector<8x64xf32>
    %4 = tpu.matmul %0, %3, %cst {dimension_numbers = #tpu.dot_dimension_numbers<[1], [0], [0], [1], [0, 0, 1, 1], [], []>} : vector<8x64xf32>, vector<64x64xf32>, vector<8x64xf32> -> vector<8x64xf32>
    %c0_8 = arith.constant 0 : index
    %c0_9 = arith.constant 0 : index
    %5 = vector.load %arg8[%c0_8, %c0_9] : memref<64x64xf32, #tpu.memory_space<vmem>>, vector<64x64xf32>
    %cst_10 = arith.constant dense<0.000000e+00> : vector<8x8x64xf32>
    %6 = tpu.matmul %1, %5, %cst_10 {dimension_numbers = #tpu.dot_dimension_numbers<[2], [0], [0, 1], [1], [0, 0, 0, 1, 1, 1], [], []>} : vector<8x8x64xf32>, vector<64x64xf32>, vector<8x8x64xf32> -> vector<8x8x64xf32>
    %c0_11 = arith.constant 0 : index
    %c0_12 = arith.constant 0 : index
    %7 = vector.load %arg9[%c0_11, %c0_12] : memref<64x64xf32, #tpu.memory_space<vmem>>, vector<64x64xf32>
    %cst_13 = arith.constant dense<0.000000e+00> : vector<8x8x64xf32>
    %8 = tpu.matmul %1, %7, %cst_13 {dimension_numbers = #tpu.dot_dimension_numbers<[2], [0], [0, 1], [1], [0, 0, 0, 1, 1, 1], [], []>} : vector<8x8x64xf32>, vector<64x64xf32>, vector<8x8x64xf32> -> vector<8x8x64xf32>
    %9 = vector.shape_cast %2 : vector<8x8xf32> to vector<8x1x8xf32>
    %10 = vector.extract_strided_slice %4 {offsets = [0, 0], sizes = [8, 32], strides = [1, 1]} : vector<8x64xf32> to vector<8x32xf32>
    %11 = vector.shape_cast %10 : vector<8x32xf32> to vector<8x1x32xf32>
    %12 = vector.extract_strided_slice %6 {offsets = [0, 0, 0], sizes = [8, 8, 32], strides = [1, 1, 1]} : vector<8x8x64xf32> to vector<8x8x32xf32>
    %13 = vector.extract_strided_slice %8 {offsets = [0, 0, 0], sizes = [8, 8, 32], strides = [1, 1, 1]} : vector<8x8x64xf32> to vector<8x8x32xf32>
    "tpu.trace_start"() <{level = 10 : i32, message = "bqd,bkd->bqk"}> : () -> ()
    %cst_14 = arith.constant dense<0.000000e+00> : vector<8x1x8xf32>
    %14 = tpu.matmul %11, %12, %cst_14 {dimension_numbers = #tpu.dot_dimension_numbers<[2], [2], [1], [1], [0, 0, 0, 1, 1, 1], [0], [0]>} : vector<8x1x32xf32>, vector<8x8x32xf32>, vector<8x1x8xf32> -> vector<8x1x8xf32>
    "tpu.trace_stop"() : () -> ()
    %cst_15 = arith.constant 0.176776692 : f32
    %15 = vector.broadcast %cst_15 : f32 to vector<8x1x8xf32>
    %16 = arith.mulf %14, %15 : vector<8x1x8xf32>
    %cst_16 = arith.constant 0.000000e+00 : f32
    %17 = vector.broadcast %cst_16 : f32 to vector<8x1x8xf32>
    %18 = arith.cmpf ogt, %9, %17 : vector<8x1x8xf32>
    %cst_17 = arith.constant -1.000000e+10 : f32
    %19 = vector.broadcast %cst_17 : f32 to vector<8x1x8xf32>
    %20 = arith.select %18, %19, %16 : vector<8x1x8xi1>, vector<8x1x8xf32>
    %cst_18 = arith.constant dense<0xFF800000> : vector<8x1xf32>
    %21 = vector.multi_reduction <maximumf>, %20, %cst_18 [2] : vector<8x1x8xf32> to vector<8x1xf32>
    %22 = vector.shape_cast %21 : vector<8x1xf32> to vector<8x1x1xf32>
    %23 = vector.broadcast %22 : vector<8x1x1xf32> to vector<8x1x8xf32>
    %24 = arith.subf %20, %23 : vector<8x1x8xf32>
    %25 = math.exp %24 : vector<8x1x8xf32>
    %cst_19 = arith.constant dense<0.000000e+00> : vector<8x1xf32>
    %26 = vector.multi_reduction <add>, %25, %cst_19 [2] : vector<8x1x8xf32> to vector<8x1xf32>
    %27 = vector.shape_cast %26 : vector<8x1xf32> to vector<8x1x1xf32>
    %28 = tpu.reciprocal %27 {approx = true} : vector<8x1x1xf32> -> vector<8x1x1xf32>
    %29 = vector.broadcast %28 : vector<8x1x1xf32> to vector<8x1x8xf32>
    %30 = arith.mulf %25, %29 : vector<8x1x8xf32>
    "tpu.trace_start"() <{level = 10 : i32, message = "bqk,bkd->bqd"}> : () -> ()
    %cst_20 = arith.constant dense<0.000000e+00> : vector<8x1x32xf32>
    %31 = tpu.matmul %30, %13, %cst_20 {dimension_numbers = #tpu.dot_dimension_numbers<[2], [1], [1], [2], [0, 0, 0, 1, 1, 2], [0], [0]>} : vector<8x1x8xf32>, vector<8x8x32xf32>, vector<8x1x32xf32> -> vector<8x1x32xf32>
    "tpu.trace_stop"() : () -> ()
    %32 = vector.shape_cast %31 : vector<8x1x32xf32> to vector<8x32xf32>
    %33 = vector.extract_strided_slice %4 {offsets = [0, 32], sizes = [8, 32], strides = [1, 1]} : vector<8x64xf32> to vector<8x32xf32>
    %34 = vector.shape_cast %33 : vector<8x32xf32> to vector<8x1x32xf32>
    %35 = vector.extract_strided_slice %6 {offsets = [0, 0, 32], sizes = [8, 8, 32], strides = [1, 1, 1]} : vector<8x8x64xf32> to vector<8x8x32xf32>
    %36 = vector.extract_strided_slice %8 {offsets = [0, 0, 32], sizes = [8, 8, 32], strides = [1, 1, 1]} : vector<8x8x64xf32> to vector<8x8x32xf32>
    "tpu.trace_start"() <{level = 10 : i32, message = "bqd,bkd->bqk"}> : () -> ()
    %cst_21 = arith.constant dense<0.000000e+00> : vector<8x1x8xf32>
    %37 = tpu.matmul %34, %35, %cst_21 {dimension_numbers = #tpu.dot_dimension_numbers<[2], [2], [1], [1], [0, 0, 0, 1, 1, 1], [0], [0]>} : vector<8x1x32xf32>, vector<8x8x32xf32>, vector<8x1x8xf32> -> vector<8x1x8xf32>
    "tpu.trace_stop"() : () -> ()
    %cst_22 = arith.constant 0.176776692 : f32
    %38 = vector.broadcast %cst_22 : f32 to vector<8x1x8xf32>
    %39 = arith.mulf %37, %38 : vector<8x1x8xf32>
    %cst_23 = arith.constant 0.000000e+00 : f32
    %40 = vector.broadcast %cst_23 : f32 to vector<8x1x8xf32>
    %41 = arith.cmpf ogt, %9, %40 : vector<8x1x8xf32>
    %cst_24 = arith.constant -1.000000e+10 : f32
    %42 = vector.broadcast %cst_24 : f32 to vector<8x1x8xf32>
    %43 = arith.select %41, %42, %39 : vector<8x1x8xi1>, vector<8x1x8xf32>
    %cst_25 = arith.constant dense<0xFF800000> : vector<8x1xf32>
    %44 = vector.multi_reduction <maximumf>, %43, %cst_25 [2] : vector<8x1x8xf32> to vector<8x1xf32>
    %45 = vector.shape_cast %44 : vector<8x1xf32> to vector<8x1x1xf32>
    %46 = vector.broadcast %45 : vector<8x1x1xf32> to vector<8x1x8xf32>
    %47 = arith.subf %43, %46 : vector<8x1x8xf32>
    %48 = math.exp %47 : vector<8x1x8xf32>
    %cst_26 = arith.constant dense<0.000000e+00> : vector<8x1xf32>
    %49 = vector.multi_reduction <add>, %48, %cst_26 [2] : vector<8x1x8xf32> to vector<8x1xf32>
    %50 = vector.shape_cast %49 : vector<8x1xf32> to vector<8x1x1xf32>
    %51 = tpu.reciprocal %50 {approx = true} : vector<8x1x1xf32> -> vector<8x1x1xf32>
    %52 = vector.broadcast %51 : vector<8x1x1xf32> to vector<8x1x8xf32>
    %53 = arith.mulf %48, %52 : vector<8x1x8xf32>
    "tpu.trace_start"() <{level = 10 : i32, message = "bqk,bkd->bqd"}> : () -> ()
    %cst_27 = arith.constant dense<0.000000e+00> : vector<8x1x32xf32>
    %54 = tpu.matmul %53, %36, %cst_27 {dimension_numbers = #tpu.dot_dimension_numbers<[2], [1], [1], [2], [0, 0, 0, 1, 1, 2], [0], [0]>} : vector<8x1x8xf32>, vector<8x8x32xf32>, vector<8x1x32xf32> -> vector<8x1x32xf32>
    "tpu.trace_stop"() : () -> ()
    %55 = vector.shape_cast %54 : vector<8x1x32xf32> to vector<8x32xf32>
    %56 = tpu.concatenate %32, %55 in 1 : vector<8x32xf32>, vector<8x32xf32> -> vector<8x64xf32>
    %c0_28 = arith.constant 0 : index
    %c0_29 = arith.constant 0 : index
    %57 = vector.load %arg10[%c0_28, %c0_29] : memref<64x64xf32, #tpu.memory_space<vmem>>, vector<64x64xf32>
    %cst_30 = arith.constant dense<0.000000e+00> : vector<8x64xf32>
    %58 = tpu.matmul %56, %57, %cst_30 {dimension_numbers = #tpu.dot_dimension_numbers<[1], [0], [0], [1], [0, 0, 1, 1], [], []>} : vector<8x64xf32>, vector<64x64xf32>, vector<8x64xf32> -> vector<8x64xf32>
    %c0_31 = arith.constant 0 : index
    %c0_32 = arith.constant 0 : index
    %59 = vector.load %arg11[%c0_31, %c0_32] : memref<1x64xf32, #tpu.memory_space<vmem>>, vector<1x64xf32>
    %60 = vector.broadcast %59 : vector<1x64xf32> to vector<8x64xf32>
    %61 = arith.addf %58, %60 : vector<8x64xf32>
    %cst_33 = arith.constant dense<0.000000e+00> : vector<8xf32>
    %62 = vector.multi_reduction <add>, %61, %cst_33 [1] : vector<8x64xf32> to vector<8xf32>
    %63 = vector.shape_cast %62 : vector<8xf32> to vector<8x1xf32>
    %cst_34 = arith.constant 6.400000e+01 : f32
    %64 = vector.broadcast %cst_34 : f32 to vector<8x1xf32>
    %65 = arith.divf %63, %64 : vector<8x1xf32>
    %66 = vector.broadcast %65 : vector<8x1xf32> to vector<8x64xf32>
    %67 = arith.subf %61, %66 : vector<8x64xf32>
    %68 = arith.mulf %67, %67 : vector<8x64xf32>
    %cst_35 = arith.constant dense<0.000000e+00> : vector<8xf32>
    %69 = vector.multi_reduction <add>, %68, %cst_35 [1] : vector<8x64xf32> to vector<8xf32>
    %70 = vector.shape_cast %69 : vector<8xf32> to vector<8x1xf32>
    %cst_36 = arith.constant 6.400000e+01 : f32
    %71 = vector.broadcast %cst_36 : f32 to vector<8x1xf32>
    %72 = arith.divf %70, %71 : vector<8x1xf32>
    %73 = vector.broadcast %65 : vector<8x1xf32> to vector<8x64xf32>
    %74 = arith.subf %61, %73 : vector<8x64xf32>
    %cst_37 = arith.constant 9.99999974E-6 : f32
    %75 = vector.broadcast %cst_37 : f32 to vector<8x1xf32>
    %76 = arith.addf %72, %75 : vector<8x1xf32>
    %77 = math.rsqrt %76 : vector<8x1xf32>
    %78 = vector.broadcast %77 : vector<8x1xf32> to vector<8x64xf32>
    %79 = arith.mulf %74, %78 : vector<8x64xf32>
    %c0_38 = arith.constant 0 : index
    %c0_39 = arith.constant 0 : index
    %80 = vector.load %arg12[%c0_38, %c0_39] : memref<1x64xf32, #tpu.memory_space<vmem>>, vector<1x64xf32>
    %81 = vector.broadcast %80 : vector<1x64xf32> to vector<8x64xf32>
    %82 = arith.mulf %79, %81 : vector<8x64xf32>
    %c0_40 = arith.constant 0 : index
    %c0_41 = arith.constant 0 : index
    %83 = vector.load %arg13[%c0_40, %c0_41] : memref<1x64xf32, #tpu.memory_space<vmem>>, vector<1x64xf32>
    %84 = vector.broadcast %83 : vector<1x64xf32> to vector<8x64xf32>
    %85 = arith.addf %82, %84 : vector<8x64xf32>
    %c0_42 = arith.constant 0 : index
    %c0_43 = arith.constant 0 : index
    %c0_44 = arith.constant 0 : index
    %86 = vector.load %arg3[%c0_42, %c0_43, %c0_44] : memref<8x8x48xf32, #tpu.memory_space<vmem>>, vector<8x8x48xf32>
    %c0_45 = arith.constant 0 : index
    %c0_46 = arith.constant 0 : index
    %87 = vector.load %arg14[%c0_45, %c0_46] : memref<48x96xf32, #tpu.memory_space<vmem>>, vector<48x96xf32>
    %cst_47 = arith.constant dense<0.000000e+00> : vector<8x8x96xf32>
    %88 = tpu.matmul %86, %87, %cst_47 {dimension_numbers = #tpu.dot_dimension_numbers<[2], [0], [0, 1], [1], [0, 0, 0, 1, 1, 1], [], []>} : vector<8x8x48xf32>, vector<48x96xf32>, vector<8x8x96xf32> -> vector<8x8x96xf32>
    %c0_48 = arith.constant 0 : index
    %c0_49 = arith.constant 0 : index
    %89 = vector.load %arg16[%c0_48, %c0_49] : memref<1x96xf32, #tpu.memory_space<vmem>>, vector<1x96xf32>
    %90 = vector.shape_cast %89 : vector<1x96xf32> to vector<1x1x96xf32>
    %91 = vector.broadcast %90 : vector<1x1x96xf32> to vector<8x8x96xf32>
    %92 = arith.addf %88, %91 : vector<8x8x96xf32>
    %c0_50 = arith.constant 0 : index
    %c0_51 = arith.constant 0 : index
    %93 = vector.load %arg15[%c0_50, %c0_51] : memref<32x96xf32, #tpu.memory_space<vmem>>, vector<32x96xf32>
    %c0_52 = arith.constant 0 : index
    %c0_53 = arith.constant 0 : index
    %94 = vector.load %arg17[%c0_52, %c0_53] : memref<1x96xf32, #tpu.memory_space<vmem>>, vector<1x96xf32>
    %95 = vector.shape_cast %94 : vector<1x96xf32> to vector<1x96xf32>
    %96 = vector.broadcast %95 : vector<1x96xf32> to vector<8x96xf32>
    %c0_54 = arith.constant 0 : index
    %c0_55 = arith.constant 0 : index
    %97 = vector.load %arg4[%c0_54, %c0_55] : memref<8x8xf32, #tpu.memory_space<vmem>>, vector<8x8xf32>
    %cst_56 = arith.constant 1.000000e+00 : f32
    %98 = vector.broadcast %cst_56 : f32 to vector<8x8xf32>
    %99 = arith.addf %98, %97 : vector<8x8xf32>
    %100 = tpu.reciprocal %99 {approx = true} : vector<8x8xf32> -> vector<8x8xf32>
    %cst_57 = arith.constant 0.000000e+00 : f32
    %101 = vector.broadcast %cst_57 : f32 to vector<8x32xf32>
    %102 = vector.extract_strided_slice %92 {offsets = [0, 0, 0], sizes = [1, 8, 96], strides = [1, 1, 1]} : vector<8x8x96xf32> to vector<1x8x96xf32>
    %103 = vector.shape_cast %102 : vector<1x8x96xf32> to vector<8x96xf32>
    %104 = vector.extract_strided_slice %100 {offsets = [0, 0], sizes = [8, 1], strides = [1, 1]} : vector<8x8xf32> to vector<8x1xf32>
    %105 = vector.broadcast %104 : vector<8x1xf32> to vector<8x32xf32>
    %106 = arith.mulf %101, %105 : vector<8x32xf32>
    %cst_58 = arith.constant dense<0.000000e+00> : vector<8x96xf32>
    %107 = tpu.matmul %106, %93, %cst_58 {dimension_numbers = #tpu.dot_dimension_numbers<[1], [0], [0], [1], [0, 0, 1, 1], [], []>} : vector<8x32xf32>, vector<32x96xf32>, vector<8x96xf32> -> vector<8x96xf32>
    %108 = arith.addf %107, %96 : vector<8x96xf32>
    %109 = vector.extract_strided_slice %103 {offsets = [0, 0], sizes = [8, 32], strides = [1, 1]} : vector<8x96xf32> to vector<8x32xf32>
    %110 = vector.extract_strided_slice %108 {offsets = [0, 0], sizes = [8, 32], strides = [1, 1]} : vector<8x96xf32> to vector<8x32xf32>
    %111 = arith.addf %109, %110 : vector<8x32xf32>
    %112 = arith.negf %111 : vector<8x32xf32>
    %113 = math.exp %112 : vector<8x32xf32>
    %cst_59 = arith.constant 1.000000e+00 : f32
    %114 = vector.broadcast %cst_59 : f32 to vector<8x32xf32>
    %115 = arith.addf %114, %113 : vector<8x32xf32>
    %116 = arith.divf %114, %115 : vector<8x32xf32>
    %117 = vector.extract_strided_slice %103 {offsets = [0, 32], sizes = [8, 32], strides = [1, 1]} : vector<8x96xf32> to vector<8x32xf32>
    %118 = vector.extract_strided_slice %108 {offsets = [0, 32], sizes = [8, 32], strides = [1, 1]} : vector<8x96xf32> to vector<8x32xf32>
    %119 = arith.addf %117, %118 : vector<8x32xf32>
    %120 = arith.negf %119 : vector<8x32xf32>
    %121 = math.exp %120 : vector<8x32xf32>
    %cst_60 = arith.constant 1.000000e+00 : f32
    %122 = vector.broadcast %cst_60 : f32 to vector<8x32xf32>
    %123 = arith.addf %122, %121 : vector<8x32xf32>
    %124 = arith.divf %122, %123 : vector<8x32xf32>
    %125 = vector.extract_strided_slice %103 {offsets = [0, 64], sizes = [8, 32], strides = [1, 1]} : vector<8x96xf32> to vector<8x32xf32>
    %126 = vector.extract_strided_slice %108 {offsets = [0, 64], sizes = [8, 32], strides = [1, 1]} : vector<8x96xf32> to vector<8x32xf32>
    %127 = arith.mulf %116, %126 : vector<8x32xf32>
    %128 = arith.addf %125, %127 : vector<8x32xf32>
    %129 = math.tanh %128 : vector<8x32xf32>
    %cst_61 = arith.constant 1.000000e+00 : f32
    %130 = vector.broadcast %cst_61 : f32 to vector<8x32xf32>
    %131 = arith.subf %130, %124 : vector<8x32xf32>
    %132 = arith.mulf %131, %129 : vector<8x32xf32>
    %133 = arith.mulf %124, %106 : vector<8x32xf32>
    %134 = arith.addf %132, %133 : vector<8x32xf32>
    %135 = vector.extract_strided_slice %2 {offsets = [0, 0], sizes = [8, 1], strides = [1, 1]} : vector<8x8xf32> to vector<8x1xf32>
    %cst_62 = arith.constant 0.000000e+00 : f32
    %136 = vector.broadcast %cst_62 : f32 to vector<8x1xf32>
    %137 = arith.cmpf ogt, %135, %136 : vector<8x1xf32>
    %138 = vector.shape_cast %137 : vector<8x1xi1> to vector<8x1xi1>
    %139 = vector.broadcast %138 : vector<8x1xi1> to vector<8x32xi1>
    %140 = arith.select %139, %101, %134 : vector<8x32xi1>, vector<8x32xf32>
    %141 = vector.extract_strided_slice %92 {offsets = [1, 0, 0], sizes = [1, 8, 96], strides = [1, 1, 1]} : vector<8x8x96xf32> to vector<1x8x96xf32>
    %142 = vector.shape_cast %141 : vector<1x8x96xf32> to vector<8x96xf32>
    %143 = vector.extract_strided_slice %100 {offsets = [0, 1], sizes = [8, 1], strides = [1, 1]} : vector<8x8xf32> to vector<8x1xf32>
    %144 = vector.broadcast %143 : vector<8x1xf32> to vector<8x32xf32>
    %145 = arith.mulf %140, %144 : vector<8x32xf32>
    %cst_63 = arith.constant dense<0.000000e+00> : vector<8x96xf32>
    %146 = tpu.matmul %145, %93, %cst_63 {dimension_numbers = #tpu.dot_dimension_numbers<[1], [0], [0], [1], [0, 0, 1, 1], [], []>} : vector<8x32xf32>, vector<32x96xf32>, vector<8x96xf32> -> vector<8x96xf32>
    %147 = arith.addf %146, %96 : vector<8x96xf32>
    %148 = vector.extract_strided_slice %142 {offsets = [0, 0], sizes = [8, 32], strides = [1, 1]} : vector<8x96xf32> to vector<8x32xf32>
    %149 = vector.extract_strided_slice %147 {offsets = [0, 0], sizes = [8, 32], strides = [1, 1]} : vector<8x96xf32> to vector<8x32xf32>
    %150 = arith.addf %148, %149 : vector<8x32xf32>
    %151 = arith.negf %150 : vector<8x32xf32>
    %152 = math.exp %151 : vector<8x32xf32>
    %cst_64 = arith.constant 1.000000e+00 : f32
    %153 = vector.broadcast %cst_64 : f32 to vector<8x32xf32>
    %154 = arith.addf %153, %152 : vector<8x32xf32>
    %155 = arith.divf %153, %154 : vector<8x32xf32>
    %156 = vector.extract_strided_slice %142 {offsets = [0, 32], sizes = [8, 32], strides = [1, 1]} : vector<8x96xf32> to vector<8x32xf32>
    %157 = vector.extract_strided_slice %147 {offsets = [0, 32], sizes = [8, 32], strides = [1, 1]} : vector<8x96xf32> to vector<8x32xf32>
    %158 = arith.addf %156, %157 : vector<8x32xf32>
    %159 = arith.negf %158 : vector<8x32xf32>
    %160 = math.exp %159 : vector<8x32xf32>
    %cst_65 = arith.constant 1.000000e+00 : f32
    %161 = vector.broadcast %cst_65 : f32 to vector<8x32xf32>
    %162 = arith.addf %161, %160 : vector<8x32xf32>
    %163 = arith.divf %161, %162 : vector<8x32xf32>
    %164 = vector.extract_strided_slice %142 {offsets = [0, 64], sizes = [8, 32], strides = [1, 1]} : vector<8x96xf32> to vector<8x32xf32>
    %165 = vector.extract_strided_slice %147 {offsets = [0, 64], sizes = [8, 32], strides = [1, 1]} : vector<8x96xf32> to vector<8x32xf32>
    %166 = arith.mulf %155, %165 : vector<8x32xf32>
    %167 = arith.addf %164, %166 : vector<8x32xf32>
    %168 = math.tanh %167 : vector<8x32xf32>
    %cst_66 = arith.constant 1.000000e+00 : f32
    %169 = vector.broadcast %cst_66 : f32 to vector<8x32xf32>
    %170 = arith.subf %169, %163 : vector<8x32xf32>
    %171 = arith.mulf %170, %168 : vector<8x32xf32>
    %172 = arith.mulf %163, %145 : vector<8x32xf32>
    %173 = arith.addf %171, %172 : vector<8x32xf32>
    %174 = vector.extract_strided_slice %2 {offsets = [0, 1], sizes = [8, 1], strides = [1, 1]} : vector<8x8xf32> to vector<8x1xf32>
    %cst_67 = arith.constant 0.000000e+00 : f32
    %175 = vector.broadcast %cst_67 : f32 to vector<8x1xf32>
    %176 = arith.cmpf ogt, %174, %175 : vector<8x1xf32>
    %177 = vector.shape_cast %176 : vector<8x1xi1> to vector<8x1xi1>
    %178 = vector.broadcast %177 : vector<8x1xi1> to vector<8x32xi1>
    %179 = arith.select %178, %140, %173 : vector<8x32xi1>, vector<8x32xf32>
    %180 = vector.extract_strided_slice %92 {offsets = [2, 0, 0], sizes = [1, 8, 96], strides = [1, 1, 1]} : vector<8x8x96xf32> to vector<1x8x96xf32>
    %181 = vector.shape_cast %180 : vector<1x8x96xf32> to vector<8x96xf32>
    %182 = vector.extract_strided_slice %100 {offsets = [0, 2], sizes = [8, 1], strides = [1, 1]} : vector<8x8xf32> to vector<8x1xf32>
    %183 = vector.broadcast %182 : vector<8x1xf32> to vector<8x32xf32>
    %184 = arith.mulf %179, %183 : vector<8x32xf32>
    %cst_68 = arith.constant dense<0.000000e+00> : vector<8x96xf32>
    %185 = tpu.matmul %184, %93, %cst_68 {dimension_numbers = #tpu.dot_dimension_numbers<[1], [0], [0], [1], [0, 0, 1, 1], [], []>} : vector<8x32xf32>, vector<32x96xf32>, vector<8x96xf32> -> vector<8x96xf32>
    %186 = arith.addf %185, %96 : vector<8x96xf32>
    %187 = vector.extract_strided_slice %181 {offsets = [0, 0], sizes = [8, 32], strides = [1, 1]} : vector<8x96xf32> to vector<8x32xf32>
    %188 = vector.extract_strided_slice %186 {offsets = [0, 0], sizes = [8, 32], strides = [1, 1]} : vector<8x96xf32> to vector<8x32xf32>
    %189 = arith.addf %187, %188 : vector<8x32xf32>
    %190 = arith.negf %189 : vector<8x32xf32>
    %191 = math.exp %190 : vector<8x32xf32>
    %cst_69 = arith.constant 1.000000e+00 : f32
    %192 = vector.broadcast %cst_69 : f32 to vector<8x32xf32>
    %193 = arith.addf %192, %191 : vector<8x32xf32>
    %194 = arith.divf %192, %193 : vector<8x32xf32>
    %195 = vector.extract_strided_slice %181 {offsets = [0, 32], sizes = [8, 32], strides = [1, 1]} : vector<8x96xf32> to vector<8x32xf32>
    %196 = vector.extract_strided_slice %186 {offsets = [0, 32], sizes = [8, 32], strides = [1, 1]} : vector<8x96xf32> to vector<8x32xf32>
    %197 = arith.addf %195, %196 : vector<8x32xf32>
    %198 = arith.negf %197 : vector<8x32xf32>
    %199 = math.exp %198 : vector<8x32xf32>
    %cst_70 = arith.constant 1.000000e+00 : f32
    %200 = vector.broadcast %cst_70 : f32 to vector<8x32xf32>
    %201 = arith.addf %200, %199 : vector<8x32xf32>
    %202 = arith.divf %200, %201 : vector<8x32xf32>
    %203 = vector.extract_strided_slice %181 {offsets = [0, 64], sizes = [8, 32], strides = [1, 1]} : vector<8x96xf32> to vector<8x32xf32>
    %204 = vector.extract_strided_slice %186 {offsets = [0, 64], sizes = [8, 32], strides = [1, 1]} : vector<8x96xf32> to vector<8x32xf32>
    %205 = arith.mulf %194, %204 : vector<8x32xf32>
    %206 = arith.addf %203, %205 : vector<8x32xf32>
    %207 = math.tanh %206 : vector<8x32xf32>
    %cst_71 = arith.constant 1.000000e+00 : f32
    %208 = vector.broadcast %cst_71 : f32 to vector<8x32xf32>
    %209 = arith.subf %208, %202 : vector<8x32xf32>
    %210 = arith.mulf %209, %207 : vector<8x32xf32>
    %211 = arith.mulf %202, %184 : vector<8x32xf32>
    %212 = arith.addf %210, %211 : vector<8x32xf32>
    %213 = vector.extract_strided_slice %2 {offsets = [0, 2], sizes = [8, 1], strides = [1, 1]} : vector<8x8xf32> to vector<8x1xf32>
    %cst_72 = arith.constant 0.000000e+00 : f32
    %214 = vector.broadcast %cst_72 : f32 to vector<8x1xf32>
    %215 = arith.cmpf ogt, %213, %214 : vector<8x1xf32>
    %216 = vector.shape_cast %215 : vector<8x1xi1> to vector<8x1xi1>
    %217 = vector.broadcast %216 : vector<8x1xi1> to vector<8x32xi1>
    %218 = arith.select %217, %179, %212 : vector<8x32xi1>, vector<8x32xf32>
    %219 = vector.extract_strided_slice %92 {offsets = [3, 0, 0], sizes = [1, 8, 96], strides = [1, 1, 1]} : vector<8x8x96xf32> to vector<1x8x96xf32>
    %220 = vector.shape_cast %219 : vector<1x8x96xf32> to vector<8x96xf32>
    %221 = vector.extract_strided_slice %100 {offsets = [0, 3], sizes = [8, 1], strides = [1, 1]} : vector<8x8xf32> to vector<8x1xf32>
    %222 = vector.broadcast %221 : vector<8x1xf32> to vector<8x32xf32>
    %223 = arith.mulf %218, %222 : vector<8x32xf32>
    %cst_73 = arith.constant dense<0.000000e+00> : vector<8x96xf32>
    %224 = tpu.matmul %223, %93, %cst_73 {dimension_numbers = #tpu.dot_dimension_numbers<[1], [0], [0], [1], [0, 0, 1, 1], [], []>} : vector<8x32xf32>, vector<32x96xf32>, vector<8x96xf32> -> vector<8x96xf32>
    %225 = arith.addf %224, %96 : vector<8x96xf32>
    %226 = vector.extract_strided_slice %220 {offsets = [0, 0], sizes = [8, 32], strides = [1, 1]} : vector<8x96xf32> to vector<8x32xf32>
    %227 = vector.extract_strided_slice %225 {offsets = [0, 0], sizes = [8, 32], strides = [1, 1]} : vector<8x96xf32> to vector<8x32xf32>
    %228 = arith.addf %226, %227 : vector<8x32xf32>
    %229 = arith.negf %228 : vector<8x32xf32>
    %230 = math.exp %229 : vector<8x32xf32>
    %cst_74 = arith.constant 1.000000e+00 : f32
    %231 = vector.broadcast %cst_74 : f32 to vector<8x32xf32>
    %232 = arith.addf %231, %230 : vector<8x32xf32>
    %233 = arith.divf %231, %232 : vector<8x32xf32>
    %234 = vector.extract_strided_slice %220 {offsets = [0, 32], sizes = [8, 32], strides = [1, 1]} : vector<8x96xf32> to vector<8x32xf32>
    %235 = vector.extract_strided_slice %225 {offsets = [0, 32], sizes = [8, 32], strides = [1, 1]} : vector<8x96xf32> to vector<8x32xf32>
    %236 = arith.addf %234, %235 : vector<8x32xf32>
    %237 = arith.negf %236 : vector<8x32xf32>
    %238 = math.exp %237 : vector<8x32xf32>
    %cst_75 = arith.constant 1.000000e+00 : f32
    %239 = vector.broadcast %cst_75 : f32 to vector<8x32xf32>
    %240 = arith.addf %239, %238 : vector<8x32xf32>
    %241 = arith.divf %239, %240 : vector<8x32xf32>
    %242 = vector.extract_strided_slice %220 {offsets = [0, 64], sizes = [8, 32], strides = [1, 1]} : vector<8x96xf32> to vector<8x32xf32>
    %243 = vector.extract_strided_slice %225 {offsets = [0, 64], sizes = [8, 32], strides = [1, 1]} : vector<8x96xf32> to vector<8x32xf32>
    %244 = arith.mulf %233, %243 : vector<8x32xf32>
    %245 = arith.addf %242, %244 : vector<8x32xf32>
    %246 = math.tanh %245 : vector<8x32xf32>
    %cst_76 = arith.constant 1.000000e+00 : f32
    %247 = vector.broadcast %cst_76 : f32 to vector<8x32xf32>
    %248 = arith.subf %247, %241 : vector<8x32xf32>
    %249 = arith.mulf %248, %246 : vector<8x32xf32>
    %250 = arith.mulf %241, %223 : vector<8x32xf32>
    %251 = arith.addf %249, %250 : vector<8x32xf32>
    %252 = vector.extract_strided_slice %2 {offsets = [0, 3], sizes = [8, 1], strides = [1, 1]} : vector<8x8xf32> to vector<8x1xf32>
    %cst_77 = arith.constant 0.000000e+00 : f32
    %253 = vector.broadcast %cst_77 : f32 to vector<8x1xf32>
    %254 = arith.cmpf ogt, %252, %253 : vector<8x1xf32>
    %255 = vector.shape_cast %254 : vector<8x1xi1> to vector<8x1xi1>
    %256 = vector.broadcast %255 : vector<8x1xi1> to vector<8x32xi1>
    %257 = arith.select %256, %218, %251 : vector<8x32xi1>, vector<8x32xf32>
    %258 = vector.extract_strided_slice %92 {offsets = [4, 0, 0], sizes = [1, 8, 96], strides = [1, 1, 1]} : vector<8x8x96xf32> to vector<1x8x96xf32>
    %259 = vector.shape_cast %258 : vector<1x8x96xf32> to vector<8x96xf32>
    %260 = vector.extract_strided_slice %100 {offsets = [0, 4], sizes = [8, 1], strides = [1, 1]} : vector<8x8xf32> to vector<8x1xf32>
    %261 = vector.broadcast %260 : vector<8x1xf32> to vector<8x32xf32>
    %262 = arith.mulf %257, %261 : vector<8x32xf32>
    %cst_78 = arith.constant dense<0.000000e+00> : vector<8x96xf32>
    %263 = tpu.matmul %262, %93, %cst_78 {dimension_numbers = #tpu.dot_dimension_numbers<[1], [0], [0], [1], [0, 0, 1, 1], [], []>} : vector<8x32xf32>, vector<32x96xf32>, vector<8x96xf32> -> vector<8x96xf32>
    %264 = arith.addf %263, %96 : vector<8x96xf32>
    %265 = vector.extract_strided_slice %259 {offsets = [0, 0], sizes = [8, 32], strides = [1, 1]} : vector<8x96xf32> to vector<8x32xf32>
    %266 = vector.extract_strided_slice %264 {offsets = [0, 0], sizes = [8, 32], strides = [1, 1]} : vector<8x96xf32> to vector<8x32xf32>
    %267 = arith.addf %265, %266 : vector<8x32xf32>
    %268 = arith.negf %267 : vector<8x32xf32>
    %269 = math.exp %268 : vector<8x32xf32>
    %cst_79 = arith.constant 1.000000e+00 : f32
    %270 = vector.broadcast %cst_79 : f32 to vector<8x32xf32>
    %271 = arith.addf %270, %269 : vector<8x32xf32>
    %272 = arith.divf %270, %271 : vector<8x32xf32>
    %273 = vector.extract_strided_slice %259 {offsets = [0, 32], sizes = [8, 32], strides = [1, 1]} : vector<8x96xf32> to vector<8x32xf32>
    %274 = vector.extract_strided_slice %264 {offsets = [0, 32], sizes = [8, 32], strides = [1, 1]} : vector<8x96xf32> to vector<8x32xf32>
    %275 = arith.addf %273, %274 : vector<8x32xf32>
    %276 = arith.negf %275 : vector<8x32xf32>
    %277 = math.exp %276 : vector<8x32xf32>
    %cst_80 = arith.constant 1.000000e+00 : f32
    %278 = vector.broadcast %cst_80 : f32 to vector<8x32xf32>
    %279 = arith.addf %278, %277 : vector<8x32xf32>
    %280 = arith.divf %278, %279 : vector<8x32xf32>
    %281 = vector.extract_strided_slice %259 {offsets = [0, 64], sizes = [8, 32], strides = [1, 1]} : vector<8x96xf32> to vector<8x32xf32>
    %282 = vector.extract_strided_slice %264 {offsets = [0, 64], sizes = [8, 32], strides = [1, 1]} : vector<8x96xf32> to vector<8x32xf32>
    %283 = arith.mulf %272, %282 : vector<8x32xf32>
    %284 = arith.addf %281, %283 : vector<8x32xf32>
    %285 = math.tanh %284 : vector<8x32xf32>
    %cst_81 = arith.constant 1.000000e+00 : f32
    %286 = vector.broadcast %cst_81 : f32 to vector<8x32xf32>
    %287 = arith.subf %286, %280 : vector<8x32xf32>
    %288 = arith.mulf %287, %285 : vector<8x32xf32>
    %289 = arith.mulf %280, %262 : vector<8x32xf32>
    %290 = arith.addf %288, %289 : vector<8x32xf32>
    %291 = vector.extract_strided_slice %2 {offsets = [0, 4], sizes = [8, 1], strides = [1, 1]} : vector<8x8xf32> to vector<8x1xf32>
    %cst_82 = arith.constant 0.000000e+00 : f32
    %292 = vector.broadcast %cst_82 : f32 to vector<8x1xf32>
    %293 = arith.cmpf ogt, %291, %292 : vector<8x1xf32>
    %294 = vector.shape_cast %293 : vector<8x1xi1> to vector<8x1xi1>
    %295 = vector.broadcast %294 : vector<8x1xi1> to vector<8x32xi1>
    %296 = arith.select %295, %257, %290 : vector<8x32xi1>, vector<8x32xf32>
    %297 = vector.extract_strided_slice %92 {offsets = [5, 0, 0], sizes = [1, 8, 96], strides = [1, 1, 1]} : vector<8x8x96xf32> to vector<1x8x96xf32>
    %298 = vector.shape_cast %297 : vector<1x8x96xf32> to vector<8x96xf32>
    %299 = vector.extract_strided_slice %100 {offsets = [0, 5], sizes = [8, 1], strides = [1, 1]} : vector<8x8xf32> to vector<8x1xf32>
    %300 = vector.broadcast %299 : vector<8x1xf32> to vector<8x32xf32>
    %301 = arith.mulf %296, %300 : vector<8x32xf32>
    %cst_83 = arith.constant dense<0.000000e+00> : vector<8x96xf32>
    %302 = tpu.matmul %301, %93, %cst_83 {dimension_numbers = #tpu.dot_dimension_numbers<[1], [0], [0], [1], [0, 0, 1, 1], [], []>} : vector<8x32xf32>, vector<32x96xf32>, vector<8x96xf32> -> vector<8x96xf32>
    %303 = arith.addf %302, %96 : vector<8x96xf32>
    %304 = vector.extract_strided_slice %298 {offsets = [0, 0], sizes = [8, 32], strides = [1, 1]} : vector<8x96xf32> to vector<8x32xf32>
    %305 = vector.extract_strided_slice %303 {offsets = [0, 0], sizes = [8, 32], strides = [1, 1]} : vector<8x96xf32> to vector<8x32xf32>
    %306 = arith.addf %304, %305 : vector<8x32xf32>
    %307 = arith.negf %306 : vector<8x32xf32>
    %308 = math.exp %307 : vector<8x32xf32>
    %cst_84 = arith.constant 1.000000e+00 : f32
    %309 = vector.broadcast %cst_84 : f32 to vector<8x32xf32>
    %310 = arith.addf %309, %308 : vector<8x32xf32>
    %311 = arith.divf %309, %310 : vector<8x32xf32>
    %312 = vector.extract_strided_slice %298 {offsets = [0, 32], sizes = [8, 32], strides = [1, 1]} : vector<8x96xf32> to vector<8x32xf32>
    %313 = vector.extract_strided_slice %303 {offsets = [0, 32], sizes = [8, 32], strides = [1, 1]} : vector<8x96xf32> to vector<8x32xf32>
    %314 = arith.addf %312, %313 : vector<8x32xf32>
    %315 = arith.negf %314 : vector<8x32xf32>
    %316 = math.exp %315 : vector<8x32xf32>
    %cst_85 = arith.constant 1.000000e+00 : f32
    %317 = vector.broadcast %cst_85 : f32 to vector<8x32xf32>
    %318 = arith.addf %317, %316 : vector<8x32xf32>
    %319 = arith.divf %317, %318 : vector<8x32xf32>
    %320 = vector.extract_strided_slice %298 {offsets = [0, 64], sizes = [8, 32], strides = [1, 1]} : vector<8x96xf32> to vector<8x32xf32>
    %321 = vector.extract_strided_slice %303 {offsets = [0, 64], sizes = [8, 32], strides = [1, 1]} : vector<8x96xf32> to vector<8x32xf32>
    %322 = arith.mulf %311, %321 : vector<8x32xf32>
    %323 = arith.addf %320, %322 : vector<8x32xf32>
    %324 = math.tanh %323 : vector<8x32xf32>
    %cst_86 = arith.constant 1.000000e+00 : f32
    %325 = vector.broadcast %cst_86 : f32 to vector<8x32xf32>
    %326 = arith.subf %325, %319 : vector<8x32xf32>
    %327 = arith.mulf %326, %324 : vector<8x32xf32>
    %328 = arith.mulf %319, %301 : vector<8x32xf32>
    %329 = arith.addf %327, %328 : vector<8x32xf32>
    %330 = vector.extract_strided_slice %2 {offsets = [0, 5], sizes = [8, 1], strides = [1, 1]} : vector<8x8xf32> to vector<8x1xf32>
    %cst_87 = arith.constant 0.000000e+00 : f32
    %331 = vector.broadcast %cst_87 : f32 to vector<8x1xf32>
    %332 = arith.cmpf ogt, %330, %331 : vector<8x1xf32>
    %333 = vector.shape_cast %332 : vector<8x1xi1> to vector<8x1xi1>
    %334 = vector.broadcast %333 : vector<8x1xi1> to vector<8x32xi1>
    %335 = arith.select %334, %296, %329 : vector<8x32xi1>, vector<8x32xf32>
    %336 = vector.extract_strided_slice %92 {offsets = [6, 0, 0], sizes = [1, 8, 96], strides = [1, 1, 1]} : vector<8x8x96xf32> to vector<1x8x96xf32>
    %337 = vector.shape_cast %336 : vector<1x8x96xf32> to vector<8x96xf32>
    %338 = vector.extract_strided_slice %100 {offsets = [0, 6], sizes = [8, 1], strides = [1, 1]} : vector<8x8xf32> to vector<8x1xf32>
    %339 = vector.broadcast %338 : vector<8x1xf32> to vector<8x32xf32>
    %340 = arith.mulf %335, %339 : vector<8x32xf32>
    %cst_88 = arith.constant dense<0.000000e+00> : vector<8x96xf32>
    %341 = tpu.matmul %340, %93, %cst_88 {dimension_numbers = #tpu.dot_dimension_numbers<[1], [0], [0], [1], [0, 0, 1, 1], [], []>} : vector<8x32xf32>, vector<32x96xf32>, vector<8x96xf32> -> vector<8x96xf32>
    %342 = arith.addf %341, %96 : vector<8x96xf32>
    %343 = vector.extract_strided_slice %337 {offsets = [0, 0], sizes = [8, 32], strides = [1, 1]} : vector<8x96xf32> to vector<8x32xf32>
    %344 = vector.extract_strided_slice %342 {offsets = [0, 0], sizes = [8, 32], strides = [1, 1]} : vector<8x96xf32> to vector<8x32xf32>
    %345 = arith.addf %343, %344 : vector<8x32xf32>
    %346 = arith.negf %345 : vector<8x32xf32>
    %347 = math.exp %346 : vector<8x32xf32>
    %cst_89 = arith.constant 1.000000e+00 : f32
    %348 = vector.broadcast %cst_89 : f32 to vector<8x32xf32>
    %349 = arith.addf %348, %347 : vector<8x32xf32>
    %350 = arith.divf %348, %349 : vector<8x32xf32>
    %351 = vector.extract_strided_slice %337 {offsets = [0, 32], sizes = [8, 32], strides = [1, 1]} : vector<8x96xf32> to vector<8x32xf32>
    %352 = vector.extract_strided_slice %342 {offsets = [0, 32], sizes = [8, 32], strides = [1, 1]} : vector<8x96xf32> to vector<8x32xf32>
    %353 = arith.addf %351, %352 : vector<8x32xf32>
    %354 = arith.negf %353 : vector<8x32xf32>
    %355 = math.exp %354 : vector<8x32xf32>
    %cst_90 = arith.constant 1.000000e+00 : f32
    %356 = vector.broadcast %cst_90 : f32 to vector<8x32xf32>
    %357 = arith.addf %356, %355 : vector<8x32xf32>
    %358 = arith.divf %356, %357 : vector<8x32xf32>
    %359 = vector.extract_strided_slice %337 {offsets = [0, 64], sizes = [8, 32], strides = [1, 1]} : vector<8x96xf32> to vector<8x32xf32>
    %360 = vector.extract_strided_slice %342 {offsets = [0, 64], sizes = [8, 32], strides = [1, 1]} : vector<8x96xf32> to vector<8x32xf32>
    %361 = arith.mulf %350, %360 : vector<8x32xf32>
    %362 = arith.addf %359, %361 : vector<8x32xf32>
    %363 = math.tanh %362 : vector<8x32xf32>
    %cst_91 = arith.constant 1.000000e+00 : f32
    %364 = vector.broadcast %cst_91 : f32 to vector<8x32xf32>
    %365 = arith.subf %364, %358 : vector<8x32xf32>
    %366 = arith.mulf %365, %363 : vector<8x32xf32>
    %367 = arith.mulf %358, %340 : vector<8x32xf32>
    %368 = arith.addf %366, %367 : vector<8x32xf32>
    %369 = vector.extract_strided_slice %2 {offsets = [0, 6], sizes = [8, 1], strides = [1, 1]} : vector<8x8xf32> to vector<8x1xf32>
    %cst_92 = arith.constant 0.000000e+00 : f32
    %370 = vector.broadcast %cst_92 : f32 to vector<8x1xf32>
    %371 = arith.cmpf ogt, %369, %370 : vector<8x1xf32>
    %372 = vector.shape_cast %371 : vector<8x1xi1> to vector<8x1xi1>
    %373 = vector.broadcast %372 : vector<8x1xi1> to vector<8x32xi1>
    %374 = arith.select %373, %335, %368 : vector<8x32xi1>, vector<8x32xf32>
    %375 = vector.extract_strided_slice %92 {offsets = [7, 0, 0], sizes = [1, 8, 96], strides = [1, 1, 1]} : vector<8x8x96xf32> to vector<1x8x96xf32>
    %376 = vector.shape_cast %375 : vector<1x8x96xf32> to vector<8x96xf32>
    %377 = vector.extract_strided_slice %100 {offsets = [0, 7], sizes = [8, 1], strides = [1, 1]} : vector<8x8xf32> to vector<8x1xf32>
    %378 = vector.broadcast %377 : vector<8x1xf32> to vector<8x32xf32>
    %379 = arith.mulf %374, %378 : vector<8x32xf32>
    %cst_93 = arith.constant dense<0.000000e+00> : vector<8x96xf32>
    %380 = tpu.matmul %379, %93, %cst_93 {dimension_numbers = #tpu.dot_dimension_numbers<[1], [0], [0], [1], [0, 0, 1, 1], [], []>} : vector<8x32xf32>, vector<32x96xf32>, vector<8x96xf32> -> vector<8x96xf32>
    %381 = arith.addf %380, %96 : vector<8x96xf32>
    %382 = vector.extract_strided_slice %376 {offsets = [0, 0], sizes = [8, 32], strides = [1, 1]} : vector<8x96xf32> to vector<8x32xf32>
    %383 = vector.extract_strided_slice %381 {offsets = [0, 0], sizes = [8, 32], strides = [1, 1]} : vector<8x96xf32> to vector<8x32xf32>
    %384 = arith.addf %382, %383 : vector<8x32xf32>
    %385 = arith.negf %384 : vector<8x32xf32>
    %386 = math.exp %385 : vector<8x32xf32>
    %cst_94 = arith.constant 1.000000e+00 : f32
    %387 = vector.broadcast %cst_94 : f32 to vector<8x32xf32>
    %388 = arith.addf %387, %386 : vector<8x32xf32>
    %389 = arith.divf %387, %388 : vector<8x32xf32>
    %390 = vector.extract_strided_slice %376 {offsets = [0, 32], sizes = [8, 32], strides = [1, 1]} : vector<8x96xf32> to vector<8x32xf32>
    %391 = vector.extract_strided_slice %381 {offsets = [0, 32], sizes = [8, 32], strides = [1, 1]} : vector<8x96xf32> to vector<8x32xf32>
    %392 = arith.addf %390, %391 : vector<8x32xf32>
    %393 = arith.negf %392 : vector<8x32xf32>
    %394 = math.exp %393 : vector<8x32xf32>
    %cst_95 = arith.constant 1.000000e+00 : f32
    %395 = vector.broadcast %cst_95 : f32 to vector<8x32xf32>
    %396 = arith.addf %395, %394 : vector<8x32xf32>
    %397 = arith.divf %395, %396 : vector<8x32xf32>
    %398 = vector.extract_strided_slice %376 {offsets = [0, 64], sizes = [8, 32], strides = [1, 1]} : vector<8x96xf32> to vector<8x32xf32>
    %399 = vector.extract_strided_slice %381 {offsets = [0, 64], sizes = [8, 32], strides = [1, 1]} : vector<8x96xf32> to vector<8x32xf32>
    %400 = arith.mulf %389, %399 : vector<8x32xf32>
    %401 = arith.addf %398, %400 : vector<8x32xf32>
    %402 = math.tanh %401 : vector<8x32xf32>
    %cst_96 = arith.constant 1.000000e+00 : f32
    %403 = vector.broadcast %cst_96 : f32 to vector<8x32xf32>
    %404 = arith.subf %403, %397 : vector<8x32xf32>
    %405 = arith.mulf %404, %402 : vector<8x32xf32>
    %406 = arith.mulf %397, %379 : vector<8x32xf32>
    %407 = arith.addf %405, %406 : vector<8x32xf32>
    %408 = vector.extract_strided_slice %2 {offsets = [0, 7], sizes = [8, 1], strides = [1, 1]} : vector<8x8xf32> to vector<8x1xf32>
    %cst_97 = arith.constant 0.000000e+00 : f32
    %409 = vector.broadcast %cst_97 : f32 to vector<8x1xf32>
    %410 = arith.cmpf ogt, %408, %409 : vector<8x1xf32>
    %411 = vector.shape_cast %410 : vector<8x1xi1> to vector<8x1xi1>
    %412 = vector.broadcast %411 : vector<8x1xi1> to vector<8x32xi1>
    %413 = arith.select %412, %374, %407 : vector<8x32xi1>, vector<8x32xf32>
    %c0_98 = arith.constant 0 : index
    %c0_99 = arith.constant 0 : index
    %414 = vector.load %arg6[%c0_98, %c0_99] : memref<8x32xf32, #tpu.memory_space<vmem>>, vector<8x32xf32>
    %c0_100 = arith.constant 0 : index
    %c0_101 = arith.constant 0 : index
    %415 = vector.load %arg18[%c0_100, %c0_101] : memref<64x32xf32, #tpu.memory_space<vmem>>, vector<64x32xf32>
    %cst_102 = arith.constant dense<0.000000e+00> : vector<8x32xf32>
    %416 = tpu.matmul %85, %415, %cst_102 {dimension_numbers = #tpu.dot_dimension_numbers<[1], [0], [0], [1], [0, 0, 1, 1], [], []>} : vector<8x64xf32>, vector<64x32xf32>, vector<8x32xf32> -> vector<8x32xf32>
    %c0_103 = arith.constant 0 : index
    %c0_104 = arith.constant 0 : index
    %417 = vector.load %arg19[%c0_103, %c0_104] : memref<32x32xf32, #tpu.memory_space<vmem>>, vector<32x32xf32>
    %cst_105 = arith.constant dense<0.000000e+00> : vector<8x32xf32>
    %418 = tpu.matmul %413, %417, %cst_105 {dimension_numbers = #tpu.dot_dimension_numbers<[1], [0], [0], [1], [0, 0, 1, 1], [], []>} : vector<8x32xf32>, vector<32x32xf32>, vector<8x32xf32> -> vector<8x32xf32>
    %419 = arith.addf %416, %418 : vector<8x32xf32>
    %c0_106 = arith.constant 0 : index
    %c0_107 = arith.constant 0 : index
    %420 = vector.load %arg20[%c0_106, %c0_107] : memref<32x32xf32, #tpu.memory_space<vmem>>, vector<32x32xf32>
    %cst_108 = arith.constant dense<0.000000e+00> : vector<8x32xf32>
    %421 = tpu.matmul %414, %420, %cst_108 {dimension_numbers = #tpu.dot_dimension_numbers<[1], [0], [0], [1], [0, 0, 1, 1], [], []>} : vector<8x32xf32>, vector<32x32xf32>, vector<8x32xf32> -> vector<8x32xf32>
    %422 = arith.addf %419, %421 : vector<8x32xf32>
    %c0_109 = arith.constant 0 : index
    %c0_110 = arith.constant 0 : index
    %423 = vector.load %arg21[%c0_109, %c0_110] : memref<1x32xf32, #tpu.memory_space<vmem>>, vector<1x32xf32>
    %424 = vector.broadcast %423 : vector<1x32xf32> to vector<8x32xf32>
    %425 = arith.addf %422, %424 : vector<8x32xf32>
    %cst_111 = arith.constant 0.000000e+00 : f32
    %426 = vector.broadcast %cst_111 : f32 to vector<8x32xf32>
    %427 = arith.maximumf %425, %426 : vector<8x32xf32>
    %c0_112 = arith.constant 0 : index
    %c0_113 = arith.constant 0 : index
    %428 = vector.load %arg22[%c0_112, %c0_113] : memref<32x32xf32, #tpu.memory_space<vmem>>, vector<32x32xf32>
    %cst_114 = arith.constant dense<0.000000e+00> : vector<8x32xf32>
    %429 = tpu.matmul %427, %428, %cst_114 {dimension_numbers = #tpu.dot_dimension_numbers<[1], [0], [0], [1], [0, 0, 1, 1], [], []>} : vector<8x32xf32>, vector<32x32xf32>, vector<8x32xf32> -> vector<8x32xf32>
    %c0_115 = arith.constant 0 : index
    %c0_116 = arith.constant 0 : index
    %430 = vector.load %arg23[%c0_115, %c0_116] : memref<1x32xf32, #tpu.memory_space<vmem>>, vector<1x32xf32>
    %431 = vector.broadcast %430 : vector<1x32xf32> to vector<8x32xf32>
    %432 = arith.addf %429, %431 : vector<8x32xf32>
    %c0_117 = arith.constant 0 : index
    %c0_118 = arith.constant 0 : index
    %433 = vector.load %arg24[%c0_117, %c0_118] : memref<8x32xf32, #tpu.memory_space<vmem>>, vector<8x32xf32>
    tpu.vector_store %arg24[%c0_117, %c0_118], %432 {strides = array<i32>} : memref<8x32xf32, #tpu.memory_space<vmem>>, vector<8x32xf32>,
    return
  }
  func.func @transform_0(%arg0: i32) -> (i32, i32) {
    %c0_i32 = arith.constant 0 : i32
    %c0_i32_0 = arith.constant 0 : i32
    return %arg0, %c0_i32 : i32, i32
  }
  func.func @transform_1(%arg0: i32) -> (i32, i32, i32) {
    %c0_i32 = arith.constant 0 : i32
    %c0_i32_0 = arith.constant 0 : i32
    %c0_i32_1 = arith.constant 0 : i32
    return %arg0, %c0_i32, %c0_i32_0 : i32, i32, i32
  }
  func.func @transform_2(%arg0: i32) -> (i32, i32, i32) {
    %c0_i32 = arith.constant 0 : i32
    %c0_i32_0 = arith.constant 0 : i32
    %c0_i32_1 = arith.constant 0 : i32
    return %c0_i32, %arg0, %c0_i32_0 : i32, i32, i32
  }
  func.func @transform_3(%arg0: i32) -> (i32, i32) {
    %c0_i32 = arith.constant 0 : i32
    %c0_i32_0 = arith.constant 0 : i32
    return %arg0, %c0_i32 : i32, i32
  }
  func.func @transform_4(%arg0: i32) -> (i32, i32) {
    %c0_i32 = arith.constant 0 : i32
    %c0_i32_0 = arith.constant 0 : i32
    return %arg0, %c0_i32 : i32, i32
  }
  func.func @transform_5(%arg0: i32) -> (i32, i32) {
    %c0_i32 = arith.constant 0 : i32
    %c0_i32_0 = arith.constant 0 : i32
    return %arg0, %c0_i32 : i32, i32
  }
  func.func @transform_6(%arg0: i32) -> (i32, i32) {
    %c0_i32 = arith.constant 0 : i32
    %c0_i32_0 = arith.constant 0 : i32
    %c0_i32_1 = arith.constant 0 : i32
    return %c0_i32, %c0_i32_0 : i32, i32
  }
  func.func @transform_7(%arg0: i32) -> (i32, i32) {
    %c0_i32 = arith.constant 0 : i32
    %c0_i32_0 = arith.constant 0 : i32
    %c0_i32_1 = arith.constant 0 : i32
    return %c0_i32, %c0_i32_0 : i32, i32
  }
  func.func @transform_8(%arg0: i32) -> (i32, i32) {
    %c0_i32 = arith.constant 0 : i32
    %c0_i32_0 = arith.constant 0 : i32
    %c0_i32_1 = arith.constant 0 : i32
    return %c0_i32, %c0_i32_0 : i32, i32
  }
  func.func @transform_9(%arg0: i32) -> (i32, i32) {
    %c0_i32 = arith.constant 0 : i32
    %c0_i32_0 = arith.constant 0 : i32
    %c0_i32_1 = arith.constant 0 : i32
    return %c0_i32, %c0_i32_0 : i32, i32
  }
  func.func @transform_10(%arg0: i32) -> (i32, i32) {
    %c0_i32 = arith.constant 0 : i32
    %c0_i32_0 = arith.constant 0 : i32
    %c0_i32_1 = arith.constant 0 : i32
    return %c0_i32, %c0_i32_0 : i32, i32
  }
  func.func @transform_11(%arg0: i32) -> (i32, i32) {
    %c0_i32 = arith.constant 0 : i32
    %c0_i32_0 = arith.constant 0 : i32
    %c0_i32_1 = arith.constant 0 : i32
    return %c0_i32, %c0_i32_0 : i32, i32
  }
  func.func @transform_12(%arg0: i32) -> (i32, i32) {
    %c0_i32 = arith.constant 0 : i32
    %c0_i32_0 = arith.constant 0 : i32
    %c0_i32_1 = arith.constant 0 : i32
    return %c0_i32, %c0_i32_0 : i32, i32
  }
  func.func @transform_13(%arg0: i32) -> (i32, i32) {
    %c0_i32 = arith.constant 0 : i32
    %c0_i32_0 = arith.constant 0 : i32
    %c0_i32_1 = arith.constant 0 : i32
    return %c0_i32, %c0_i32_0 : i32, i32
  }
  func.func @transform_14(%arg0: i32) -> (i32, i32) {
    %c0_i32 = arith.constant 0 : i32
    %c0_i32_0 = arith.constant 0 : i32
    %c0_i32_1 = arith.constant 0 : i32
    return %c0_i32, %c0_i32_0 : i32, i32
  }
  func.func @transform_15(%arg0: i32) -> (i32, i32) {
    %c0_i32 = arith.constant 0 : i32
    %c0_i32_0 = arith.constant 0 : i32
    %c0_i32_1 = arith.constant 0 : i32
    return %c0_i32, %c0_i32_0 : i32, i32
  }
  func.func @transform_16(%arg0: i32) -> (i32, i32) {
    %c0_i32 = arith.constant 0 : i32
    %c0_i32_0 = arith.constant 0 : i32
    %c0_i32_1 = arith.constant 0 : i32
    return %c0_i32, %c0_i32_0 : i32, i32
  }
  func.func @transform_17(%arg0: i32) -> (i32, i32) {
    %c0_i32 = arith.constant 0 : i32
    %c0_i32_0 = arith.constant 0 : i32
    %c0_i32_1 = arith.constant 0 : i32
    return %c0_i32, %c0_i32_0 : i32, i32
  }
  func.func @transform_18(%arg0: i32) -> (i32, i32) {
    %c0_i32 = arith.constant 0 : i32
    %c0_i32_0 = arith.constant 0 : i32
    %c0_i32_1 = arith.constant 0 : i32
    return %c0_i32, %c0_i32_0 : i32, i32
  }
  func.func @transform_19(%arg0: i32) -> (i32, i32) {
    %c0_i32 = arith.constant 0 : i32
    %c0_i32_0 = arith.constant 0 : i32
    %c0_i32_1 = arith.constant 0 : i32
    return %c0_i32, %c0_i32_0 : i32, i32
  }
  func.func @transform_20(%arg0: i32) -> (i32, i32) {
    %c0_i32 = arith.constant 0 : i32
    %c0_i32_0 = arith.constant 0 : i32
    %c0_i32_1 = arith.constant 0 : i32
    return %c0_i32, %c0_i32_0 : i32, i32
  }
  func.func @transform_21(%arg0: i32) -> (i32, i32) {
    %c0_i32 = arith.constant 0 : i32
    %c0_i32_0 = arith.constant 0 : i32
    %c0_i32_1 = arith.constant 0 : i32
    return %c0_i32, %c0_i32_0 : i32, i32
  }
  func.func @transform_22(%arg0: i32) -> (i32, i32) {
    %c0_i32 = arith.constant 0 : i32
    %c0_i32_0 = arith.constant 0 : i32
    %c0_i32_1 = arith.constant 0 : i32
    return %c0_i32, %c0_i32_0 : i32, i32
  }
  func.func @transform_23(%arg0: i32) -> (i32, i32) {
    %c0_i32 = arith.constant 0 : i32
    %c0_i32_0 = arith.constant 0 : i32
    return %arg0, %c0_i32 : i32, i32
  }
}

</mosaic_0001>

<bundles_post_ra>
// kernel: tpu_custom_call.1
= control target key start
LH: loop header
LB: loop body
LE: loop exit
PB: predicated region body
PF: predicated region fallthrough
CT: control target
= control target key end

     0   :  { %s7212_s0 = inlined_call_operand.hbm [shape: f32[8,64], index: 0, kind: input, shape index: {}]   ;;  %s7213_s1 = inlined_call_operand.vmem [shape: f32[8,8,64], index: 1, kind: input, shape index: {}]   ;;  %s7214_s2 = inlined_call_operand.hbm [shape: f32[8,8,48], index: 2, kind: input, shape index: {}]   ;;  %s7215_s3 = inlined_call_operand.hbm [shape: f32[8,8], index: 3, kind: input, shape index: {}]   ;;  %s7216_s4 = inlined_call_operand.hbm [shape: f32[8,8], index: 4, kind: input, shape index: {}]   ;;  %s7217_s5 = inlined_call_operand.hbm [shape: f32[8,32], index: 5, kind: input, shape index: {}]   ;;  %s7218_s6 = inlined_call_operand.hbm [shape: f32[64,64], index: 6, kind: input, shape index: {}]   ;;  %s7219_s7 = inlined_call_operand.hbm [shape: f32[64,64], index: 7, kind: input, shape index: {}]   ;;  %s7220_s8 = inlined_call_operand.hbm [shape: f32[64,64], index: 8, kind: input, shape index: {}]   ;;  %s7221_s9 = inlined_call_operand.hbm [shape: f32[64,64], index: 9, kind: input, shape index: {}]   ;;  %s7222_s10 = inlined_call_operand.vmem [shape: f32[1,64], index: 10, kind: input, shape index: {}]   ;;  %s7223_s11 = inlined_call_operand.vmem [shape: f32[1,64], index: 11, kind: input, shape index: {}]   ;;  %s7224_s12 = inlined_call_operand.vmem [shape: f32[1,64], index: 12, kind: input, shape index: {}]   ;;  %s7225_s13 = inlined_call_operand.vmem [shape: f32[48,96], index: 13, kind: input, shape index: {}]   ;;  %s7226_s14 = inlined_call_operand.hbm [shape: f32[32,96], index: 14, kind: input, shape index: {}]   ;;  %s7227_s15 = inlined_call_operand.vmem [shape: f32[1,96], index: 15, kind: input, shape index: {}]   ;;  %s7228_s16 = inlined_call_operand.vmem [shape: f32[1,96], index: 16, kind: input, shape index: {}]   ;;  %s7229_s17 = inlined_call_operand.vmem [shape: f32[64,32], index: 17, kind: input, shape index: {}]   ;;  %s7230_s18 = inlined_call_operand.hbm [shape: f32[32,32], index: 18, kind: input, shape index: {}]   ;;  %s7231_s19 = inlined_call_operand.hbm [shape: f32[32,32], index: 19, kind: input, shape index: {}]   ;;  %s7232_s20 = inlined_call_operand.vmem [shape: f32[1,32], index: 20, kind: input, shape index: {}]   ;;  %s7233_s21 = inlined_call_operand.hbm [shape: f32[32,32], index: 21, kind: input, shape index: {}]   ;;  %s7234_s22 = inlined_call_operand.vmem [shape: f32[1,32], index: 22, kind: input, shape index: {}]   ;;  %s7235_s23 = inlined_call_operand.hbm [shape: f32[8,32], index: 23, kind: output, shape index: {}]  }
   0x1   :  { %7240 = sst [smem:[#allocation32_spill]] %s7212_s0 }
   0x2   :  { %7241 = sst [smem:[#allocation33_spill]] %s7213_s1 }
   0x3   :  { %7242 = sst [smem:[#allocation34_spill]] %s7214_s2 }
   0x4   :  { %7243 = sst [smem:[#allocation35_spill]] %s7215_s3 }
   0x5   :  { %7244 = sst [smem:[#allocation36_spill]] %s7216_s4 }
   0x6   :  { %7245 = sst [smem:[#allocation37_spill]] %s7217_s5 }
   0x7   :  { %7246 = sst [smem:[#allocation38_spill]] %s7218_s6 }
   0x8   :  { %7247 = sst [smem:[#allocation39_spill]] %s7219_s7 }
   0x9   :  { %28 = vsyncpa [#allocation3], 0 }
   0xa   :  { %29 = vsyncpa [#allocation6], 0 }
   0xb   :  { %30 = vsyncpa [#allocation9], 0 }
   0xc   :  { %31 = vsyncpa [#allocation12], 0 }
   0xd   :  { %32 = vsyncpa [#allocation15], 0 }
   0xe   :  { %33 = vsyncpa [#allocation18], 0 }
   0xf   :  { %34 = vsyncpa [#allocation21], 0 }
  0x10   :  { %35 = vsyncpa [#allocation4], 0  ;;  %s6115_s4 = smov [#allocation5]  }
  0x11   :  { %s53_s30 = sshll.u32 %s6115_s4, 4  ;;  %s54_s30 = int_to_ptr.vmem [resolvable:$true] %s53_s30 }
  0x12   :  { %s5827_s24 = scalar_lea.vmem %s54_s30, 1024  ;;  %p5832_p1 = scmp.lt.s32.totalorder %s54_s30, %s54_s30 }
  0x13   :  { %p5828_p0 = scmp.ne.s32.totalorder %s54_s30, %s5827_s24  ;;  %p5833_p2 = scmp.lt.s32.totalorder %s5827_s24, %s5827_s24 }
  0x15   :  { %p5834_p3 = por %p5833_p2, %p5832_p1 }
  0x17   :  { %p5835_p4 = pnand %p5834_p3, %p5828_p0 }
  0x19   :  { %5838 = shalt.err (!%p5835_p4)
}
  0x1a   :  { %s6116_s25 = smov 128   ;;  %s6117_s5 = smov 8  }
  0x1b   :  { %s7248_s2 = sld [smem:[#allocation34_spill]]  ;;  %s6118_s6 = smov [#allocation8]  }
  0x1c   :  { %s76_s27 = sshll.u32 %s6118_s6, 4  ;;  %s6119_s7 = smov [#allocation11]   ;;  %s77_s27 = int_to_ptr.vmem [resolvable:$true] %s76_s27 }
  0x1d   :  { %s95_s28 = sshll.u32 %s6119_s7, 4  ;;  %s5847_s29 = scalar_lea.vmem %s77_s27, 128  ;;  %s96_s28 = int_to_ptr.vmem [resolvable:$true] %s95_s28 }
  0x1e   :  { %p5848_p5 = scmp.ne.s32.totalorder %s77_s27, %s5847_s29  ;;  %p5852_p6 = scmp.lt.s32.totalorder %s77_s27, %s77_s27 }
  0x1f   :  { %p5853_p7 = scmp.lt.s32.totalorder %s5847_s29, %s5847_s29 }
  0x21   :  { %59 = dma.hbm_to_vmem [thread:$0]  %s7248_s2, 1024, %s54_s30, [#allocation6], %s6116_s25, %s6116_s25, %s6117_s5  }
  0x22   :  { %p5854_p8 = por %p5853_p7, %p5852_p6 }
  0x24   :  { %p5855_p9 = pnand %p5854_p8, %p5848_p5 }
  0x26   :  { %5858 = shalt.err (!%p5855_p9)
}
  0x27   :  { %s7249_s4 = sld [smem:[#allocation36_spill]]  ;;  %s5867_s24 = scalar_lea.vmem %s96_s28, 1024 }
  0x28   :  { %p5868_p10 = scmp.ne.s32.totalorder %s96_s28, %s5867_s24  ;;  %p5872_p11 = scmp.lt.s32.totalorder %s96_s28, %s96_s28 }
  0x29   :  { %p5873_p12 = scmp.lt.s32.totalorder %s5867_s24, %s5867_s24 }
  0x2b   :  { %p5874_p13 = por %p5873_p12, %p5872_p11 }
  0x2d   :  { %79 = dma.hbm_to_vmem [thread:$0]  %s7249_s4, 128, %s77_s27, [#allocation9]  }
  0x2e   :  { %p5875_p0 = pnand %p5874_p13, %p5868_p10 }
  0x30   :  { %5878 = shalt.err (!%p5875_p0)
}
  0x31   :  { %s7250_s26 = sld [smem:[#allocation38_spill]]  ;;  %s6120_s2 = smov [#allocation14]  }
  0x32   :  { %s119_s6 = sshll.u32 %s6120_s2, 4  ;;  %s6121_s7 = smov [#allocation17]   ;;  %s120_s6 = int_to_ptr.vmem [resolvable:$true] %s119_s6 }
  0x33   :  { %s151_s27 = sshll.u32 %s6121_s7, 4  ;;  %s5887_s29 = scalar_lea.vmem %s120_s6, 1024  ;;  %s152_s27 = int_to_ptr.vmem [resolvable:$true] %s151_s27 }
  0x34   :  { %p5888_p1 = scmp.ne.s32.totalorder %s120_s6, %s5887_s29  ;;  %p5892_p2 = scmp.lt.s32.totalorder %s120_s6, %s120_s6 }
  0x35   :  { %p5893_p3 = scmp.lt.s32.totalorder %s5887_s29, %s5887_s29 }
  0x37   :  { %101 = dma.hbm_to_vmem [thread:$0]  %s7250_s26, 1024, %s96_s28, [#allocation12], %s6116_s25, %s6116_s25, %s6117_s5  }
  0x38   :  { %p5894_p4 = por %p5893_p3, %p5892_p2 }
  0x3a   :  { %p5895_p5 = pnand %p5894_p4, %p5888_p1 }
  0x3c   :  { %5898 = shalt.err (!%p5895_p5)
}
  0x3d   :  { %125 = dma.hbm_to_vmem [thread:$0]  %s7220_s8, 1024, %s120_s6, [#allocation15], %s6116_s25, %s6116_s25, %s6117_s5  }
  0x3e   :  { %s5907_s28 = scalar_lea.vmem %s152_s27, 512  ;;  %p5912_p7 = scmp.lt.s32.totalorder %s152_s27, %s152_s27 }
  0x3f   :  { %p5908_p6 = scmp.ne.s32.totalorder %s152_s27, %s5907_s28  ;;  %p5913_p8 = scmp.lt.s32.totalorder %s5907_s28, %s5907_s28 }
  0x41   :  { %p5914_p9 = por %p5913_p8, %p5912_p7 }
  0x43   :  { %p5915_p10 = pnand %p5914_p9, %p5908_p6 }
  0x45   :  { %5918 = shalt.err (!%p5915_p10)
}
  0x46   :  { %157 = dma.hbm_to_vmem [thread:$0]  %s7226_s14, 512, %s152_s27, [#allocation18], %s6116_s25, %s6116_s25, %s6117_s5  }
  0x47   :  { %s6122_s30 = smov [#allocation20]   ;;  %s6123_s26 = smov [#allocation2]  }
  0x48   :  { %s181_s1 = sshll.u32 %s6122_s30, 4  ;;  %s42_s8 = sshll.u32 %s6123_s26, 4  ;;  %s182_s1 = int_to_ptr.vmem [resolvable:$true] %s181_s1  ;;  %s43_s8 = int_to_ptr.vmem [resolvable:$true] %s42_s8 }
  0x49   :  { %s5927_s2 = scalar_lea.vmem %s182_s1, 512  ;;  %p5932_p12 = scmp.lt.s32.totalorder %s182_s1, %s182_s1 }
  0x4a   :  { %p5928_p11 = scmp.ne.s32.totalorder %s182_s1, %s5927_s2  ;;  %p5933_p13 = scmp.lt.s32.totalorder %s5927_s2, %s5927_s2 }
  0x4c   :  { %p5934_p0 = por %p5933_p13, %p5932_p12 }
  0x4e   :  { %p5935_p1 = pnand %p5934_p0, %p5928_p11 }
  0x50   :  { %5938 = shalt.err (!%p5935_p1)
}
  0x51   :  { %187 = dma.hbm_to_vmem [thread:$0]  %s7231_s19, 512, %s182_s1, [#allocation21], %s6116_s25, %s6116_s25, %s6117_s5  }
  0x52   :  { %s5947_s14 = scalar_lea.vmem %s43_s8, 128  ;;  %p5952_p3 = scmp.lt.s32.totalorder %s43_s8, %s43_s8 }
  0x53   :  { %p5948_p2 = scmp.ne.s32.totalorder %s43_s8, %s5947_s14  ;;  %p5953_p4 = scmp.lt.s32.totalorder %s5947_s14, %s5947_s14 }
  0x55   :  { %p5954_p5 = por %p5953_p4, %p5952_p3 }
  0x57   :  { %p5955_p6 = pnand %p5954_p5, %p5948_p2 }
  0x59   :  { %5958 = shalt.err (!%p5955_p6)
}
  0x5a   :  { %s7251_s3 = sld [smem:[#allocation32_spill]]  ;;  %s6124_s0 = smov [#allocation7]  }
  0x5b   :  { %s66_s28 = sshll.u32 %s6124_s0, 4  ;;  %s6125_s4 = smov [#allocation10]   ;;  %s67_s28 = int_to_ptr.vmem [resolvable:$true] %s66_s28 }
  0x5c   :  { %s86_s24 = sshll.u32 %s6125_s4, 4  ;;  %s5967_s30 = scalar_lea.vmem %s67_s28, 128  ;;  %s87_s24 = int_to_ptr.vmem [resolvable:$true] %s86_s24 }
  0x5d   :  { %p5968_p7 = scmp.ne.s32.totalorder %s67_s28, %s5967_s30  ;;  %p5972_p8 = scmp.lt.s32.totalorder %s67_s28, %s67_s28 }
  0x5e   :  { %p5973_p9 = scmp.lt.s32.totalorder %s5967_s30, %s5967_s30 }
  0x60   :  { %45 = dma.hbm_to_vmem [thread:$0]  %s7251_s3, 128, %s43_s8, [#allocation3]  }
  0x61   :  { %p5974_p10 = por %p5973_p9, %p5972_p8 }
  0x63   :  { %p5975_p11 = pnand %p5974_p10, %p5968_p7 }
  0x65   :  { %5978 = shalt.err (!%p5975_p11)
}
  0x66   :  { %s7252_s26 = sld [smem:[#allocation35_spill]]  ;;  %s5987_s2 = scalar_lea.vmem %s87_s24, 128 }
  0x67   :  { %p5988_p12 = scmp.ne.s32.totalorder %s87_s24, %s5987_s2  ;;  %p5992_p13 = scmp.lt.s32.totalorder %s87_s24, %s87_s24 }
  0x68   :  { %p5993_p0 = scmp.lt.s32.totalorder %s5987_s2, %s5987_s2 }
  0x6a   :  { %p5994_p1 = por %p5993_p0, %p5992_p13 }
  0x6c   :  { %69 = dma.hbm_to_vmem [thread:$0]  %s7252_s26, 128, %s67_s28, [#allocation6]  }
  0x6d   :  { %p5995_p2 = pnand %p5994_p1, %p5988_p12 }
  0x6f   :  { %5998 = shalt.err (!%p5995_p2)
}
  0x70   :  { %s7253_s7 = sld [smem:[#allocation37_spill]]  ;;  %s6126_s14 = smov [#allocation13]  }
  0x71   :  { %s107_s27 = sshll.u32 %s6126_s14, 4  ;;  %s6127_s29 = smov [#allocation16]   ;;  %s108_s27 = int_to_ptr.vmem [resolvable:$true] %s107_s27 }
  0x72   :  { %s131_s3 = sshll.u32 %s6127_s29, 4  ;;  %s6007_s0 = scalar_lea.vmem %s108_s27, 1024  ;;  %s132_s3 = int_to_ptr.vmem [resolvable:$true] %s131_s3 }
  0x73   :  { %p6008_p3 = scmp.ne.s32.totalorder %s108_s27, %s6007_s0  ;;  %p6012_p4 = scmp.lt.s32.totalorder %s108_s27, %s108_s27 }
  0x74   :  { %p6013_p5 = scmp.lt.s32.totalorder %s6007_s0, %s6007_s0 }
  0x76   :  { %89 = dma.hbm_to_vmem [thread:$0]  %s7253_s7, 128, %s87_s24, [#allocation9]  }
  0x77   :  { %p6014_p6 = por %p6013_p5, %p6012_p4 }
  0x79   :  { %p6015_p7 = pnand %p6014_p6, %p6008_p3 }
  0x7b   :  { %6018 = shalt.err (!%p6015_p7)
}
  0x7c   :  { %s7254_s30 = sld [smem:[#allocation39_spill]]  ;;  %s6027_s24 = scalar_lea.vmem %s132_s3, 1024 }
  0x7d   :  { %p6028_p8 = scmp.ne.s32.totalorder %s132_s3, %s6027_s24  ;;  %p6032_p9 = scmp.lt.s32.totalorder %s132_s3, %s132_s3 }
  0x7e   :  { %p6033_p10 = scmp.lt.s32.totalorder %s6027_s24, %s6027_s24 }
  0x80   :  { %p6034_p11 = por %p6033_p10, %p6032_p9 }
  0x82   :  { %113 = dma.hbm_to_vmem [thread:$0]  %s7254_s30, 1024, %s108_s27, [#allocation12], %s6116_s25, %s6116_s25, %s6117_s5  }
  0x83   :  { %p6035_p12 = pnand %p6034_p11, %p6028_p8 }
  0x85   :  { %6038 = shalt.err (!%p6035_p12)
}
  0x86   :  { %137 = dma.hbm_to_vmem [thread:$0]  %s7221_s9, 1024, %s132_s3, [#allocation15], %s6116_s25, %s6116_s25, %s6117_s5  }
  0x87   :  { %s6128_s26 = smov [#allocation19]   ;;  %s6129_s8 = smov [#allocation22]  }
  0x88   :  { %s169_s2 = sshll.u32 %s6128_s26, 4  ;;  %s195_s6 = sshll.u32 %s6129_s8, 4  ;;  %s170_s2 = int_to_ptr.vmem [resolvable:$true] %s169_s2  ;;  %s196_s6 = int_to_ptr.vmem [resolvable:$true] %s195_s6 }
  0x89   :  { %s6047_s7 = scalar_lea.vmem %s170_s2, 512  ;;  %p6052_p0 = scmp.lt.s32.totalorder %s170_s2, %s170_s2 }
  0x8a   :  { %p6048_p13 = scmp.ne.s32.totalorder %s170_s2, %s6047_s7  ;;  %p6053_p1 = scmp.lt.s32.totalorder %s6047_s7, %s6047_s7 }
  0x8c   :  { %p6054_p2 = por %p6053_p1, %p6052_p0 }
  0x8e   :  { %p6055_p3 = pnand %p6054_p2, %p6048_p13 }
  0x90   :  { %6058 = shalt.err (!%p6055_p3)
}
  0x91   :  { %175 = dma.hbm_to_vmem [thread:$0]  %s7230_s18, 512, %s170_s2, [#allocation18], %s6116_s25, %s6116_s25, %s6117_s5  }
  0x92   :  { %s6067_s9 = scalar_lea.vmem %s196_s6, 512  ;;  %p6072_p5 = scmp.lt.s32.totalorder %s196_s6, %s196_s6 }
  0x93   :  { %p6068_p4 = scmp.ne.s32.totalorder %s196_s6, %s6067_s9  ;;  %p6073_p6 = scmp.lt.s32.totalorder %s6067_s9, %s6067_s9 }
  0x95   :  { %p6074_p7 = por %p6073_p6, %p6072_p5 }
  0x97   :  { %p6075_p8 = pnand %p6074_p7, %p6068_p4 }
  0x99   :  { %6078 = shalt.err (!%p6075_p8)
}
  0x9a   :  { %201 = dma.hbm_to_vmem [thread:$0]  %s7233_s21, 512, %s196_s6, [#allocation21], %s6116_s25, %s6116_s25, %s6117_s5  }
  0x9b   :  { %6099 = dma.done.wait [#allocation3], 128  }
  0x9c   :  { %6100 = vsyncadd [#allocation3], 4294967168 }
  0x9d   :  { %6101 = dma.done.wait [#allocation6], 1152  }
  0x9e   :  { %6102 = vsyncadd [#allocation6], 4294966144 }
  0x9f   :  { %6103 = dma.done.wait [#allocation9], 256  }
  0xa0   :  { %6104 = vsyncadd [#allocation9], 4294967040 }
  0xa1   :  { %6105 = dma.done.wait [#allocation12], 2048  }
  0xa2   :  { %6106 = vsyncadd [#allocation12], 4294965248 }
  0xa3   :  { %6107 = dma.done.wait [#allocation15], 2048  }
  0xa4   :  { %6108 = vsyncadd [#allocation15], 4294965248 }
  0xa5   :  { %6109 = dma.done.wait [#allocation18], 1024  }
  0xa6   :  { %6110 = vsyncadd [#allocation18], 4294966272 }
  0xa7   :  { %6111 = dma.done.wait [#allocation21], 1024  }
  0xa8   :  { %6112 = vsyncadd [#allocation21], 4294966272  ;;  %v6130_v0 = vmov 0.0   ;;  %vm6131_vm0 = vmmov 0   ;;  %v342_v1 = vld [vmem:[#allocation13 + $0x38] sm:$0xff]  ;;  %v341_v3 = vld [vmem:[#allocation13 + $0x30] sm:$0xff]  ;;  %v590_v36 = vlaneseq }
  0xa9   :  { %5243 = vmatprep.subr.mxu0 %v6130_v0  ;;  %5259 = vmatprep.mubr.msk.f32.mxu0 %vm6131_vm0, %v6130_v0  ;;  %v260_v2 = vld [vmem:[#allocation11 + $0x38] sm:$0xff]  ;;  %v259_v4 = vld [vmem:[#allocation11 + $0x30] sm:$0xff]  ;;  %v340_v5 = vld [vmem:[#allocation13 + $0x28] sm:$0xff]  ;;  %s7255_s25 = sld [smem:[#allocation33_spill]]  ;;  %vm7237_vm1 = vcmask 523264   ;;  %vm7238_vm2 = vcmask 261120  }
  0xaa   :  { %5262 = vmatprep.subr.mxu1 %v342_v1  ;;  %5244 = vmatpush3.msra.mxu0 %v260_v2  ;;  %v258_v6 = vld [vmem:[#allocation11 + $0x28] sm:$0xff]  ;;  %v339_v7 = vld [vmem:[#allocation13 + $0x20] sm:$0xff]  ;;  %v338_v9 = vld [vmem:[#allocation13 + $0x18] sm:$0xff]  ;;  %v6132_v34 = vmov 1966171168   ;;  %v591_v38 = vshrl.u32 %v590_v36, 7 }
  0xab   :  { %5263 = vmatpush3.msra.mxu1 %v342_v1  ;;  %5245 = vmatprep.subr.mxu0 %v6130_v0  ;;  %v257_v8 = vld [vmem:[#allocation11 + $0x20] sm:$0xff]  ;;  %v256_v10 = vld [vmem:[#allocation11 + $0x18] sm:$0xff]  ;;  %v337_v11 = vld [vmem:[#allocation13 + $0x10] sm:$0xff]  ;;  %v588_v35 = vunpack.c.l.s4 %v6132_v34  ;;  %vm1318_vm4 = vcmask 57344   ;;  %s6133_s27 = smov 96   ;;  %vm1407_vm12 = vcmask 64512  }
  0xac   :  { %5264 = vmatprep.subr.mxu1 %v341_v3  ;;  %5246 = vmatpush3.msra.mxu0 %v259_v4  ;;  %v255_v12 = vld [vmem:[#allocation11 + $0x10] sm:$0xff]  ;;  %v336_v13 = vld [vmem:[#allocation13 + $0x8] sm:$0xff]  ;;  %v335_v15 = vld [vmem:[#allocation13] sm:$0xff]  ;;  %v6395_v46 = vsub.s32 0, %v591_v38  ;;  %vm3377_vm13 = vcmask 1041409   ;;  %vm3380_vm14 = vcmask 1042434  }
  0xad   :  { %5265 = vmatpush3.msra.mxu1 %v341_v3  ;;  %5247 = vmatprep.subr.mxu0 %v6130_v0  ;;  %v254_v14 = vld [vmem:[#allocation11 + $0x8] sm:$0xff]  ;;  %v253_v17 = vld [vmem:[#allocation11] sm:$0xff]  ;;  %v479_v21 = vld [vmem:[#allocation14 + $0x38] sm:$0xff]  ;;  %v589_v37 = vunpack.c.0.s8 %v588_v35  ;;  %vm3383_vm15 = vcmask 1043459   ;;  %s6136_s26 = smov 64   ;;  %s6144_s2 = smov [#allocation23]  }
  0xae   :  { %5266 = vmatprep.subr.mxu1 %v340_v5  ;;  %5248 = vmatpush3.msra.mxu0 %v258_v6  ;;  %v243_v19 = vld [vmem:[#allocation2] sm:$0xff]  ;;  %v478_v22 = vld [vmem:[#allocation14 + $0x30] sm:$0xff]  ;;  %v477_v25 = vld [vmem:[#allocation14 + $0x28] sm:$0xff]  ;;  %s4935_s8 = sshll.u32 %s6144_s2, 4  ;;  %s4936_s8 = int_to_ptr.vmem [resolvable:$true] %s4935_s8 }
  0xaf   :  { %5267 = vmatpush3.msra.mxu1 %v340_v5  ;;  %5249 = vmatprep.subr.mxu0 %v6130_v0  ;;  %v244_v16 = vld [vmem:[%s7255_s25] sm:$0xff]  ;;  %v245_v18 = vld [vmem:[%s7255_s25 + $0x8] sm:$0xff]  ;;  %v246_v20 = vld [vmem:[%s7255_s25 + $0x10] sm:$0xff]  ;;  %v6388_v39 = vsub.s32 %v589_v37, %v591_v38  ;;  %p6084_p10 = scmp.lt.s32.totalorder %s4936_s8, %s4936_s8 }
  0xb0   :  { %5268 = vmatprep.subr.mxu1 %v339_v7  ;;  %5250 = vmatpush3.msra.mxu0 %v257_v8  ;;  %v247_v23 = vld [vmem:[%s7255_s25 + $0x18] sm:$0xff]  ;;  %v248_v24 = vld [vmem:[%s7255_s25 + $0x20] sm:$0xff]  ;;  %v249_v27 = vld [vmem:[%s7255_s25 + $0x28] sm:$0xff] }
  0xb1   :  { %5269 = vmatpush3.msra.mxu1 %v339_v7  ;;  %5251 = vmatprep.subr.mxu0 %v6130_v0  ;;  %v476_v26 = vld [vmem:[#allocation14 + $0x20] sm:$0xff]  ;;  %v250_v28 = vld [vmem:[%s7255_s25 + $0x30] sm:$0xff]  ;;  %v475_v29 = vld [vmem:[#allocation14 + $0x18] sm:$0xff] }
  0xb2   :  { %5270 = vmatprep.subr.mxu1 %v338_v9  ;;  %5252 = vmatpush3.msra.mxu0 %v256_v10  ;;  %v474_v30 = vld [vmem:[#allocation14 + $0x10] sm:$0xff]  ;;  %v251_v31 = vld [vmem:[%s7255_s25 + $0x38] sm:$0xff]  ;;  %v473_v32 = vld [vmem:[#allocation14 + $0x8] sm:$0xff] }
  0xb3   :  { %5271 = vmatpush3.msra.mxu1 %v338_v9  ;;  %5253 = vmatprep.subr.mxu0 %v6130_v0  ;;  %v472_v33 = vld [vmem:[#allocation14] sm:$0xff] }
  0xb4   :  { %5272 = vmatprep.subr.mxu1 %v337_v11  ;;  %5254 = vmatpush3.msra.mxu0 %v255_v12 }
  0xb5   :  { %5273 = vmatpush3.msra.mxu1 %v337_v11  ;;  %5255 = vmatprep.subr.mxu0 %v6130_v0 }
  0xb6   :  { %5274 = vmatprep.subr.mxu1 %v336_v13  ;;  %5256 = vmatpush3.msra.mxu0 %v254_v14 }
  0xb7   :  { %5275 = vmatpush3.msra.mxu1 %v336_v13  ;;  %5257 = vmatprep.subr.mxu0 %v6130_v0  ;;  %v252_v13 = vld [vmem:[#allocation8] sm:$0xff] }
  0xb8   :  { %5276 = vmatprep.subr.mxu1 %v335_v15  ;;  %5278 = vmatprep.mubr.msk.f32.mxu1 %vm7237_vm1, %v244_v16 }
  0xb9   :  { %5277 = vmatpush3.msra.mxu1 %v335_v15  ;;  %5258 = vmatpush3.msra.mxu0 %v253_v17  ;;  %v593_v15 = vrot.slane %v252_v13, %v6388_v39 }
  0xba   :  { %5279 = vmatmul.mubr.msk.f32.vlgmr.msra.gmra.mxu1 %vm7237_vm1, %v245_v18  ;;  %5260 = vmatmul.mubr.msk.f32.vlgmr.msra.gmra.mxu0 %vm7237_vm1, %v243_v19  ;;  %v586_v19 = vcombine.high %v252_v13, %v252_v13 }
  0xbb   :  { %5281 = vmatprep.mubr.msk.f32.mxu1 %vm7237_vm1, %v246_v20  ;;  %5290 = vmatprep.subr.mxu0 %v479_v21  ;;  %v6528_v17 = vrot.slane %v593_v15, %v6388_v39 }
  0xbc   :  { %5291 = vmatpush3.msra.mxu0 %v479_v21  ;;  %5306 = vmatprep.mubr.msk.f32.mxu0 %vm7237_vm1, %v244_v16 }
  0xbd   :  { %5292 = vmatprep.subr.mxu0 %v478_v22  ;;  %5318 = vmatprep.subr.mxu1 %v6130_v0  ;;  %vm1302_vm3 = vcmp.gt.f32.partialorder %v6528_v17, 0.0 }
  0xbe   :  { %5282 = vmatmul.mubr.msk.f32.gmra.mxu1 %vm7237_vm1, %v247_v23  ;;  %5293 = vmatpush3.msra.mxu0 %v478_v22 }
  0xbf   :  { %5284 = vmatprep.mubr.msk.f32.mxu1 %vm7237_vm1, %v248_v24  ;;  %5294 = vmatprep.subr.mxu0 %v477_v25 }
  0xc0   :  { %5295 = vmatpush3.msra.mxu0 %v477_v25 }
  0xc1   :  { %5296 = vmatprep.subr.mxu0 %v476_v26 }
  0xc2   :  { %5285 = vmatmul.mubr.msk.f32.gmra.mxu1 %vm7237_vm1, %v249_v27  ;;  %5297 = vmatpush3.msra.mxu0 %v476_v26 }
  0xc3   :  { %5287 = vmatprep.mubr.msk.f32.mxu1 %vm7237_vm1, %v250_v28  ;;  %5298 = vmatprep.subr.mxu0 %v475_v29 }
  0xc4   :  { %5299 = vmatpush3.msra.mxu0 %v475_v29 }
  0xc5   :  { %5300 = vmatprep.subr.mxu0 %v474_v30 }
  0xc6   :  { %5288 = vmatmul.mubr.msk.f32.gmra.mxu1 %vm7237_vm1, %v251_v31  ;;  %5301 = vmatpush3.msra.mxu0 %v474_v30 }
  0xc7   :  { %5302 = vmatprep.subr.mxu0 %v473_v32  ;;  %5320 = vmatprep.mubr.msk.f32.mxu1 %vm6131_vm0, %v6130_v0 }
  0xc8   :  { %5303 = vmatpush3.msra.mxu0 %v473_v32 }
  0xc9   :  { %5304 = vmatprep.subr.mxu0 %v472_v33 }
  0xca   :  { %5305 = vmatpush3.msra.mxu0 %v472_v33 }
  0xcb   :  { %5307 = vmatmul.mubr.msk.f32.vlgmr.msra.gmra.mxu0 %vm7237_vm1, %v245_v18  ;;  %5338 = vmatprep.subr.mxu0 %v6130_v0  ;;  %v601_v18 = vcombine.high %v593_v15, %v593_v15 }
  0xcc   :  { %5309 = vmatprep.mubr.msk.f32.mxu0 %vm7237_vm1, %v246_v20 }
  0xcd   :  { %v6534_v22 = vrot.slane %v601_v18, %v6388_v39 }
  0xcf   :  { %5310 = vmatmul.mubr.msk.f32.gmra.mxu0 %vm7237_vm1, %v247_v23  ;;  %v600_v23 = vrot.slane %v586_v19, %v6388_v39  ;;  %vm1303_vm5 = vcmp.gt.f32.partialorder %v6534_v22, 0.0 }
  0xd0   :  { %5312 = vmatprep.mubr.msk.f32.mxu0 %vm7237_vm1, %v248_v24 }
  0xd3   :  { %5313 = vmatmul.mubr.msk.f32.gmra.mxu0 %vm7237_vm1, %v249_v27  ;;  %v631_v27 = vcombine.high %v6528_v17, %v6528_v17 }
  0xd4   :  { %5315 = vmatprep.mubr.msk.f32.mxu0 %vm7237_vm1, %v250_v28 }
  0xd5   :  { %vm6555_vm6 = vcmp.gt.f32.partialorder %v631_v27, 0.0 }
  0xd7   :  { %5316 = vmatmul.mubr.msk.f32.gmra.mxu0 %vm7237_vm1, %v251_v31  ;;  %v6549_v31 = vrot.slane %v600_v23, %v6388_v39  ;;  %vm7239_vm1 = vcmask 1044484  }
  0xd8   :  { %5340 = vmatprep.mubr.msk.f32.mxu0 %vm6131_vm0, %v6130_v0 }
  0xd9   :  { %vm1306_vm7 = vcmp.gt.f32.partialorder %v6549_v31, 0.0 }
 0x17a   :  { %v6390_v40 = vpop.f32.mrf.mxu1  ;;  %v331_v41 = vpop.f32.mrf.mxu0 }
 0x17b   :  { %v644_v42 = vcombine.high %v331_v41, %v331_v41  ;;  %v651_v43 = vrot.slane %v331_v41, %v6388_v39  ;;  %v633_v41 = vcombine.high %v6534_v22, %v6534_v22 }
 0x17c   :  { %v6393_v44 = vpop.f32.mrf.mxu1  ;;  %v5261_v45 = vpop.f32.mrf.mxu0 }
 0x17d   :  { %v658_v47 = vrot.slane %v644_v42, %v6388_v39  ;;  %v659_v48 = vcombine.high %v651_v43, %v651_v43  ;;  %v6399_v49 = vrot.slane %v651_v43, %v6388_v39  ;;  %5319 = vmatpush3.xpose.msk.msra.mxu1 %vm7238_vm2, %v6393_v44  ;;  %v632_v42 = vcombine.high %v6549_v31, %v6549_v31 }
 0x17e   :  { %v6403_v50 = vpop.f32.mrf.mxu1  ;;  %5323 = vmatprep.subr.mxu1 %v6130_v0  ;;  %vm6572_vm8 = vcmp.gt.f32.partialorder %v633_v41, 0.0 }
 0x17f   :  { %v660_v51 = vcombine.high %v658_v47, %v658_v47  ;;  %v6407_v52 = vrot.slane %v658_v47, %v6388_v39  ;;  %v6410_v53 = vrot.slane %v659_v48, %v6388_v39  ;;  %v6414_v54 = vcombine.high %v6399_v49, %v6399_v49 }
 0x180   :  { %v6416_v55 = vpop.f32.mrf.mxu1  ;;  %5321 = vmatmul.mubr.msk.f32.vlgmr.msra.gmra.mxu1 %vm7238_vm2, %v6399_v49  ;;  %v1995_v56 = vrot.slane %v6399_v49, %v6395_v46  ;;  %vm6576_vm9 = vcmp.gt.f32.partialorder %v632_v42, 0.0 }
 0x181   :  { %v6423_v57 = vrot.slane %v660_v51, %v6388_v39  ;;  %v6427_v58 = vcombine.high %v6407_v52, %v6407_v52  ;;  %v6431_v59 = vcombine.high %v6410_v53, %v6410_v53  ;;  %5324 = vmatpush3.xpose.msk.msra.mxu1 %vm7238_vm2, %v6390_v40  ;;  %5325 = vmatprep.mubr.msk.f32.mxu1 %vm6131_vm0, %v6130_v0 }
 0x182   :  { %v6437_v60 = vpop.f32.mrf.mxu1  ;;  %5328 = vmatprep.subr.mxu1 %v6130_v0  ;;  %v2077_v61 = vrot.slane %v6410_v53, %v6395_v46  ;;  %v2159_v62 = vrot.slane %v6414_v54, %v6395_v46  ;;  %v2323_v63 = vrot.slane %v6407_v52, %v6395_v46 }
 0x183   :  { %v6448_v1 = vcombine.high %v6423_v57, %v6423_v57  ;;  %v2241_v2 = vrot.slane %v6431_v59, %v6395_v46  ;;  %v2487_v3 = vrot.slane %v6427_v58, %v6395_v46  ;;  %v2405_v4 = vrot.slane %v6423_v57, %v6395_v46 }
 0x184   :  { %v6456_v5 = vpop.f32.mrf.mxu1  ;;  %5326 = vmatmul.mubr.msk.f32.vlgmr.msra.gmra.mxu1 %vm7238_vm2, %v6410_v53 }
 0x185   :  { %5329 = vmatpush3.xpose.msk.msra.mxu1 %vm7238_vm2, %v6416_v55  ;;  %5339 = vmatpush3.xpose.msk.msra.mxu0 %vm7238_vm2, %v6456_v5  ;;  %v2569_v6 = vrot.slane %v6448_v1, %v6395_v46 }
 0x186   :  { %v6466_v7 = vpop.f32.mrf.mxu1  ;;  %5330 = vmatprep.mubr.msk.f32.mxu1 %vm6131_vm0, %v6130_v0  ;;  %5333 = vmatprep.subr.mxu1 %v6130_v0 }
 0x187   :  { %5348 = vmatprep.subr.mxu0 %v6130_v0 }
 0x188   :  { %v6472_v8 = vpop.f32.mrf.mxu1  ;;  %5331 = vmatmul.mubr.msk.f32.vlgmr.msra.gmra.mxu1 %vm7238_vm2, %v6414_v54  ;;  %5341 = vmatmul.mubr.msk.f32.vlgmr.msra.gmra.mxu0 %vm7238_vm2, %v6407_v52 }
 0x189   :  { %5334 = vmatpush3.xpose.msk.msra.mxu1 %vm7238_vm2, %v6403_v50  ;;  %5349 = vmatpush3.xpose.msk.msra.mxu0 %vm7238_vm2, %v6472_v8 }
 0x18a   :  { %5335 = vmatprep.mubr.msk.f32.mxu1 %vm6131_vm0, %v6130_v0  ;;  %5350 = vmatprep.mubr.msk.f32.mxu0 %vm6131_vm0, %v6130_v0 }
 0x18b   :  { %5343 = vmatprep.subr.mxu1 %v6130_v0  ;;  %v6487_v9 = vpop.f32.mrf.mxu0  ;;  %5358 = vmatprep.subr.mxu0 %v6130_v0 }
 0x18c   :  { %5336 = vmatmul.mubr.msk.f32.vlgmr.msra.gmra.mxu1 %vm7238_vm2, %v6431_v59  ;;  %5351 = vmatmul.mubr.msk.f32.vlgmr.msra.gmra.mxu0 %vm7238_vm2, %v6427_v58 }
 0x18d   :  { %5344 = vmatpush3.xpose.msk.msra.mxu1 %vm7238_vm2, %v6437_v60  ;;  %5345 = vmatprep.mubr.msk.f32.mxu1 %vm6131_vm0, %v6130_v0  ;;  %v6498_v10 = vpop.f32.mrf.mxu0 }
 0x18e   :  { %5353 = vmatprep.subr.mxu1 %v6130_v0  ;;  %5359 = vmatpush3.msra.mxu0 %v6498_v10 }
 0x18f   :  { %5360 = vmatprep.mubr.msk.f32.mxu0 %vm6131_vm0, %v6130_v0  ;;  %5368 = vmatprep.subr.mxu0 %v6130_v0  ;;  %v6518_v11 = vpop.f32.mrf.mxu0 }
 0x190   :  { %5346 = vmatmul.mubr.msk.f32.vlgmr.msra.gmra.mxu1 %vm7238_vm2, %v6423_v57 }
 0x191   :  { %5354 = vmatpush3.xpose.msk.msra.mxu1 %vm7238_vm2, %v6466_v7  ;;  %5355 = vmatprep.mubr.msk.f32.mxu1 %vm6131_vm0, %v6130_v0  ;;  %v6520_v12 = vpop.f32.mrf.mxu0 }
 0x192   :  { %5363 = vmatprep.subr.mxu1 %v6130_v0 }
 0x193   :  { %v6522_v14 = vpop.f32.mrf.mxu0 }
 0x194   :  { %5356 = vmatmul.mubr.msk.f32.vlgmr.msra.gmra.mxu1 %vm7238_vm2, %v6448_v1 }
 0x195   :  { %5364 = vmatpush3.msra.mxu1 %v6487_v9  ;;  %5365 = vmatprep.mubr.msk.f32.mxu1 %vm6131_vm0, %v6130_v0  ;;  %v6525_v16 = vpop.f32.mrf.mxu0 }
 0x196   :  { %5373 = vmatprep.subr.mxu1 %v6130_v0 }
 0x197   :  { %v6530_v21 = vpop.f32.mrf.mxu0 }
 0x199   :  { %v6545_v30 = vpop.f32.mrf.mxu0 }
 0x240   :  { %v765_v20 = vpop.f32.mrf.mxu1 }
 0x241   :  { %v1294_v24 = vmul.f32 0.17677669, %v765_v20 }
 0x242   :  { %v5322_v25 = vpop.f32.mrf.mxu1 }
 0x243   :  { %v6539_v26 = vsel %vm1302_vm3, -1e+10, %v1294_v24 }
 0x244   :  { %v840_v28 = vpop.f32.mrf.mxu1  ;;  %v1319_v29 = vsel %vm1318_vm4, %v6539_v26, -inf }
 0x245   :  { %v1295_v32 = vmul.f32 0.17677669, %v840_v28  ;;  %1320 = vmax.xlane.f32.xlu0 %v1319_v29 }
 0x246   :  { %v5327_v33 = vpop.f32.mrf.mxu1 }
 0x247   :  { %v6553_v34 = vsel %vm1303_vm5, -1e+10, %v1295_v32 }
 0x248   :  { %v915_v36 = vpop.f32.mrf.mxu1  ;;  %v1065_v37 = vpop.f32.mrf.mxu0  ;;  %v1322_v38 = vsel %vm1318_vm4, %v6553_v34, -inf }
 0x249   :  { %v1296_v43 = vmul.f32 0.17677669, %v915_v36  ;;  %v1298_v45 = vmul.f32 0.17677669, %v1065_v37  ;;  %1323 = vmax.xlane.f32.xlu0 %v1322_v38 }
 0x24a   :  { %v5332_v47 = vpop.f32.mrf.mxu1  ;;  %v5342_v48 = vpop.f32.mrf.mxu0 }
 0x24b   :  { %v1312_v51 = vsel %vm6555_vm6, -1e+10, %v1296_v43  ;;  %v1314_v13 = vsel %vm1306_vm7, -1e+10, %v1298_v45  ;;  %v602_v47 = vcombine.high %v600_v23, %v600_v23 }
 0x24c   :  { %v990_v15 = vpop.f32.mrf.mxu1  ;;  %v1215_v18 = vpop.f32.mrf.mxu0  ;;  %v1325_v19 = vsel %vm1318_vm4, %v1312_v51, -inf  ;;  %v1331_v20 = vsel %vm1318_vm4, %v1314_v13, -inf }
 0x24d   :  { %v1297_v27 = vmul.f32 0.17677669, %v990_v15  ;;  %v1300_v28 = vmul.f32 0.17677669, %v1215_v18  ;;  %1326 = vmax.xlane.f32.xlu1 %v1325_v19  ;;  %1332 = vmax.xlane.f32.xlu0 %v1331_v20  ;;  %v6601_v48 = vrot.slane %v602_v47, %v6388_v39 }
 0x24e   :  { %v5337_v29 = vpop.f32.mrf.mxu1  ;;  %v5352_v32 = vpop.f32.mrf.mxu0 }
 0x24f   :  { %v1313_v33 = vsel %vm6572_vm8, -1e+10, %v1297_v27  ;;  %v1316_v36 = vsel %vm6576_vm9, -1e+10, %v1300_v28  ;;  %vm1307_vm10 = vcmp.gt.f32.partialorder %v6601_v48, 0.0  ;;  %v634_v49 = vcombine.high %v6601_v48, %v6601_v48 }
 0x250   :  { %v1140_v37 = vpop.f32.mrf.mxu1  ;;  %v1328_v38 = vsel %vm1318_vm4, %v1313_v33, -inf  ;;  %v1337_v41 = vsel %vm1318_vm4, %v1316_v36, -inf }
 0x251   :  { %1329 = vmax.xlane.f32.xlu1 %v1328_v38  ;;  %1338 = vmax.xlane.f32.xlu0 %v1337_v41  ;;  %vm6608_vm11 = vcmp.gt.f32.partialorder %v634_v49, 0.0 }
 0x252   :  { %v5347_v42 = vpop.f32.mrf.mxu1 }
 0x254   :  { %v1290_v43 = vpop.f32.mrf.mxu1 }
 0x256   :  { %v5357_v45 = vpop.f32.mrf.mxu1 }
 0x262   :  { %2080 = vrot.lane.b32.xlu1 %v6390_v40, %s6133_s27  ;;  %v1299_v40 = vmul.f32 0.17677669, %v1140_v37 }
 0x266   :  { %1996 = vrot.lane.b32.xlu1 %v1995_v56, %s6133_s27  ;;  %v1301_v56 = vmul.f32 0.17677669, %v1290_v43 }
 0x267   :  { %1998 = vrot.lane.b32.xlu0 %v6393_v44, %s6133_s27  ;;  %v1315_v44 = vsel %vm1307_vm10, -1e+10, %v1299_v40 }
 0x268   :  { %v1317_v39 = vsel %vm6608_vm11, -1e+10, %v1301_v56 }
 0x26a   :  { %2078 = vrot.lane.b32.xlu1 %v2077_v61, %s6133_s27  ;;  %v1340_v61 = vsel %vm1318_vm4, %v1317_v39, -inf }
 0x26b   :  { %2162 = vrot.lane.b32.xlu0 %v6416_v55, %s6133_s27  ;;  %v1334_v55 = vsel %vm1318_vm4, %v1315_v44, -inf }
 0x28e   :  { %1335 = vmax.xlane.f32.xlu1 %v1334_v55 }
 0x292   :  { %1341 = vmax.xlane.f32.xlu1 %v1340_v61 }
 0x2a3   :  { %2244 = vrot.lane.b32.xlu1 %v6403_v50, %s6133_s27 }
 0x2ce   :  { %v1321_v23 = vpop.xlane.xlu0 %1320 }
 0x2cf   :  { %v1343_v15 = vsub.f32 %v6539_v26, %v1321_v23 }
 0x2d1   :  { %v1351_v18 = vmul.f32 1.442695, %v1343_v15 }
 0x2d2   :  { %v1324_v19 = vpop.xlane.xlu0 %1323 }
 0x2d3   :  { %5702 = vpow2.f32 %v1351_v18  ;;  %v1344_v20 = vsub.f32 %v6553_v34, %v1324_v19 }
 0x2d5   :  { %v1353_v27 = vmul.f32 1.442695, %v1344_v20 }
 0x2d6   :  { %v1327_v28 = vpop.xlane.xlu1 %1326  ;;  %v1333_v29 = vpop.xlane.xlu0 %1332 }
 0x2d7   :  { %5704 = vpow2.f32 %v1353_v27  ;;  %v1345_v32 = vsub.f32 %v1312_v51, %v1327_v28  ;;  %v1347_v37 = vsub.f32 %v1314_v13, %v1333_v29 }
 0x2d9   :  { %v1355_v38 = vmul.f32 1.442695, %v1345_v32  ;;  %v1359_v41 = vmul.f32 1.442695, %v1347_v37 }
 0x2da   :  { %v1330_v42 = vpop.xlane.xlu1 %1329  ;;  %v1339_v43 = vpop.xlane.xlu0 %1338 }
 0x2db   :  { %5706 = vpow2.f32 %v1355_v38  ;;  %v1346_v50 = vsub.f32 %v1313_v33, %v1330_v42  ;;  %v1349_v45 = vsub.f32 %v1316_v36, %v1339_v43 }
 0x2dc   :  { %5708 = vpow2.f32 %v1359_v41 }
 0x2dd   :  { %v1357_v26 = vmul.f32 1.442695, %v1346_v50  ;;  %v1363_v47 = vmul.f32 1.442695, %v1349_v45 }
 0x2de   :  { %v6647_v18 = vpop.permute.xlu1 %2080  ;;  %v1999_v58 = vpop.permute.xlu0 %1998 }
 0x2df   :  { %5710 = vpow2.f32 %v1357_v26 }
 0x2e0   :  { %v5703_v40 = vpop.eup %5702  ;;  %5712 = vpow2.f32 %v1363_v47 }
 0x2e1   :  { %v1367_v34 = vsel %vm1318_vm4, %v5703_v40, 0.0 }
 0x2e2   :  { %1368 = vadd.xlane.f32.xlu0 %v1367_v34  ;;  %v6655_v19 = vpop.permute.xlu1 %1996 }
 0x2e4   :  { %v6621_v49 = vpop.eup %5704 }
 0x2e5   :  { %v1370_v51 = vsel %vm1318_vm4, %v6621_v49, 0.0 }
 0x2e6   :  { %1371 = vadd.xlane.f32.xlu1 %v1370_v51  ;;  %v6661_v59 = vpop.permute.xlu1 %2078 }
 0x2e8   :  { %v6625_v13 = vpop.eup %5706 }
 0x2e9   :  { %v1373_v33 = vsel %vm1318_vm4, %v6625_v13, 0.0  ;;  %v6629_v36 = vpop.eup %5708 }
 0x2ea   :  { %1374 = vadd.xlane.f32.xlu0 %v1373_v33  ;;  %v1379_v61 = vsel %vm1318_vm4, %v6629_v36, 0.0 }
 0x2ec   :  { %v6631_v56 = vpop.eup %5710 }
 0x2ed   :  { %v1376_v55 = vsel %vm1318_vm4, %v6631_v56, 0.0  ;;  %v6637_v23 = vpop.eup %5712 }
 0x2ee   :  { %1377 = vadd.xlane.f32.xlu1 %v1376_v55  ;;  %1380 = vadd.xlane.f32.xlu0 %v1379_v61  ;;  %v1385_v15 = vsel %vm1318_vm4, %v6637_v23, 0.0 }
 0x2f2   :  { %1386 = vadd.xlane.f32.xlu0 %v1385_v15 }
 0x2ff   :  { %2242 = vrot.lane.b32.xlu1 %v2241_v2, %s6133_s27 }
 0x303   :  { %2408 = vrot.lane.b32.xlu1 %v6437_v60, %s6133_s27 }
 0x308   :  { %2160 = vrot.lane.b32.xlu0 %v2159_v62, %s6133_s27 }
 0x30c   :  { %2326 = vrot.lane.b32.xlu0 %v6456_v5, %s6133_s27 }
 0x310   :  { %2324 = vrot.lane.b32.xlu0 %v2323_v63, %s6133_s27 }
 0x314   :  { %2490 = vrot.lane.b32.xlu0 %v6472_v8, %s6133_s27 }
 0x317   :  { %v1336_v60 = vpop.xlane.xlu1 %1335 }
 0x318   :  { %v1348_v2 = vsub.f32 %v1315_v44, %v1336_v60  ;;  %2488 = vrot.lane.b32.xlu0 %v2487_v3, %s6133_s27  ;;  %v2163_v3 = vpop.permute.xlu0 %2162 }
 0x31a   :  { %v1361_v54 = vmul.f32 1.442695, %v1348_v2 }
 0x31b   :  { %v1342_v62 = vpop.xlane.xlu1 %1341 }
 0x31c   :  { %5714 = vpow2.f32 %v1361_v54  ;;  %v1350_v5 = vsub.f32 %v1317_v39, %v1342_v62 }
 0x31e   :  { %v1365_v20 = vmul.f32 1.442695, %v1350_v5 }
 0x31f   :  { %v6687_v39 = vpop.permute.xlu1 %2244 }
 0x320   :  { %5716 = vpow2.f32 %v1365_v20 }
 0x329   :  { %v6669_v52 = vpop.eup %5714 }
 0x32a   :  { %v1382_v63 = vsel %vm1318_vm4, %v6669_v52, 0.0 }
 0x32b   :  { %1383 = vadd.xlane.f32.xlu1 %v1382_v63 }
 0x32d   :  { %v6673_v8 = vpop.eup %5716 }
 0x32e   :  { %v1388_v44 = vsel %vm1318_vm4, %v6673_v8, 0.0 }
 0x32f   :  { %1389 = vadd.xlane.f32.xlu1 %v1388_v44 }
 0x340   :  { %2406 = vrot.lane.b32.xlu1 %v2405_v4, %s6133_s27 }
 0x344   :  { %2572 = vrot.lane.b32.xlu1 %v6466_v7, %s6133_s27 }
 0x348   :  { %2570 = vrot.lane.b32.xlu1 %v2569_v6, %s6133_s27 }
 0x36b   :  { %v1369_v27 = vpop.xlane.xlu0 %1368 }
 0x36c   :  { %5718 = vrcp.f32 %v1369_v27 }
 0x36f   :  { %v1372_v28 = vpop.xlane.xlu1 %1371 }
 0x370   :  { %5720 = vrcp.f32 %v1372_v28 }
 0x373   :  { %v1375_v29 = vpop.xlane.xlu0 %1374 }
 0x374   :  { %5722 = vrcp.f32 %v1375_v29 }
 0x377   :  { %v1378_v57 = vpop.xlane.xlu1 %1377  ;;  %v1381_v4 = vpop.xlane.xlu0 %1380 }
 0x378   :  { %5724 = vrcp.f32 %v1378_v57 }
 0x379   :  { %v5719_v32 = vpop.eup %5718  ;;  %5726 = vrcp.f32 %v1381_v4 }
 0x37a   :  { %v1399_v7 = vmul.f32 %v5719_v32, %v5703_v40 }
 0x37b   :  { %v1387_v37 = vpop.xlane.xlu0 %1386 }
 0x37c   :  { %5728 = vrcp.f32 %v1387_v37  ;;  %5361 = vmatmul.mubr.msk.f32.vlgmr.msra.gmra.mxu0 %vm1407_vm12, %v1399_v7 }
 0x37d   :  { %v5721_v46 = vpop.eup %5720  ;;  %5369 = vmatpush3.msra.mxu0 %v6520_v12  ;;  %5370 = vmatprep.mubr.msk.f32.mxu0 %vm6131_vm0, %v6130_v0 }
 0x37e   :  { %v1400_v1 = vmul.f32 %v5721_v46, %v6621_v49  ;;  %5378 = vmatprep.subr.mxu0 %v6130_v0 }
 0x37f   :  { %v2161_v41 = vpop.permute.xlu0 %2160 }
 0x380   :  { %5366 = vmatmul.mubr.msk.f32.vlgmr.msra.gmra.mxu1 %vm1407_vm12, %v1400_v1 }
 0x381   :  { %v5723_v6 = vpop.eup %5722  ;;  %5374 = vmatpush3.msra.mxu1 %v6518_v11  ;;  %5375 = vmatprep.mubr.msk.f32.mxu1 %vm6131_vm0, %v6130_v0 }
 0x382   :  { %v1401_v38 = vmul.f32 %v5723_v6, %v6625_v13  ;;  %5383 = vmatprep.subr.mxu1 %v6130_v0  ;;  %v2243_v13 = vpop.permute.xlu1 %2242 }
 0x383   :  { %v2327_v47 = vpop.permute.xlu0 %2326 }
 0x384   :  { %5371 = vmatmul.mubr.msk.f32.vlgmr.msra.gmra.mxu0 %vm1407_vm12, %v1401_v38 }
 0x385   :  { %v5725_v42 = vpop.eup %5724  ;;  %5379 = vmatpush3.msra.mxu0 %v6525_v16  ;;  %5380 = vmatprep.mubr.msk.f32.mxu0 %vm6131_vm0, %v6130_v0 }
 0x386   :  { %v5727_v43 = vpop.eup %5726  ;;  %5388 = vmatprep.subr.mxu0 %v6130_v0  ;;  %v1402_v50 = vmul.f32 %v5725_v42, %v6631_v56  ;;  %v2409_v33 = vpop.permute.xlu1 %2408 }
 0x387   :  { %v1403_v45 = vmul.f32 %v5727_v43, %v6629_v36  ;;  %v2325_v34 = vpop.permute.xlu0 %2324 }
 0x388   :  { %5376 = vmatmul.mubr.msk.f32.vlgmr.msra.gmra.mxu1 %vm1407_vm12, %v1402_v50 }
 0x389   :  { %v5729_v26 = vpop.eup %5728  ;;  %5381 = vmatmul.mubr.msk.f32.vlgmr.msra.gmra.mxu0 %vm1407_vm12, %v1403_v45  ;;  %5384 = vmatpush3.msra.mxu1 %v6522_v14 }
 0x38a   :  { %5389 = vmatpush3.msra.mxu0 %v6545_v30  ;;  %5390 = vmatprep.mubr.msk.f32.mxu0 %vm6131_vm0, %v6130_v0  ;;  %v1405_v40 = vmul.f32 %v5729_v26, %v6637_v23 }
 0x38b   :  { %5398 = vmatprep.subr.mxu0 %v6130_v0  ;;  %5385 = vmatprep.mubr.msk.f32.mxu1 %vm6131_vm0, %v6130_v0  ;;  %v2491_v49 = vpop.permute.xlu0 %2490 }
 0x38c   :  { %5393 = vmatprep.subr.mxu1 %v6130_v0 }
 0x38d   :  { %5391 = vmatmul.mubr.msk.f32.vlgmr.msra.gmra.mxu0 %vm1407_vm12, %v1405_v40 }
 0x38e   :  { %5399 = vmatpush3.xpose.msk.msra.mxu0 %vm7238_vm2, %v1999_v58  ;;  %5400 = vmatprep.mubr.msk.f32.mxu0 %vm6131_vm0, %v6130_v0 }
 0x38f   :  { %5408 = vmatprep.subr.mxu0 %v6130_v0  ;;  %v2489_v51 = vpop.permute.xlu0 %2488 }
 0x391   :  { %5401 = vmatmul.mubr.msk.f32.vlgmr.msra.gmra.mxu0 %vm7238_vm2, %v6655_v19 }
 0x392   :  { %5409 = vmatpush3.xpose.msk.msra.mxu0 %vm7238_vm2, %v2163_v3  ;;  %5410 = vmatprep.mubr.msk.f32.mxu0 %vm6131_vm0, %v6130_v0 }
 0x393   :  { %5418 = vmatprep.subr.mxu0 %v6130_v0 }
 0x395   :  { %5411 = vmatmul.mubr.msk.f32.vlgmr.msra.gmra.mxu0 %vm7238_vm2, %v2161_v41 }
 0x396   :  { %5419 = vmatpush3.xpose.msk.msra.mxu0 %vm7238_vm2, %v2327_v47  ;;  %5420 = vmatprep.mubr.msk.f32.mxu0 %vm6131_vm0, %v6130_v0 }
 0x397   :  { %5428 = vmatprep.subr.mxu0 %v6130_v0 }
 0x399   :  { %5421 = vmatmul.mubr.msk.f32.vlgmr.msra.gmra.mxu0 %vm7238_vm2, %v2325_v34 }
 0x39a   :  { %5429 = vmatpush3.xpose.msk.msra.mxu0 %vm7238_vm2, %v2491_v49  ;;  %5430 = vmatprep.mubr.msk.f32.mxu0 %vm6131_vm0, %v6130_v0 }
 0x39b   :  { %5438 = vmatprep.subr.mxu0 %v6130_v0 }
 0x39d   :  { %5431 = vmatmul.mubr.msk.f32.vlgmr.msra.gmra.mxu0 %vm7238_vm2, %v2489_v51 }
 0x39e   :  { %5440 = vmatprep.mubr.msk.f32.mxu0 %vm6131_vm0, %v6130_v0 }
 0x3b4   :  { %v1384_v36 = vpop.xlane.xlu1 %1383 }
 0x3b5   :  { %5730 = vrcp.f32 %v1384_v36 }
 0x3b8   :  { %v1390_v56 = vpop.xlane.xlu1 %1389 }
 0x3b9   :  { %5732 = vrcp.f32 %v1390_v56 }
 0x3bc   :  { %v2407_v19 = vpop.permute.xlu1 %2406 }
 0x3c2   :  { %v5731_v55 = vpop.eup %5730 }
 0x3c3   :  { %v1404_v61 = vmul.f32 %v5731_v55, %v6669_v52 }
 0x3c5   :  { %5386 = vmatmul.mubr.msk.f32.vlgmr.msra.gmra.mxu1 %vm1407_vm12, %v1404_v61 }
 0x3c6   :  { %v5733_v23 = vpop.eup %5732  ;;  %5394 = vmatpush3.msra.mxu1 %v6530_v21  ;;  %5395 = vmatprep.mubr.msk.f32.mxu1 %vm6131_vm0, %v6130_v0 }
 0x3c7   :  { %5403 = vmatprep.subr.mxu1 %v6130_v0  ;;  %v1406_v15 = vmul.f32 %v5733_v23, %v6673_v8 }
 0x3c9   :  { %5396 = vmatmul.mubr.msk.f32.vlgmr.msra.gmra.mxu1 %vm1407_vm12, %v1406_v15 }
 0x3ca   :  { %5404 = vmatpush3.xpose.msk.msra.mxu1 %vm7238_vm2, %v6647_v18  ;;  %5405 = vmatprep.mubr.msk.f32.mxu1 %vm6131_vm0, %v6130_v0  ;;  %v2573_v18 = vpop.permute.xlu1 %2572 }
 0x3cb   :  { %5413 = vmatprep.subr.mxu1 %v6130_v0 }
 0x3cd   :  { %5406 = vmatmul.mubr.msk.f32.vlgmr.msra.gmra.mxu1 %vm7238_vm2, %v6661_v59 }
 0x3ce   :  { %5414 = vmatpush3.xpose.msk.msra.mxu1 %vm7238_vm2, %v6687_v39  ;;  %5415 = vmatprep.mubr.msk.f32.mxu1 %vm6131_vm0, %v6130_v0  ;;  %v2571_v59 = vpop.permute.xlu1 %2570 }
 0x3cf   :  { %5423 = vmatprep.subr.mxu1 %v6130_v0 }
 0x3d1   :  { %5416 = vmatmul.mubr.msk.f32.vlgmr.msra.gmra.mxu1 %vm7238_vm2, %v2243_v13 }
 0x3d2   :  { %5424 = vmatpush3.xpose.msk.msra.mxu1 %vm7238_vm2, %v2409_v33  ;;  %5425 = vmatprep.mubr.msk.f32.mxu1 %vm6131_vm0, %v6130_v0 }
 0x3d3   :  { %5433 = vmatprep.subr.mxu1 %v6130_v0 }
 0x3d5   :  { %5426 = vmatmul.mubr.msk.f32.vlgmr.msra.gmra.mxu1 %vm7238_vm2, %v2407_v19 }
 0x3d6   :  { %5434 = vmatpush3.xpose.msk.msra.mxu1 %vm7238_vm2, %v2573_v18  ;;  %5435 = vmatprep.mubr.msk.f32.mxu1 %vm6131_vm0, %v6130_v0 }
 0x3d7   :  { %5443 = vmatprep.subr.mxu1 %v6130_v0 }
 0x3d9   :  { %5436 = vmatmul.mubr.msk.f32.vlgmr.msra.gmra.mxu1 %vm7238_vm2, %v2571_v59  ;;  %vm3392_vm2 = vcmask 1046534  }
 0x3da   :  { %5445 = vmatprep.mubr.msk.f32.mxu1 %vm6131_vm0, %v6130_v0 }
 0x43c   :  { %v1477_v60 = vpop.f32.mrf.mxu0 }
 0x43e   :  { %v5362_v2 = vpop.f32.mrf.mxu0 }
 0x440   :  { %v1550_v54 = vpop.f32.mrf.mxu1 }
 0x441   :  { %v3376_v62 = vrot.slane %v1550_v54, 7 }
 0x442   :  { %v5367_v5 = vpop.f32.mrf.mxu1 }
 0x443   :  { %v3378_v20 = vsel %vm3377_vm13, %v3376_v62, %v1477_v60 }
 0x444   :  { %v1623_v52 = vpop.f32.mrf.mxu0 }
 0x445   :  { %v3379_v63 = vrot.slane %v1623_v52, 6 }
 0x446   :  { %v5372_v8 = vpop.f32.mrf.mxu0 }
 0x447   :  { %v3381_v44 = vsel %vm3380_vm14, %v3379_v63, %v3378_v20 }
 0x448   :  { %v1696_v58 = vpop.f32.mrf.mxu1 }
 0x449   :  { %v3382_v3 = vrot.slane %v1696_v58, 5  ;;  %v1769_v39 = vpop.f32.mrf.mxu0 }
 0x44a   :  { %v3385_v27 = vrot.slane %v1769_v39, 4  ;;  %v5377_v28 = vpop.f32.mrf.mxu1 }
 0x44b   :  { %v3384_v29 = vsel %vm3383_vm15, %v3382_v3, %v3381_v44  ;;  %v5382_v57 = vpop.f32.mrf.mxu0 }
 0x44c   :  { %v3387_v4 = vsel %vm7239_vm1, %v3385_v27, %v3384_v29  ;;  %vm3395_vm1 = vcmask 1047559  }
 0x44d   :  { %v1915_v32 = vpop.f32.mrf.mxu0 }
 0x44e   :  { %v3391_v51 = vrot.slane %v1915_v32, 2 }
 0x44f   :  { %v5392_v7 = vpop.f32.mrf.mxu0 }
 0x451   :  { %v2070_v37 = vpop.f32.mrf.mxu0 }
 0x452   :  { %v2648_v46 = vmul.f32 0.17677669, %v2070_v37 }
 0x453   :  { %v5402_v1 = vpop.f32.mrf.mxu0 }
 0x454   :  { %v6782_v6 = vsel %vm1302_vm3, -1e+10, %v2648_v46  ;;  %vm3389_vm3 = vcmask 1045509  }
 0x455   :  { %v2234_v38 = vpop.f32.mrf.mxu0  ;;  %v2664_v41 = vsel %vm1318_vm4, %v6782_v6, -inf }
 0x456   :  { %v2650_v42 = vmul.f32 0.17677669, %v2234_v38  ;;  %2665 = vmax.xlane.f32.xlu0 %v2664_v41 }
 0x457   :  { %v5412_v43 = vpop.f32.mrf.mxu0 }
 0x458   :  { %v6788_v50 = vsel %vm6555_vm6, -1e+10, %v2650_v42  ;;  %vm7266_vm6 = vcmask 523264  }
 0x459   :  { %v2398_v45 = vpop.f32.mrf.mxu0  ;;  %v2670_v26 = vsel %vm1318_vm4, %v6788_v50, -inf }
 0x45a   :  { %2671 = vmax.xlane.f32.xlu0 %v2670_v26  ;;  %v2652_v2 = vmul.f32 0.17677669, %v2398_v45 }
 0x45b   :  { %v5422_v47 = vpop.f32.mrf.mxu0 }
 0x45c   :  { %v2660_v22 = vsel %vm1306_vm7, -1e+10, %v2652_v2 }
 0x45d   :  { %v2562_v17 = vpop.f32.mrf.mxu0  ;;  %v2676_v27 = vsel %vm1318_vm4, %v2660_v22, -inf }
 0x45e   :  { %v2654_v63 = vmul.f32 0.17677669, %v2562_v17 }
 0x45f   :  { %v5432_v40 = vpop.f32.mrf.mxu0 }
 0x460   :  { %v2662_v28 = vsel %vm6576_vm9, -1e+10, %v2654_v63 }
 0x461   :  { %v2682_v48 = vsel %vm1318_vm4, %v2662_v28, -inf }
 0x485   :  { %v1842_v34 = vpop.f32.mrf.mxu1 }
 0x486   :  { %v3388_v49 = vrot.slane %v1842_v34, 3 }
 0x487   :  { %v5387_v13 = vpop.f32.mrf.mxu1 }
 0x488   :  { %v3390_v33 = vsel %vm3389_vm3, %v3388_v49, %v3387_v4 }
 0x489   :  { %v1988_v36 = vpop.f32.mrf.mxu1  ;;  %v3393_v35 = vsel %vm3392_vm2, %v3391_v51, %v3390_v33 }
 0x48a   :  { %v3394_v56 = vrot.slane %v1988_v36, 1 }
 0x48b   :  { %v5397_v55 = vpop.f32.mrf.mxu1 }
 0x48c   :  { %v6795_v61 = vsel %vm3395_vm1, %v3394_v56, %v3393_v35 }
 0x48d   :  { %v2152_v23 = vpop.f32.mrf.mxu1 }
 0x48e   :  { %v2649_v15 = vmul.f32 0.17677669, %v2152_v23 }
 0x48f   :  { %v5407_v19 = vpop.f32.mrf.mxu1 }
 0x490   :  { %v2657_v18 = vsel %vm1303_vm5, -1e+10, %v2649_v15  ;;  %vm7264_vm5 = vcmask 1044484  }
 0x491   :  { %v2316_v59 = vpop.f32.mrf.mxu1  ;;  %v2667_v60 = vsel %vm1318_vm4, %v2657_v18, -inf }
 0x492   :  { %v2651_v54 = vmul.f32 0.17677669, %v2316_v59  ;;  %2668 = vmax.xlane.f32.xlu1 %v2667_v60 }
 0x493   :  { %v5417_v62 = vpop.f32.mrf.mxu1 }
 0x494   :  { %v2659_v5 = vsel %vm6572_vm8, -1e+10, %v2651_v54 }
 0x495   :  { %v2480_v20 = vpop.f32.mrf.mxu1  ;;  %v2673_v52 = vsel %vm1318_vm4, %v2659_v5, -inf }
 0x496   :  { %v2653_v8 = vmul.f32 0.17677669, %v2480_v20  ;;  %2674 = vmax.xlane.f32.xlu0 %v2673_v52 }
 0x497   :  { %v5427_v44 = vpop.f32.mrf.mxu1 }
 0x498   :  { %v2661_v58 = vsel %vm1307_vm10, -1e+10, %v2653_v8 }
 0x499   :  { %v2644_v3 = vpop.f32.mrf.mxu1  ;;  %v2679_v39 = vsel %vm1318_vm4, %v2661_v58, -inf }
 0x49a   :  { %v2655_v24 = vmul.f32 0.17677669, %v2644_v3  ;;  %2680 = vmax.xlane.f32.xlu1 %v2679_v39  ;;  %2677 = vmax.xlane.f32.xlu0 %v2676_v27 }
 0x49b   :  { %v5437_v29 = vpop.f32.mrf.mxu1 }
 0x49c   :  { %v2663_v31 = vsel %vm6608_vm11, -1e+10, %v2655_v24 }
 0x49d   :  { %v2685_v57 = vsel %vm1318_vm4, %v2663_v31, -inf }
 0x49e   :  { %2686 = vmax.xlane.f32.xlu1 %v2685_v57  ;;  %2683 = vmax.xlane.f32.xlu0 %v2682_v48 }
 0x4af   :  { %2830 = vrot.lane.b32.xlu1 %v6487_v9, %s6133_s27 }
 0x4b3   :  { %2907 = vrot.lane.b32.xlu1 %v6520_v12, %s6133_s27 }
 0x4b4   :  { %2753 = vrot.lane.b32.xlu0 %v6498_v10, %s6133_s27 }
 0x4b7   :  { %2984 = vrot.lane.b32.xlu1 %v6518_v11, %s6133_s27 }
 0x4b8   :  { %3061 = vrot.lane.b32.xlu0 %v6525_v16, %s6133_s27 }
 0x4bb   :  { %3138 = vrot.lane.b32.xlu1 %v6522_v14, %s6133_s27 }
 0x4df   :  { %v2666_v25 = vpop.xlane.xlu0 %2665 }
 0x4e0   :  { %v2688_v53 = vsub.f32 %v6782_v6, %v2666_v25 }
 0x4e2   :  { %v2696_v4 = vmul.f32 1.442695, %v2688_v53 }
 0x4e3   :  { %v2672_v9 = vpop.xlane.xlu0 %2671 }
 0x4e4   :  { %5734 = vpow2.f32 %v2696_v4  ;;  %v2690_v12 = vsub.f32 %v6788_v50, %v2672_v9 }
 0x4e6   :  { %v2700_v32 = vmul.f32 1.442695, %v2690_v12 }
 0x4e8   :  { %5736 = vpow2.f32 %v2700_v32 }
 0x4f1   :  { %v5735_v10 = vpop.eup %5734 }
 0x4f2   :  { %v2712_v7 = vsel %vm1318_vm4, %v5735_v10, 0.0 }
 0x4f3   :  { %2713 = vadd.xlane.f32.xlu0 %v2712_v7 }
 0x4f5   :  { %v6830_v11 = vpop.eup %5736 }
 0x4f6   :  { %v2718_v16 = vsel %vm1318_vm4, %v6830_v11, 0.0 }
 0x4f7   :  { %2719 = vadd.xlane.f32.xlu0 %v2718_v16 }
 0x51b   :  { %v2669_v14 = vpop.xlane.xlu1 %2668 }
 0x51c   :  { %v2689_v37 = vsub.f32 %v2657_v18, %v2669_v14  ;;  %v3704_v14 = vld [vmem:[#allocation7] sm:$0xff] }
 0x51e   :  { %v2698_v46 = vmul.f32 1.442695, %v2689_v37  ;;  %v3705_v37 = vadd.f32 1.0, %v3704_v14 }
 0x51f   :  { %v2675_v1 = vpop.xlane.xlu0 %2674 }
 0x520   :  { %5738 = vpow2.f32 %v2698_v46  ;;  %v2691_v6 = vsub.f32 %v2659_v5, %v2675_v1  ;;  %v6134_v1 = vmov 0  }
 0x521   :  { %5691 = vset.pattern.permute.xlu1 %v6134_v1  ;;  %5692 = vset.pattern.permute.xlu0 %v6134_v1 }
 0x522   :  { %v2702_v38 = vmul.f32 1.442695, %v2691_v6  ;;  %v3431_v6 = vld [vmem:[#allocation16 + $0x38] sm:$0xff] }
 0x523   :  { %v2681_v41 = vpop.xlane.xlu1 %2680  ;;  %v2678_v42 = vpop.xlane.xlu0 %2677 }
 0x524   :  { %5740 = vpow2.f32 %v2702_v38  ;;  %v2693_v43 = vsub.f32 %v2661_v58, %v2681_v41  ;;  %v2692_v50 = vsub.f32 %v2660_v22, %v2678_v42  ;;  %v3430_v38 = vld [vmem:[#allocation16 + $0x30] sm:$0xff]  ;;  %v3555_v41 = vld [vmem:[%s7225_s13 + $0x28] sm:$0xff] }
 0x525   :  { %v3429_v42 = vld [vmem:[#allocation16 + $0x28] sm:$0xff] }
 0x526   :  { %v2706_v45 = vmul.f32 1.442695, %v2693_v43  ;;  %v2704_v26 = vmul.f32 1.442695, %v2692_v50  ;;  %v3554_v43 = vld [vmem:[%s7225_s13 + $0x20] sm:$0xff]  ;;  %v3553_v50 = vld [vmem:[%s7225_s13 + $0x18] sm:$0xff] }
 0x527   :  { %v2687_v47 = vpop.xlane.xlu1 %2686  ;;  %v2684_v17 = vpop.xlane.xlu0 %2683 }
 0x528   :  { %5742 = vpow2.f32 %v2706_v45  ;;  %v2695_v40 = vsub.f32 %v2663_v31, %v2687_v47  ;;  %v2694_v34 = vsub.f32 %v2662_v28, %v2684_v17  ;;  %v3428_v45 = vld [vmem:[#allocation16 + $0x20] sm:$0xff]  ;;  %v3426_v47 = vld [vmem:[#allocation16 + $0x10] sm:$0xff]  ;;  %v3425_v17 = vld [vmem:[#allocation16 + $0x8] sm:$0xff] }
 0x529   :  { %5744 = vpow2.f32 %v2704_v26  ;;  %v3427_v26 = vld [vmem:[#allocation16 + $0x18] sm:$0xff] }
 0x52a   :  { %v2710_v49 = vmul.f32 1.442695, %v2695_v40  ;;  %v2708_v51 = vmul.f32 1.442695, %v2694_v34  ;;  %v3424_v40 = vld [vmem:[#allocation16] sm:$0xff] }
 0x52b   :  { %v2831_v13 = vpop.permute.xlu1 %2830  ;;  %v2754_v33 = vpop.permute.xlu0 %2753 }
 0x52c   :  { %5746 = vpow2.f32 %v2710_v49  ;;  %5439 = vmatpush3.msra.mxu0 %v2754_v33  ;;  %5444 = vmatpush3.msra.mxu1 %v2831_v13 }
 0x52d   :  { %v5739_v36 = vpop.eup %5738  ;;  %5748 = vpow2.f32 %v2708_v51  ;;  %5448 = vmatprep.subr.mxu0 %v6130_v0  ;;  %5453 = vmatprep.subr.mxu1 %v6130_v0 }
 0x52e   :  { %v2715_v35 = vsel %vm1318_vm4, %v5739_v36, 0.0 }
 0x52f   :  { %2716 = vadd.xlane.f32.xlu1 %v2715_v35  ;;  %v3062_v62 = vpop.permute.xlu0 %3061  ;;  %v2908_v8 = vpop.permute.xlu1 %2907 }
 0x531   :  { %v5741_v56 = vpop.eup %5740 }
 0x532   :  { %v2721_v55 = vsel %vm1318_vm4, %v5741_v56, 0.0 }
 0x533   :  { %2722 = vadd.xlane.f32.xlu1 %v2721_v55 }
 0x535   :  { %v5743_v23 = vpop.eup %5742 }
 0x536   :  { %v5745_v15 = vpop.eup %5744  ;;  %v2727_v19 = vsel %vm1318_vm4, %v5743_v23, 0.0 }
 0x537   :  { %2728 = vadd.xlane.f32.xlu1 %v2727_v19  ;;  %v2724_v18 = vsel %vm1318_vm4, %v5745_v15, 0.0  ;;  %v3552_v19 = vld [vmem:[%s7225_s13 + $0x10] sm:$0xff] }
 0x538   :  { %2725 = vadd.xlane.f32.xlu0 %v2724_v18 }
 0x539   :  { %v6840_v59 = vpop.eup %5746 }
 0x53a   :  { %v6842_v60 = vpop.eup %5748  ;;  %v2733_v2 = vsel %vm1318_vm4, %v6840_v59, 0.0 }
 0x53b   :  { %2734 = vadd.xlane.f32.xlu1 %v2733_v2  ;;  %v2730_v54 = vsel %vm1318_vm4, %v6842_v60, 0.0  ;;  %vm3563_vm4 = vcmask 392192  }
 0x53c   :  { %2731 = vadd.xlane.f32.xlu0 %v2730_v54 }
 0x54c   :  { %3292 = vrot.lane.b32.xlu1 %v6530_v21, %s6133_s27 }
 0x552   :  { %3215 = vrot.lane.b32.xlu0 %v6545_v30, %s6133_s27  ;;  %v2985_v30 = vpop.permute.xlu1 %2984 }
 0x556   :  { %v3139_v44 = vpop.permute.xlu1 %3138 }
 0x57c   :  { %v2714_v5 = vpop.xlane.xlu0 %2713 }
 0x57d   :  { %5750 = vrcp.f32 %v2714_v5 }
 0x580   :  { %v2720_v20 = vpop.xlane.xlu0 %2719 }
 0x581   :  { %5752 = vrcp.f32 %v2720_v20 }
 0x58a   :  { %v5751_v52 = vpop.eup %5750 }
 0x58b   :  { %v2744_v63 = vmul.f32 %v5751_v52, %v5735_v10  ;;  %v3542_v52 = vld [vmem:[#allocation5] sm:$0xff] }
 0x58d   :  { %5441 = vmatmul.mubr.msk.f32.vlgmr.msra.gmra.mxu0 %vm1407_vm12, %v2744_v63 }
 0x58e   :  { %v5753_v22 = vpop.eup %5752  ;;  %5449 = vmatpush3.msra.mxu0 %v2908_v8  ;;  %5450 = vmatprep.mubr.msk.f32.mxu0 %vm6131_vm0, %v6130_v0 }
 0x58f   :  { %5458 = vmatprep.subr.mxu0 %v6130_v0  ;;  %v2746_v21 = vmul.f32 %v5753_v22, %v6830_v11 }
 0x591   :  { %5451 = vmatmul.mubr.msk.f32.vlgmr.msra.gmra.mxu0 %vm1407_vm12, %v2746_v21  ;;  %v3543_v21 = vld [vmem:[#allocation5 + $0x8] sm:$0xff] }
 0x592   :  { %5459 = vmatpush3.msra.mxu0 %v3062_v62  ;;  %5460 = vmatprep.mubr.msk.f32.mxu0 %vm6131_vm0, %v6130_v0  ;;  %v3550_v62 = vld [vmem:[%s7225_s13] sm:$0xff] }
 0x593   :  { %5468 = vmatprep.subr.mxu0 %v6130_v0 }
 0x5b8   :  { %v2717_v58 = vpop.xlane.xlu1 %2716 }
 0x5b9   :  { %5754 = vrcp.f32 %v2717_v58  ;;  %v6918_v58 = vld [vmem:[#allocation17 + $0x18] sm:$0xff] }
 0x5bc   :  { %v2723_v3 = vpop.xlane.xlu1 %2722 }
 0x5bd   :  { %5756 = vrcp.f32 %v2723_v3 }
 0x5c0   :  { %v2729_v39 = vpop.xlane.xlu1 %2728 }
 0x5c1   :  { %5758 = vrcp.f32 %v2729_v39  ;;  %v2726_v27 = vpop.xlane.xlu0 %2725 }
 0x5c2   :  { %5760 = vrcp.f32 %v2726_v27 }
 0x5c4   :  { %v2735_v24 = vpop.xlane.xlu1 %2734 }
 0x5c5   :  { %5762 = vrcp.f32 %v2735_v24  ;;  %v2732_v28 = vpop.xlane.xlu0 %2731 }
 0x5c6   :  { %v5755_v29 = vpop.eup %5754  ;;  %5764 = vrcp.f32 %v2732_v28  ;;  %v6923_v28 = vld [vmem:[#allocation17 + $0x10] sm:$0xff] }
 0x5c7   :  { %v2745_v31 = vmul.f32 %v5755_v29, %v5739_v36  ;;  %5766 = vrcp.f32 %v3705_v37 }
 0x5c8   :  { %v3293_v12 = vpop.permute.xlu1 %3292 }
 0x5c9   :  { %5446 = vmatmul.mubr.msk.f32.vlgmr.msra.gmra.mxu1 %vm1407_vm12, %v2745_v31  ;;  %v3216_v10 = vpop.permute.xlu0 %3215 }
 0x5ca   :  { %v5757_v57 = vpop.eup %5756  ;;  %5454 = vmatpush3.msra.mxu1 %v2985_v30  ;;  %5455 = vmatprep.mubr.msk.f32.mxu1 %vm6131_vm0, %v6130_v0 }
 0x5cb   :  { %5463 = vmatprep.subr.mxu1 %v6130_v0  ;;  %v2747_v48 = vmul.f32 %v5757_v57, %v5741_v56 }
 0x5cd   :  { %5456 = vmatmul.mubr.msk.f32.vlgmr.msra.gmra.mxu1 %vm1407_vm12, %v2747_v48  ;;  %v6929_v48 = vld [vmem:[#allocation17 + $0x8] sm:$0xff] }
 0x5ce   :  { %v5759_v25 = vpop.eup %5758  ;;  %5464 = vmatpush3.msra.mxu1 %v3139_v44  ;;  %5465 = vmatprep.mubr.msk.f32.mxu1 %vm6131_vm0, %v6130_v0 }
 0x5cf   :  { %v5761_v53 = vpop.eup %5760  ;;  %5473 = vmatprep.subr.mxu1 %v6130_v0  ;;  %v2749_v4 = vmul.f32 %v5759_v25, %v5743_v23 }
 0x5d0   :  { %v2748_v9 = vmul.f32 %v5761_v53, %v5745_v15  ;;  %v6934_v53 = vld [vmem:[#allocation17] sm:$0xff] }
 0x5d1   :  { %5466 = vmatmul.mubr.msk.f32.vlgmr.msra.gmra.mxu1 %vm1407_vm12, %v2749_v4 }
 0x5d2   :  { %v5763_v32 = vpop.eup %5762  ;;  %5461 = vmatmul.mubr.msk.f32.vlgmr.msra.gmra.mxu0 %vm1407_vm12, %v2748_v9  ;;  %5474 = vmatpush3.msra.mxu1 %v3293_v12 }
 0x5d3   :  { %v5765_v7 = vpop.eup %5764  ;;  %5469 = vmatpush3.msra.mxu0 %v3216_v10  ;;  %5470 = vmatprep.mubr.msk.f32.mxu0 %vm6131_vm0, %v6130_v0  ;;  %v2751_v11 = vmul.f32 %v5763_v32, %v6840_v59 }
 0x5d4   :  { %5475 = vmatprep.mubr.msk.f32.mxu1 %vm6131_vm0, %v6130_v0  ;;  %v2750_v16 = vmul.f32 %v5765_v7, %v6842_v60  ;;  %5478 = vmatprep.subr.mxu0 %v6130_v0  ;;  %v6882_v46 = vpop.eup %5766  ;;  %v3551_v60 = vld [vmem:[%s7225_s13 + $0x8] sm:$0xff]  ;;  %s6135_s13 = smov 32   ;;  %v6971_v7 = vld [vmem:[%s7228_s16] ss:$0 sm:$0xff] }
 0x5d5   :  { %5476 = vmatmul.mubr.msk.f32.vlgmr.msra.gmra.mxu1 %vm1407_vm12, %v2751_v11  ;;  %3709 = vperm.xlu1 %5691, %v6882_v46  }
 0x5d6   :  { %5471 = vmatmul.mubr.msk.f32.vlgmr.msra.gmra.mxu0 %vm1407_vm12, %v2750_v16  ;;  %5497 = vmatprep.subr.mxu1 %v3555_v41  ;;  %v5818_v16 = vld [vmem:[#allocation8] sm:$0xff] }
 0x5d7   :  { %5494 = vmatprep.mubr.msk.f32.mxu0 %vm6131_vm0, %v6130_v0  ;;  %5479 = vmatpush3.msra.mxu0 %v3431_v6  ;;  %vm3812_vm7 = vcmp.gt.f32.partialorder %v5818_v16, 0.0 }
 0x5d8   :  { %5480 = vmatprep.subr.mxu0 %v6130_v0  ;;  %5498 = vmatpush3.msra.mxu1 %v3555_v41  ;;  %v6976_v6 = vsel %vm3812_vm7, 1, %v6134_v1  ;;  %v6984_v41 = vld [vmem:[%s7227_s15] ss:$0 sm:$0xff]  ;;  %vm7274_vm7 = vcmask 523264   ;;  %s6079_s15 = scalar_lea.vmem %s4936_s8, 128 }
 0x5d9   :  { %5481 = vmatpush3.msra.mxu0 %v3430_v38  ;;  %5499 = vmatprep.subr.mxu1 %v3554_v43  ;;  %p6080_p9 = scmp.ne.s32.totalorder %s4936_s8, %s6079_s15  ;;  %p6085_p11 = scmp.lt.s32.totalorder %s6079_s15, %s6079_s15 }
 0x5da   :  { %5482 = vmatprep.subr.mxu0 %v6130_v0  ;;  %5500 = vmatpush3.msra.mxu1 %v3554_v43 }
 0x5db   :  { %5483 = vmatpush3.msra.mxu0 %v3429_v42  ;;  %5501 = vmatprep.subr.mxu1 %v3553_v50  ;;  %p6086_p12 = por %p6085_p11, %p6084_p10 }
 0x5dc   :  { %5484 = vmatprep.subr.mxu0 %v6130_v0  ;;  %5502 = vmatpush3.msra.mxu1 %v3553_v50 }
 0x5dd   :  { %5485 = vmatpush3.msra.mxu0 %v3428_v45  ;;  %5503 = vmatprep.subr.mxu1 %v3552_v19  ;;  %p6087_p13 = pnand %p6086_p12, %p6080_p9 }
 0x5de   :  { %5486 = vmatprep.subr.mxu0 %v6130_v0  ;;  %5504 = vmatpush3.msra.mxu1 %v3552_v19 }
 0x5df   :  { %5487 = vmatpush3.msra.mxu0 %v3427_v26  ;;  %5505 = vmatprep.subr.mxu1 %v3551_v60 }
 0x5e0   :  { %5488 = vmatprep.subr.mxu0 %v6130_v0  ;;  %5506 = vmatpush3.msra.mxu1 %v3551_v60 }
 0x5e1   :  { %5489 = vmatpush3.msra.mxu0 %v3426_v47  ;;  %5507 = vmatprep.subr.mxu1 %v3550_v62 }
 0x5e2   :  { %5490 = vmatprep.subr.mxu0 %v6130_v0  ;;  %5508 = vmatpush3.msra.mxu1 %v3550_v62 }
 0x5e3   :  { %5491 = vmatpush3.msra.mxu0 %v3425_v17  ;;  %5509 = vmatprep.mubr.msk.f32.mxu1 %vm3563_vm4, %v3542_v52 }
 0x5e4   :  { %5492 = vmatprep.subr.mxu0 %v6130_v0  ;;  %5510 = vmatmul.mubr.msk.f32.vlgmr.msra.gmra.mxu1 %vm3563_vm4, %v3543_v21 }
 0x5e5   :  { %5493 = vmatpush3.msra.mxu0 %v3424_v40  ;;  %5532 = vmatprep.subr.mxu1 %v6130_v0 }
 0x5e6   :  { %5521 = vmatprep.subr.mxu0 %v6130_v0  ;;  %5533 = vmatpush3.msra.mxu1 %v6918_v58 }
 0x5e7   :  { %5534 = vmatprep.subr.mxu1 %v6130_v0 }
 0x5e8   :  { %5535 = vmatpush3.msra.mxu1 %v6923_v28 }
 0x5e9   :  { %5536 = vmatprep.subr.mxu1 %v6130_v0 }
 0x5ea   :  { %5537 = vmatpush3.msra.mxu1 %v6929_v48 }
 0x5eb   :  { %5538 = vmatprep.subr.mxu1 %v6130_v0 }
 0x5ec   :  { %5539 = vmatpush3.msra.mxu1 %v6934_v53 }
 0x5ed   :  { %5554 = vmatprep.subr.mxu1 %v6130_v0 }
 0x64d   :  { %v2825_v34 = vpop.f32.mrf.mxu0 }
 0x64f   :  { %v5442_v49 = vpop.f32.mrf.mxu0 }
 0x650   :  { %v3710_v12 = vpop.permute.xlu1 %3709 }
 0x651   :  { %v2979_v51 = vpop.f32.mrf.mxu0  ;;  %v6948_v32 = vmul.f32 0.0, %v3710_v12 }
 0x652   :  { %v3408_v35 = vrot.slane %v2979_v51, 6 }
 0x653   :  { %v5452_v13 = vpop.f32.mrf.mxu0 }
 0x689   :  { %v2902_v33 = vpop.f32.mrf.mxu1 }
 0x68a   :  { %v3406_v36 = vrot.slane %v2902_v33, 7  ;;  %v3544_v33 = vld [vmem:[#allocation5 + $0x10] sm:$0xff] }
 0x68b   :  { %v5447_v56 = vpop.f32.mrf.mxu1  ;;  %5512 = vmatprep.mubr.msk.f32.mxu1 %vm3563_vm4, %v3544_v33 }
 0x68c   :  { %v3407_v55 = vsel %vm3377_vm13, %v3406_v36, %v2825_v34  ;;  %v6137_v34 = vmov 1   ;;  %v3545_v36 = vld [vmem:[#allocation5 + $0x18] sm:$0xff]  ;;  %v3547_v56 = vld [vmem:[#allocation5 + $0x28] sm:$0xff] }
 0x68d   :  { %v3056_v23 = vpop.f32.mrf.mxu1  ;;  %v3409_v15 = vsel %vm3380_vm14, %v3408_v35, %v3407_v55  ;;  %5693 = vset.pattern.permute.xlu1 %v6137_v34  ;;  %v3546_v35 = vld [vmem:[#allocation5 + $0x20] sm:$0xff]  ;;  %5513 = vmatmul.mubr.msk.f32.gmra.mxu1 %vm3563_vm4, %v3545_v36  ;;  %v3548_v55 = vld [vmem:[#allocation5 + $0x30] sm:$0xff]  ;;  %v6139_v36 = vmov 3  }
 0x68e   :  { %v3410_v59 = vrot.slane %v3056_v23, 5  ;;  %5515 = vmatprep.mubr.msk.f32.mxu1 %vm3563_vm4, %v3546_v35  ;;  %v3549_v23 = vld [vmem:[#allocation5 + $0x38] sm:$0xff] }
 0x68f   :  { %v5457_v18 = vpop.f32.mrf.mxu1 }
 0x690   :  { %v3411_v63 = vsel %vm3383_vm15, %v3410_v59, %v3409_v15 }
 0x691   :  { %v3210_v2 = vpop.f32.mrf.mxu1  ;;  %5516 = vmatmul.mubr.msk.f32.gmra.mxu1 %vm3563_vm4, %v3547_v56 }
 0x692   :  { %v3133_v54 = vpop.f32.mrf.mxu0  ;;  %v3414_v8 = vrot.slane %v3210_v2, 3  ;;  %5518 = vmatprep.mubr.msk.f32.mxu1 %vm3563_vm4, %v3548_v55 }
 0x693   :  { %v3412_v5 = vrot.slane %v3133_v54, 4  ;;  %v5467_v20 = vpop.f32.mrf.mxu1 }
 0x694   :  { %v5462_v22 = vpop.f32.mrf.mxu0 }
 0x695   :  { %v3413_v30 = vsel %vm7264_vm5, %v3412_v5, %v3411_v63  ;;  %v3364_v44 = vpop.f32.mrf.mxu1  ;;  %5519 = vmatmul.mubr.msk.f32.gmra.mxu1 %vm3563_vm4, %v3549_v23 }
 0x696   :  { %v3287_v3 = vpop.f32.mrf.mxu0  ;;  %v3418_v39 = vrot.slane %v3364_v44, 1  ;;  %v3415_v29 = vsel %vm3389_vm3, %v3414_v8, %v3413_v30  ;;  %5540 = vmatprep.mubr.msk.f32.mxu1 %vm6131_vm0, %v6130_v0 }
 0x697   :  { %v3416_v27 = vrot.slane %v3287_v3, 2  ;;  %v5477_v24 = vpop.f32.mrf.mxu1 }
 0x698   :  { %v5472_v31 = vpop.f32.mrf.mxu0 }
 0x699   :  { %v3417_v57 = vsel %vm3392_vm2, %v3416_v27, %v3415_v29  ;;  %vm7265_vm2 = vcmask 261120  }
 0x69a   :  { %v3419_v25 = vsel %vm3395_vm1, %v3418_v39, %v3417_v57  ;;  %vm7267_vm1 = vmmov %vm7265_vm2 }
 0x69b   :  { %3420 = vrot.lane.b32.xlu0 %v3419_v25, %s6135_s13  ;;  %vm7268_vm9 = vmmov %vm7267_vm1  ;;  %v6138_v25 = vmov 2  }
 0x69c   :  { %vm7269_vm11 = vmmov %vm7267_vm1 }
 0x69d   :  { %vm7270_vm13 = vmmov %vm7267_vm1 }
 0x69e   :  { %vm7271_vm15 = vmmov %vm7267_vm1 }
 0x69f   :  { %vm7272_vm4 = vmmov %vm7267_vm1 }
 0x6a4   :  { %v6979_v38 = vpop.f32.mrf.mxu1 }
 0x6a5   :  { %v3660_v27 = vadd.f32 %v6979_v38, %v6984_v41 }
 0x6a6   :  { %v3654_v42 = vpop.f32.mrf.mxu1 }
 0x6a7   :  { %v3655_v43 = vadd.f32 %v6984_v41, %v3654_v42 }
 0x70d   :  { %v3421_v4 = vpop.permute.xlu0 %3420 }
 0x70e   :  { %v3423_v9 = vsel %vm7265_vm2, %v6795_v61, %v3421_v4  ;;  %vm7273_vm2 = vmmov %vm7267_vm1 }
 0x70f   :  { %5495 = vmatmul.mubr.msk.f32.vlgmr.msra.gmra.mxu0 %vm7266_vm6, %v3423_v9 }
 0x710   :  { %5522 = vmatpush3.msra.mxu0 %v6918_v58  ;;  %5529 = vmatprep.mubr.msk.f32.mxu0 %vm6131_vm0, %v6130_v0 }
 0x711   :  { %5523 = vmatprep.subr.mxu0 %v6130_v0 }
 0x712   :  { %5524 = vmatpush3.msra.mxu0 %v6923_v28 }
 0x713   :  { %5525 = vmatprep.subr.mxu0 %v6130_v0 }
 0x714   :  { %5526 = vmatpush3.msra.mxu0 %v6929_v48 }
 0x715   :  { %5527 = vmatprep.subr.mxu0 %v6130_v0 }
 0x716   :  { %5528 = vmatpush3.msra.mxu0 %v6934_v53 }
 0x717   :  { %5530 = vmatmul.mubr.msk.f32.vlgmr.msra.gmra.mxu0 %vm7267_vm1, %v6948_v32  ;;  %5543 = vmatprep.subr.mxu0 %v6130_v0 }
 0x718   :  { %5544 = vmatpush3.msra.mxu0 %v6918_v58  ;;  %5551 = vmatprep.mubr.msk.f32.mxu0 %vm6131_vm0, %v6130_v0 }
 0x719   :  { %5545 = vmatprep.subr.mxu0 %v6130_v0 }
 0x71a   :  { %5546 = vmatpush3.msra.mxu0 %v6923_v28 }
 0x71b   :  { %5547 = vmatprep.subr.mxu0 %v6130_v0 }
 0x71c   :  { %5548 = vmatpush3.msra.mxu0 %v6929_v48 }
 0x71d   :  { %5549 = vmatprep.subr.mxu0 %v6130_v0 }
 0x71e   :  { %5550 = vmatpush3.msra.mxu0 %v6934_v53 }
 0x71f   :  { %5565 = vmatprep.subr.mxu0 %v6130_v0 }
 0x74d   :  { %v7011_v52 = vpop.f32.mrf.mxu1 }
 0x74f   :  { %v3664_v63 = vpop.f32.mrf.mxu1 }
 0x750   :  { %v3665_v34 = vadd.f32 %v6984_v41, %v3664_v63 }
 0x751   :  { %v7013_v8 = vpop.f32.mrf.mxu1 }
 0x753   :  { %v7015_v22 = vpop.f32.mrf.mxu1 }
 0x755   :  { %v7017_v21 = vpop.f32.mrf.mxu1 }
 0x757   :  { %v7019_v30 = vpop.f32.mrf.mxu1 }
 0x7cf   :  { %v6966_v61 = vpop.f32.mrf.mxu0 }
 0x7d1   :  { %v5496_v10 = vpop.f32.mrf.mxu0 }
 0x7d7   :  { %v3782_v11 = vpop.f32.mrf.mxu0 }
 0x7d8   :  { %v3783_v14 = vadd.f32 %v6971_v7, %v3782_v11 }
 0x7d9   :  { %v5531_v37 = vpop.f32.mrf.mxu0 }
 0x7da   :  { %3794 = vrot.lane.b32.xlu0 %v3783_v14, %s6136_s26  ;;  %v3786_v50 = vadd.f32 %v3783_v14, %v3655_v43 }
 0x7dc   :  { %v5030_v45 = vmul.f32 -1.442695, %v3786_v50 }
 0x7de   :  { %3815 = vperm.xlu0 %5692, %v6976_v6   ;;  %5768 = vpow2.f32 %v5030_v45 }
 0x7eb   :  { %v5769_v26 = vpop.eup %5768 }
 0x7ec   :  { %v3790_v47 = vadd.f32 1.0, %v5769_v26 }
 0x7ee   :  { %5770 = vrcp.f32 %v3790_v47 }
 0x7fb   :  { %v5771_v1 = vpop.eup %5770 }
 0x7fc   :  { %v3804_v19 = vsub.f32 1.0, %v5771_v1  ;;  %v3810_v59 = vmul.f32 %v5771_v1, %v6948_v32 }
 0x84c   :  { %v3795_v17 = vpop.permute.xlu0 %3794 }
 0x84d   :  { %v3797_v40 = vmul.f32 %v5771_v1, %v3795_v17 }
 0x84f   :  { %3799 = vrot.lane.b32.xlu1 %v3797_v40, %s6136_s26 }
 0x859   :  { %v3816_v60 = vpop.permute.xlu0 %3815 }
 0x85a   :  { %vm3817_vm8 = vcmp.eq.s32.totalorder %v3816_v60, 1 }
 0x8c1   :  { %v3800_v49 = vpop.permute.xlu1 %3799 }
 0x8c2   :  { %v3802_v51 = vadd.f32 %v3800_v49, %v3655_v43 }
 0x8c4   :  { %5772 = vtanh.f32 %v3802_v51 }
 0x8d1   :  { %v5773_v13 = vpop.eup %5772 }
 0x8d2   :  { %3806 = vrot.lane.b32.xlu1 %v5773_v13, %s6133_s27 }
 0x8d6   :  { %3820 = vperm.xlu1 %5693, %v6882_v46  }
 0x944   :  { %v3807_v15 = vpop.permute.xlu1 %3806 }
 0x945   :  { %v3809_v18 = vmul.f32 %v3807_v15, %v3804_v19 }
 0x947   :  { %v3811_v2 = vadd.f32 %v3810_v59, %v3809_v18 }
 0x949   :  { %v3818_v54 = vsel %vm3817_vm8, 0.0, %v3811_v2  ;;  %vm7275_vm8 = vmmov %vm7274_vm7 }
 0x951   :  { %v3821_v62 = vpop.permute.xlu1 %3820 }
 0x952   :  { %v3823_v5 = vmul.f32 %v3821_v62, %v3818_v54 }
 0x954   :  { %3825 = vrot.lane.b32.xlu0 %v3823_v5, %s6133_s27 }
 0x9c6   :  { %v3826_v20 = vpop.permute.xlu0 %3825 }
 0x9c7   :  { %5541 = vmatmul.mubr.msk.f32.vlgmr.msra.gmra.mxu1 %vm7268_vm9, %v3826_v20 }
 0x9c8   :  { %5555 = vmatpush3.msra.mxu1 %v6918_v58  ;;  %5562 = vmatprep.mubr.msk.f32.mxu1 %vm6131_vm0, %v6130_v0 }
 0x9c9   :  { %5556 = vmatprep.subr.mxu1 %v6130_v0 }
 0x9ca   :  { %5557 = vmatpush3.msra.mxu1 %v6923_v28 }
 0x9cb   :  { %5558 = vmatprep.subr.mxu1 %v6130_v0 }
 0x9cc   :  { %5559 = vmatpush3.msra.mxu1 %v6929_v48 }
 0x9cd   :  { %5560 = vmatprep.subr.mxu1 %v6130_v0 }
 0x9ce   :  { %5561 = vmatpush3.msra.mxu1 %v6934_v53 }
 0x9cf   :  { %5576 = vmatprep.subr.mxu1 %v6130_v0 }
 0xa87   :  { %v3895_v44 = vpop.f32.mrf.mxu1 }
 0xa88   :  { %v3896_v3 = vadd.f32 %v6971_v7, %v3895_v44 }
 0xa89   :  { %v5542_v39 = vpop.f32.mrf.mxu1 }
 0xa8a   :  { %3907 = vrot.lane.b32.xlu1 %v3896_v3, %s6136_s26  ;;  %v3899_v24 = vadd.f32 %v3896_v3, %v3660_v27 }
 0xa8c   :  { %v5032_v29 = vmul.f32 -1.442695, %v3899_v24  ;;  %v3670_v24 = vadd.f32 %v7011_v52, %v6984_v41 }
 0xa8e   :  { %3926 = vperm.xlu1 %5693, %v6976_v6   ;;  %5774 = vpow2.f32 %v5032_v29 }
 0xa92   :  { %5694 = vset.pattern.permute.xlu1 %v6138_v25 }
 0xa93   :  { %3931 = vperm.xlu1 %5694, %v6882_v46  }
 0xa9b   :  { %v5775_v31 = vpop.eup %5774 }
 0xa9c   :  { %v3903_v57 = vadd.f32 1.0, %v5775_v31 }
 0xa9e   :  { %5776 = vrcp.f32 %v3903_v57 }
 0xaab   :  { %v5777_v4 = vpop.eup %5776 }
 0xaac   :  { %v3917_v14 = vsub.f32 1.0, %v5777_v4  ;;  %v3923_v38 = vmul.f32 %v5777_v4, %v3823_v5 }
 0xafc   :  { %v3908_v9 = vpop.permute.xlu1 %3907 }
 0xafd   :  { %v3910_v12 = vmul.f32 %v5777_v4, %v3908_v9  ;;  %v6140_v4 = vmov 4  }
 0xaff   :  { %3912 = vrot.lane.b32.xlu0 %v3910_v12, %s6136_s26 }
 0xb09   :  { %v3927_v16 = vpop.permute.xlu1 %3926 }
 0xb0a   :  { %vm3928_vm10 = vcmp.eq.s32.totalorder %v3927_v16, 1 }
 0xb0e   :  { %v3932_v50 = vpop.permute.xlu1 %3931 }
 0xb71   :  { %v3913_v32 = vpop.permute.xlu0 %3912 }
 0xb72   :  { %v3915_v10 = vadd.f32 %v3913_v32, %v3660_v27 }
 0xb74   :  { %5778 = vtanh.f32 %v3915_v10 }
 0xb81   :  { %v5779_v11 = vpop.eup %5778 }
 0xb82   :  { %3919 = vrot.lane.b32.xlu0 %v5779_v11, %s6133_s27 }
 0xbf4   :  { %v3920_v37 = vpop.permute.xlu0 %3919 }
 0xbf5   :  { %v3922_v42 = vmul.f32 %v3920_v37, %v3917_v14 }
 0xbf7   :  { %v3924_v43 = vadd.f32 %v3923_v38, %v3922_v42 }
 0xbf9   :  { %v3929_v45 = vsel %vm3928_vm10, %v3818_v54, %v3924_v43  ;;  %vm7276_vm10 = vmmov %vm7274_vm7 }
 0xbfa   :  { %v3934_v26 = vmul.f32 %v3932_v50, %v3929_v45 }
 0xbfc   :  { %3936 = vrot.lane.b32.xlu0 %v3934_v26, %s6133_s27 }
 0xc6e   :  { %v3937_v47 = vpop.permute.xlu0 %3936 }
 0xc6f   :  { %5552 = vmatmul.mubr.msk.f32.vlgmr.msra.gmra.mxu0 %vm7269_vm11, %v3937_v47  ;;  %vm7277_vm11 = vmmov %vm7267_vm1 }
 0xc70   :  { %5566 = vmatpush3.msra.mxu0 %v6918_v58  ;;  %5573 = vmatprep.mubr.msk.f32.mxu0 %vm6131_vm0, %v6130_v0 }
 0xc71   :  { %5567 = vmatprep.subr.mxu0 %v6130_v0 }
 0xc72   :  { %5568 = vmatpush3.msra.mxu0 %v6923_v28 }
 0xc73   :  { %5569 = vmatprep.subr.mxu0 %v6130_v0 }
 0xc74   :  { %5570 = vmatpush3.msra.mxu0 %v6929_v48 }
 0xc75   :  { %5571 = vmatprep.subr.mxu0 %v6130_v0 }
 0xc76   :  { %5572 = vmatpush3.msra.mxu0 %v6934_v53 }
 0xc77   :  { %5587 = vmatprep.subr.mxu0 %v6130_v0 }
 0xd2f   :  { %v4006_v1 = vpop.f32.mrf.mxu0 }
 0xd30   :  { %v4007_v17 = vadd.f32 %v6971_v7, %v4006_v1 }
 0xd31   :  { %v5553_v40 = vpop.f32.mrf.mxu0 }
 0xd32   :  { %4018 = vrot.lane.b32.xlu1 %v4007_v17, %s6136_s26  ;;  %v4010_v49 = vadd.f32 %v4007_v17, %v3665_v34 }
 0xd34   :  { %v5034_v51 = vmul.f32 -1.442695, %v4010_v49 }
 0xd36   :  { %4037 = vperm.xlu1 %5694, %v6976_v6   ;;  %5780 = vpow2.f32 %v5034_v51 }
 0xd3a   :  { %5695 = vset.pattern.permute.xlu1 %v6139_v36  ;;  %v6141_v36 = vmov 5  }
 0xd3b   :  { %4042 = vperm.xlu1 %5695, %v6882_v46  }
 0xd43   :  { %v5781_v13 = vpop.eup %5780 }
 0xd44   :  { %v4014_v33 = vadd.f32 1.0, %v5781_v13 }
 0xd46   :  { %5782 = vrcp.f32 %v4014_v33 }
 0xd53   :  { %v5783_v35 = vpop.eup %5782 }
 0xd54   :  { %v4028_v59 = vsub.f32 1.0, %v5783_v35  ;;  %v4034_v2 = vmul.f32 %v5783_v35, %v3934_v26 }
 0xda4   :  { %v4019_v56 = vpop.permute.xlu1 %4018 }
 0xda5   :  { %v4021_v55 = vmul.f32 %v5783_v35, %v4019_v56 }
 0xda7   :  { %4023 = vrot.lane.b32.xlu0 %v4021_v55, %s6136_s26 }
 0xdb1   :  { %v4038_v18 = vpop.permute.xlu1 %4037 }
 0xdb2   :  { %vm4039_vm12 = vcmp.eq.s32.totalorder %v4038_v18, 1 }
 0xdb6   :  { %v4043_v5 = vpop.permute.xlu1 %4042 }
 0xe19   :  { %v4024_v23 = vpop.permute.xlu0 %4023 }
 0xe1a   :  { %v4026_v15 = vadd.f32 %v4024_v23, %v3665_v34  ;;  %v3675_v34 = vadd.f32 %v6984_v41, %v7015_v22 }
 0xe1c   :  { %5784 = vtanh.f32 %v4026_v15 }
 0xe29   :  { %v5785_v19 = vpop.eup %5784 }
 0xe2a   :  { %4030 = vrot.lane.b32.xlu0 %v5785_v19, %s6133_s27 }
 0xe9c   :  { %v4031_v60 = vpop.permute.xlu0 %4030 }
 0xe9d   :  { %v4033_v54 = vmul.f32 %v4031_v60, %v4028_v59 }
 0xe9f   :  { %v4035_v62 = vadd.f32 %v4034_v2, %v4033_v54 }
 0xea1   :  { %v4040_v20 = vsel %vm4039_vm12, %v3929_v45, %v4035_v62  ;;  %vm7278_vm12 = vmmov %vm7267_vm1 }
 0xea2   :  { %v4045_v63 = vmul.f32 %v4043_v5, %v4040_v20 }
 0xea4   :  { %4047 = vrot.lane.b32.xlu0 %v4045_v63, %s6133_s27 }
 0xf16   :  { %v4048_v44 = vpop.permute.xlu0 %4047 }
 0xf17   :  { %5563 = vmatmul.mubr.msk.f32.vlgmr.msra.gmra.mxu1 %vm7270_vm13, %v4048_v44 }
 0xf18   :  { %5577 = vmatpush3.msra.mxu1 %v6918_v58  ;;  %5584 = vmatprep.mubr.msk.f32.mxu1 %vm6131_vm0, %v6130_v0 }
 0xf19   :  { %5578 = vmatprep.subr.mxu1 %v6130_v0 }
 0xf1a   :  { %5579 = vmatpush3.msra.mxu1 %v6923_v28 }
 0xf1b   :  { %5580 = vmatprep.subr.mxu1 %v6130_v0 }
 0xf1c   :  { %5581 = vmatpush3.msra.mxu1 %v6929_v48 }
 0xf1d   :  { %5582 = vmatprep.subr.mxu1 %v6130_v0 }
 0xf1e   :  { %5583 = vmatpush3.msra.mxu1 %v6934_v53 }
 0xf1f   :  { %5598 = vmatprep.subr.mxu1 %v6130_v0 }
 0xfd7   :  { %v4117_v3 = vpop.f32.mrf.mxu1 }
 0xfd8   :  { %v4118_v39 = vadd.f32 %v6971_v7, %v4117_v3 }
 0xfd9   :  { %v5564_v27 = vpop.f32.mrf.mxu1 }
 0xfda   :  { %4129 = vrot.lane.b32.xlu1 %v4118_v39, %s6136_s26  ;;  %v4121_v29 = vadd.f32 %v4118_v39, %v3670_v24 }
 0xfdc   :  { %v5036_v31 = vmul.f32 -1.442695, %v4121_v29 }
 0xfde   :  { %4148 = vperm.xlu1 %5695, %v6976_v6   ;;  %5786 = vpow2.f32 %v5036_v31 }
 0xfe2   :  { %5696 = vset.pattern.permute.xlu1 %v6140_v4 }
 0xfe3   :  { %4153 = vperm.xlu1 %5696, %v6882_v46  }
 0xfeb   :  { %v5787_v57 = vpop.eup %5786 }
 0xfec   :  { %v4125_v25 = vadd.f32 1.0, %v5787_v57 }
 0xfee   :  { %5788 = vrcp.f32 %v4125_v25 }
 0xffb   :  { %v5789_v9 = vpop.eup %5788 }
 0xffc   :  { %v4139_v14 = vsub.f32 1.0, %v5789_v9  ;;  %v4145_v38 = vmul.f32 %v5789_v9, %v4045_v63 }
0x104c   :  { %v4130_v12 = vpop.permute.xlu1 %4129 }
0x104d   :  { %v4132_v32 = vmul.f32 %v5789_v9, %v4130_v12 }
0x104f   :  { %4134 = vrot.lane.b32.xlu0 %v4132_v32, %s6136_s26 }
0x1059   :  { %v4149_v52 = vpop.permute.xlu1 %4148 }
0x105a   :  { %vm4150_vm14 = vcmp.eq.s32.totalorder %v4149_v52, 1 }
0x105e   :  { %v4154_v50 = vpop.permute.xlu1 %4153 }
0x10c1   :  { %v4135_v10 = vpop.permute.xlu0 %4134 }
0x10c2   :  { %v4137_v11 = vadd.f32 %v4135_v10, %v3670_v24 }
0x10c4   :  { %5790 = vtanh.f32 %v4137_v11 }
0x10d1   :  { %v5791_v16 = vpop.eup %5790 }
0x10d2   :  { %4141 = vrot.lane.b32.xlu0 %v5791_v16, %s6133_s27 }
0x1144   :  { %v4142_v37 = vpop.permute.xlu0 %4141 }
0x1145   :  { %v4144_v42 = vmul.f32 %v4142_v37, %v4139_v14 }
0x1147   :  { %v4146_v43 = vadd.f32 %v4145_v38, %v4144_v42 }
0x1149   :  { %v4151_v45 = vsel %vm4150_vm14, %v4040_v20, %v4146_v43 }
0x114a   :  { %v4156_v26 = vmul.f32 %v4154_v50, %v4151_v45 }
0x114c   :  { %4158 = vrot.lane.b32.xlu0 %v4156_v26, %s6133_s27 }
0x11be   :  { %v4159_v47 = vpop.permute.xlu0 %4158 }
0x11bf   :  { %5574 = vmatmul.mubr.msk.f32.vlgmr.msra.gmra.mxu0 %vm7271_vm15, %v4159_v47 }
0x11c0   :  { %5588 = vmatpush3.msra.mxu0 %v6918_v58  ;;  %5595 = vmatprep.mubr.msk.f32.mxu0 %vm6131_vm0, %v6130_v0 }
0x11c1   :  { %5589 = vmatprep.subr.mxu0 %v6130_v0 }
0x11c2   :  { %5590 = vmatpush3.msra.mxu0 %v6923_v28 }
0x11c3   :  { %5591 = vmatprep.subr.mxu0 %v6130_v0 }
0x11c4   :  { %5592 = vmatpush3.msra.mxu0 %v6929_v48 }
0x11c5   :  { %5593 = vmatprep.subr.mxu0 %v6130_v0 }
0x11c6   :  { %5594 = vmatpush3.msra.mxu0 %v6934_v53 }
0x11c7   :  { %5609 = vmatprep.subr.mxu0 %v6130_v0 }
0x127f   :  { %v4228_v1 = vpop.f32.mrf.mxu0 }
0x1280   :  { %v4229_v17 = vadd.f32 %v6971_v7, %v4228_v1 }
0x1281   :  { %v5575_v40 = vpop.f32.mrf.mxu0 }
0x1282   :  { %4240 = vrot.lane.b32.xlu1 %v4229_v17, %s6136_s26  ;;  %v4232_v49 = vadd.f32 %v4229_v17, %v3675_v34  ;;  %v6143_v40 = vmov 7  }
0x1283   :  { %5700 = vset.pattern.permute.xlu0 %v6143_v40 }
0x1284   :  { %v5038_v51 = vmul.f32 -1.442695, %v4232_v49 }
0x1286   :  { %4259 = vperm.xlu1 %5696, %v6976_v6   ;;  %5792 = vpow2.f32 %v5038_v51 }
0x128a   :  { %5697 = vset.pattern.permute.xlu1 %v6141_v36 }
0x128b   :  { %4264 = vperm.xlu1 %5697, %v6882_v46  }
0x1293   :  { %v5793_v13 = vpop.eup %5792 }
0x1294   :  { %v4236_v33 = vadd.f32 1.0, %v5793_v13 }
0x1296   :  { %5794 = vrcp.f32 %v4236_v33 }
0x12a3   :  { %v5795_v35 = vpop.eup %5794 }
0x12a4   :  { %v4250_v18 = vsub.f32 1.0, %v5795_v35  ;;  %v4256_v60 = vmul.f32 %v5795_v35, %v4156_v26 }
0x12f4   :  { %v4241_v56 = vpop.permute.xlu1 %4240 }
0x12f5   :  { %v4243_v55 = vmul.f32 %v5795_v35, %v4241_v56 }
0x12f7   :  { %4245 = vrot.lane.b32.xlu0 %v4243_v55, %s6136_s26 }
0x1301   :  { %v4260_v22 = vpop.permute.xlu1 %4259 }
0x1302   :  { %vm4261_vm3 = vcmp.eq.s32.totalorder %v4260_v22, 1 }
0x1306   :  { %v4265_v62 = vpop.permute.xlu1 %4264 }
0x1369   :  { %v4246_v23 = vpop.permute.xlu0 %4245 }
0x136a   :  { %v4248_v15 = vadd.f32 %v4246_v23, %v3675_v34 }
0x136c   :  { %5796 = vtanh.f32 %v4248_v15 }
0x1379   :  { %v5797_v19 = vpop.eup %5796 }
0x137a   :  { %4252 = vrot.lane.b32.xlu0 %v5797_v19, %s6133_s27 }
0x13ec   :  { %v4253_v59 = vpop.permute.xlu0 %4252 }
0x13ed   :  { %v4255_v2 = vmul.f32 %v4253_v59, %v4250_v18 }
0x13ef   :  { %v4257_v54 = vadd.f32 %v4256_v60, %v4255_v2 }
0x13f1   :  { %v4262_v5 = vsel %vm4261_vm3, %v4151_v45, %v4257_v54  ;;  %v3685_v45 = vadd.f32 %v6984_v41, %v7019_v30  ;;  %v5015_v54 = vld [vmem:[%s7222_s10] ss:$0 sm:$0xff] }
0x13f2   :  { %v4267_v20 = vmul.f32 %v4265_v62, %v4262_v5  ;;  %v3509_v62 = vadd.f32 %v5015_v54, %v6966_v61  ;;  %v5048_v54 = vld [vmem:[%s7232_s20] ss:$0 sm:$0xff] }
0x13f4   :  { %4269 = vrot.lane.b32.xlu0 %v4267_v20, %s6133_s27 }
0x1466   :  { %v4270_v63 = vpop.permute.xlu0 %4269 }
0x1467   :  { %5585 = vmatmul.mubr.msk.f32.vlgmr.msra.gmra.mxu1 %vm7272_vm4, %v4270_v63 }
0x1468   :  { %5599 = vmatpush3.msra.mxu1 %v6918_v58  ;;  %5606 = vmatprep.mubr.msk.f32.mxu1 %vm6131_vm0, %v6130_v0 }
0x1469   :  { %5600 = vmatprep.subr.mxu1 %v6130_v0 }
0x146a   :  { %5601 = vmatpush3.msra.mxu1 %v6923_v28  ;;  %v3680_v28 = vadd.f32 %v7013_v8, %v6984_v41 }
0x146b   :  { %5602 = vmatprep.subr.mxu1 %v6130_v0 }
0x146c   :  { %5603 = vmatpush3.msra.mxu1 %v6929_v48 }
0x146d   :  { %5604 = vmatprep.subr.mxu1 %v6130_v0 }
0x146e   :  { %5605 = vmatpush3.msra.mxu1 %v6934_v53  ;;  %v6142_v53 = vmov 6  }
0x146f   :  { %5620 = vmatprep.subr.mxu1 %v6130_v0 }
0x1527   :  { %v4339_v44 = vpop.f32.mrf.mxu1 }
0x1528   :  { %v4340_v58 = vadd.f32 %v6971_v7, %v4339_v44 }
0x1529   :  { %v5586_v3 = vpop.f32.mrf.mxu1 }
0x152a   :  { %4351 = vrot.lane.b32.xlu1 %v4340_v58, %s6136_s26  ;;  %v4343_v39 = vadd.f32 %v4340_v58, %v3680_v28 }
0x152c   :  { %v5040_v27 = vmul.f32 -1.442695, %v4343_v39 }
0x152e   :  { %4370 = vperm.xlu1 %5697, %v6976_v6   ;;  %5798 = vpow2.f32 %v5040_v27 }
0x1532   :  { %5698 = vset.pattern.permute.xlu1 %v6142_v53 }
0x1533   :  { %4375 = vperm.xlu1 %5698, %v6882_v46  }
0x153b   :  { %v5799_v48 = vpop.eup %5798 }
0x153c   :  { %v4347_v24 = vadd.f32 1.0, %v5799_v48 }
0x153e   :  { %5800 = vrcp.f32 %v4347_v24 }
0x154b   :  { %v5801_v29 = vpop.eup %5800 }
0x154c   :  { %v4361_v12 = vsub.f32 1.0, %v5801_v29  ;;  %v4367_v10 = vmul.f32 %v5801_v29, %v4267_v20  ;;  %v3690_v20 = vadd.f32 %v7017_v21, %v6984_v41 }
0x159c   :  { %v4352_v31 = vpop.permute.xlu1 %4351 }
0x159d   :  { %v4354_v57 = vmul.f32 %v5801_v29, %v4352_v31  ;;  %v4604_v31 = vld [vmem:[%s7229_s17 + $0x38] sm:$0xff] }
0x159f   :  { %4356 = vrot.lane.b32.xlu0 %v4354_v57, %s6136_s26  ;;  %v4602_v57 = vld [vmem:[%s7229_s17 + $0x28] sm:$0xff] }
0x15a9   :  { %v4371_v8 = vpop.permute.xlu1 %4370 }
0x15aa   :  { %vm4372_vm5 = vcmp.eq.s32.totalorder %v4371_v8, 1  ;;  %v4598_v8 = vld [vmem:[%s7229_s17 + $0x8] sm:$0xff] }
0x15ae   :  { %v4376_v52 = vpop.permute.xlu1 %4375 }
0x1611   :  { %v4357_v25 = vpop.permute.xlu0 %4356 }
0x1612   :  { %v4359_v4 = vadd.f32 %v4357_v25, %v3680_v28  ;;  %v4601_v25 = vld [vmem:[%s7229_s17 + $0x20] sm:$0xff] }
0x1614   :  { %5802 = vtanh.f32 %v4359_v4  ;;  %v4600_v4 = vld [vmem:[%s7229_s17 + $0x18] sm:$0xff] }
0x1621   :  { %v5803_v9 = vpop.eup %5802 }
0x1622   :  { %4363 = vrot.lane.b32.xlu0 %v5803_v9, %s6133_s27  ;;  %v4599_v9 = vld [vmem:[%s7229_s17 + $0x10] sm:$0xff] }
0x1694   :  { %v4364_v32 = vpop.permute.xlu0 %4363 }
0x1695   :  { %v4366_v11 = vmul.f32 %v4364_v32, %v4361_v12  ;;  %v4597_v12 = vld [vmem:[%s7229_s17] sm:$0xff]  ;;  %v4608_v32 = vld [vmem:[#allocation19 + $0x18] sm:$0xff] }
0x1697   :  { %v4368_v16 = vadd.f32 %v4367_v10, %v4366_v11  ;;  %v4607_v10 = vld [vmem:[#allocation19 + $0x10] sm:$0xff]  ;;  %v4606_v11 = vld [vmem:[#allocation19 + $0x8] sm:$0xff] }
0x1699   :  { %v4373_v14 = vsel %vm4372_vm5, %v4262_v5, %v4368_v16  ;;  %v3512_v5 = vsel %vm7274_vm7, %v3509_v62, 0.0  ;;  %v4605_v16 = vld [vmem:[#allocation19] sm:$0xff] }
0x169a   :  { %v4378_v37 = vmul.f32 %v4376_v52, %v4373_v14 }
0x169c   :  { %4380 = vrot.lane.b32.xlu0 %v4378_v37, %s6133_s27 }
0x170e   :  { %v4381_v38 = vpop.permute.xlu0 %4380 }
0x170f   :  { %5596 = vmatmul.mubr.msk.f32.vlgmr.msra.gmra.mxu0 %vm7273_vm2, %v4381_v38 }
0x1710   :  { %5617 = vmatprep.mubr.msk.f32.mxu0 %vm6131_vm0, %v6130_v0  ;;  %5610 = vmatpush3.msra.mxu0 %v4608_v32 }
0x1711   :  { %5611 = vmatprep.subr.mxu0 %v6130_v0 }
0x1712   :  { %5612 = vmatpush3.msra.mxu0 %v4607_v10 }
0x1713   :  { %5613 = vmatprep.subr.mxu0 %v6130_v0 }
0x1714   :  { %5614 = vmatpush3.msra.mxu0 %v4606_v11 }
0x1715   :  { %5615 = vmatprep.subr.mxu0 %v6130_v0 }
0x1716   :  { %5616 = vmatpush3.msra.mxu0 %v4605_v16 }
0x1717   :  { %5639 = vmatprep.subr.mxu0 %v6130_v0 }
0x17cf   :  { %v4450_v42 = vpop.f32.mrf.mxu0 }
0x17d0   :  { %v4451_v43 = vadd.f32 %v6971_v7, %v4450_v42 }
0x17d1   :  { %v5597_v50 = vpop.f32.mrf.mxu0 }
0x17d2   :  { %4462 = vrot.lane.b32.xlu1 %v4451_v43, %s6136_s26  ;;  %v4454_v26 = vadd.f32 %v4451_v43, %v3685_v45 }
0x17d4   :  { %v5042_v47 = vmul.f32 -1.442695, %v4454_v26 }
0x17d6   :  { %4481 = vperm.xlu1 %5698, %v6976_v6   ;;  %5804 = vpow2.f32 %v5042_v47 }
0x17da   :  { %5699 = vset.pattern.permute.xlu1 %v6143_v40 }
0x17db   :  { %4486 = vperm.xlu1 %5699, %v6882_v46  }
0x17e3   :  { %v5805_v1 = vpop.eup %5804 }
0x17e4   :  { %v4458_v17 = vadd.f32 1.0, %v5805_v1 }
0x17e6   :  { %5806 = vrcp.f32 %v4458_v17  ;;  %v5017_v17 = vld [vmem:[%s7223_s11] ss:$0 sm:$0xff] }
0x17f3   :  { %v5807_v34 = vpop.eup %5806 }
0x17f4   :  { %v4472_v35 = vsub.f32 1.0, %v5807_v34  ;;  %v4478_v55 = vmul.f32 %v5807_v34, %v4378_v37 }
0x1844   :  { %v4463_v49 = vpop.permute.xlu1 %4462 }
0x1845   :  { %v4465_v51 = vmul.f32 %v5807_v34, %v4463_v49  ;;  %v5018_v34 = vld [vmem:[%s7224_s12] ss:$0 sm:$0xff] }
0x1847   :  { %4467 = vrot.lane.b32.xlu0 %v4465_v51, %s6136_s26 }
0x1851   :  { %v4482_v36 = vpop.permute.xlu1 %4481 }
0x1852   :  { %vm4483_vm6 = vcmp.eq.s32.totalorder %v4482_v36, 1  ;;  %v4758_v36 = vld [vmem:[#allocation20 + $0x8] sm:$0xff] }
0x1856   :  { %v4487_v19 = vpop.permute.xlu1 %4486 }
0x18b9   :  { %v4468_v13 = vpop.permute.xlu0 %4467 }
0x18ba   :  { %v4470_v33 = vadd.f32 %v4468_v13, %v3685_v45  ;;  %v4760_v13 = vld [vmem:[#allocation20 + $0x18] sm:$0xff] }
0x18bc   :  { %5808 = vtanh.f32 %v4470_v33 }
0x18c9   :  { %v5809_v30 = vpop.eup %5808 }
0x18ca   :  { %4474 = vrot.lane.b32.xlu0 %v5809_v30, %s6133_s27  ;;  %v4759_v30 = vld [vmem:[#allocation20 + $0x10] sm:$0xff] }
0x193c   :  { %v4475_v56 = vpop.permute.xlu0 %4474 }
0x193d   :  { %v4477_v23 = vmul.f32 %v4475_v56, %v4472_v35  ;;  %v4757_v35 = vld [vmem:[#allocation20] sm:$0xff]  ;;  %v4596_v56 = vld [vmem:[#allocation10] sm:$0xff] }
0x193f   :  { %v4479_v15 = vadd.f32 %v4478_v55, %v4477_v23  ;;  %v4847_v55 = vld [vmem:[#allocation22 + $0x18] sm:$0xff]  ;;  %v4846_v23 = vld [vmem:[#allocation22 + $0x10] sm:$0xff] }
0x1941   :  { %v7120_v46 = vsel %vm4483_vm6, %v4373_v14, %v4479_v15  ;;  %v4845_v15 = vld [vmem:[#allocation22 + $0x8] sm:$0xff] }
0x1942   :  { %v7123_v22 = vmul.f32 %v4487_v19, %v7120_v46  ;;  %v4844_v19 = vld [vmem:[#allocation22] sm:$0xff] }
0x1944   :  { %4491 = vrot.lane.b32.xlu0 %v7123_v22, %s6133_s27 }
0x19b6   :  { %v4492_v18 = vpop.permute.xlu0 %4491 }
0x19b7   :  { %5607 = vmatmul.mubr.msk.f32.vlgmr.msra.gmra.mxu1 %vm7267_vm1, %v4492_v18 }
0x19b8   :  { %5636 = vmatprep.mubr.msk.f32.mxu1 %vm6131_vm0, %v6130_v0  ;;  %5621 = vmatpush3.msra.mxu1 %v4604_v31 }
0x19b9   :  { %5622 = vmatprep.subr.mxu1 %v6130_v0 }
0x1a77   :  { %v4561_v59 = vpop.f32.mrf.mxu1 }
0x1a78   :  { %v4562_v60 = vadd.f32 %v6971_v7, %v4561_v59 }
0x1a79   :  { %v5608_v2 = vpop.f32.mrf.mxu1 }
0x1a7a   :  { %4573 = vrot.lane.b32.xlu1 %v4562_v60, %s6136_s26  ;;  %v4565_v63 = vadd.f32 %v4562_v60, %v3690_v20 }
0x1a7c   :  { %v5044_v44 = vmul.f32 -1.442695, %v4565_v63 }
0x1a7e   :  { %5810 = vpow2.f32 %v5044_v44 }
0x1a8b   :  { %v5811_v58 = vpop.eup %5810 }
0x1a8c   :  { %v4569_v7 = vadd.f32 1.0, %v5811_v58 }
0x1a8e   :  { %5812 = vrcp.f32 %v4569_v7 }
0x1a9b   :  { %v5813_v3 = vpop.eup %5812 }
0x1a9c   :  { %v4583_v14 = vsub.f32 1.0, %v5813_v3  ;;  %v4589_v38 = vmul.f32 %v5813_v3, %v7123_v22 }
0x1a9e   :  { %3513 = vadd.xlane.f32.xlu1 %v3512_v5 }
0x1aec   :  { %v4574_v28 = vpop.permute.xlu1 %4573 }
0x1aed   :  { %v4576_v39 = vmul.f32 %v5813_v3, %v4574_v28 }
0x1aef   :  { %4578 = vrot.lane.b32.xlu0 %v4576_v39, %s6136_s26 }
0x1af3   :  { %4592 = vperm.xlu0 %5700, %v6976_v6   ;;  %v4603_v6 = vld [vmem:[%s7229_s17 + $0x30] sm:$0xff] }
0x1af4   :  { %5623 = vmatpush3.msra.mxu1 %v4603_v6 }
0x1af5   :  { %5624 = vmatprep.subr.mxu1 %v6130_v0 }
0x1af6   :  { %5625 = vmatpush3.msra.mxu1 %v4602_v57 }
0x1af7   :  { %5626 = vmatprep.subr.mxu1 %v6130_v0 }
0x1af8   :  { %5627 = vmatpush3.msra.mxu1 %v4601_v25 }
0x1af9   :  { %5628 = vmatprep.subr.mxu1 %v6130_v0 }
0x1afa   :  { %5629 = vmatpush3.msra.mxu1 %v4600_v4 }
0x1afb   :  { %5630 = vmatprep.subr.mxu1 %v6130_v0 }
0x1afc   :  { %5631 = vmatpush3.msra.mxu1 %v4599_v9 }
0x1afd   :  { %5632 = vmatprep.subr.mxu1 %v6130_v0 }
0x1afe   :  { %5633 = vmatpush3.msra.mxu1 %v4598_v8 }
0x1aff   :  { %5634 = vmatprep.subr.mxu1 %v6130_v0 }
0x1b00   :  { %5635 = vmatpush3.msra.mxu1 %v4597_v12 }
0x1b27   :  { %v3514_v41 = vpop.xlane.xlu1 %3513 }
0x1b28   :  { %v3516_v21 = vmul.f32 0.015625, %v3514_v41 }
0x1b2a   :  { %v3517_v24 = vsub.f32 %v3509_v62, %v3516_v21 }
0x1b2c   :  { %v3518_v53 = vmul.f32 %v3517_v24, %v3517_v24 }
0x1b2e   :  { %v3519_v29 = vsel %vm7275_vm8, %v3518_v53, 0.0 }
0x1b61   :  { %v4579_v61 = vpop.permute.xlu0 %4578 }
0x1b62   :  { %v4581_v27 = vadd.f32 %v4579_v61, %v3690_v20 }
0x1b64   :  { %5814 = vtanh.f32 %v4581_v27 }
0x1b6e   :  { %v4593_v52 = vpop.permute.xlu0 %4592 }
0x1b6f   :  { %vm4594_vm9 = vcmp.eq.s32.totalorder %v4593_v52, 1 }
0x1b71   :  { %v5815_v48 = vpop.eup %5814 }
0x1b72   :  { %4585 = vrot.lane.b32.xlu0 %v5815_v48, %s6133_s27 }
0x1b91   :  { %3520 = vadd.xlane.f32.xlu0 %v3519_v29 }
0x1be4   :  { %v4586_v37 = vpop.permute.xlu0 %4585 }
0x1be5   :  { %v4588_v42 = vmul.f32 %v4586_v37, %v4583_v14 }
0x1be7   :  { %v4590_v43 = vadd.f32 %v4589_v38, %v4588_v42 }
0x1be9   :  { %v4595_v50 = vsel %vm4594_vm9, %v7120_v46, %v4590_v43 }
0x1bea   :  { %4610 = vrot.lane.b32.xlu1 %v4595_v50, %s6133_s27 }
0x1c1a   :  { %v3521_v45 = vpop.xlane.xlu0 %3520 }
0x1c1b   :  { %v3522_v26 = vmul.f32 0.015625, %v3521_v45 }
0x1c1d   :  { %v3523_v47 = vadd.f32 1e-05, %v3522_v26 }
0x1c1f   :  { %5816 = vrsqrt.f32 %v3523_v47 }
0x1c2c   :  { %v5817_v1 = vpop.eup %5816 }
0x1c2d   :  { %v3525_v40 = vmul.f32 %v5817_v1, %v3517_v24 }
0x1c2f   :  { %v3533_v49 = vmul.f32 %v5017_v17, %v3525_v40 }
0x1c31   :  { %v3541_v51 = vadd.f32 %v5018_v34, %v3533_v49 }
0x1c33   :  { %5637 = vmatmul.mubr.msk.f32.vlgmr.msra.gmra.mxu1 %vm7276_vm10, %v3541_v51 }
0x1c5c   :  { %v4611_v33 = vpop.permute.xlu1 %4610 }
0x1c5d   :  { %5618 = vmatmul.mubr.msk.f32.vlgmr.msra.gmra.mxu0 %vm7277_vm11, %v4611_v33 }
0x1c5e   :  { %5640 = vmatpush3.msra.mxu0 %v4760_v13  ;;  %5647 = vmatprep.mubr.msk.f32.mxu0 %vm6131_vm0, %v6130_v0 }
0x1c5f   :  { %5641 = vmatprep.subr.mxu0 %v6130_v0 }
0x1c60   :  { %5642 = vmatpush3.msra.mxu0 %v4759_v30 }
0x1c61   :  { %5643 = vmatprep.subr.mxu0 %v6130_v0 }
0x1c62   :  { %5644 = vmatpush3.msra.mxu0 %v4758_v36 }
0x1c63   :  { %5645 = vmatprep.subr.mxu0 %v6130_v0 }
0x1c64   :  { %5646 = vmatpush3.msra.mxu0 %v4757_v35 }
0x1c65   :  { %5648 = vmatmul.mubr.msk.f32.vlgmr.msra.gmra.mxu0 %vm7278_vm12, %v4596_v56  ;;  %5650 = vmatprep.subr.mxu0 %v6130_v0 }
0x1c66   :  { %5658 = vmatprep.mubr.msk.f32.mxu0 %vm6131_vm0, %v6130_v0  ;;  %5651 = vmatpush3.msra.mxu0 %v4847_v55  ;;  %vm7279_vm0 = vmmov %vm7267_vm1 }
0x1c67   :  { %5652 = vmatprep.subr.mxu0 %v6130_v0  ;;  %vm7280_vm13 = vmmov %vm7279_vm0 }
0x1c68   :  { %5653 = vmatpush3.msra.mxu0 %v4846_v23 }
0x1c69   :  { %5654 = vmatprep.subr.mxu0 %v6130_v0 }
0x1c6a   :  { %5655 = vmatpush3.msra.mxu0 %v4845_v15 }
0x1c6b   :  { %5656 = vmatprep.subr.mxu0 %v6130_v0  ;;  %v5049_v0 = vld [vmem:[%s7234_s22] ss:$0 sm:$0xff] }
0x1c6c   :  { %5657 = vmatpush3.msra.mxu0 %v4844_v19 }
0x1cf3   :  { %v4753_v46 = vpop.f32.mrf.mxu1 }
0x1cf5   :  { %v5638_v22 = vpop.f32.mrf.mxu1 }
0x1d1d   :  { %v4680_v18 = vpop.f32.mrf.mxu0 }
0x1d1e   :  { %v4754_v60 = vadd.f32 %v4753_v46, %v4680_v18 }
0x1d1f   :  { %v5619_v59 = vpop.f32.mrf.mxu0 }
0x1d25   :  { %v4830_v2 = vpop.f32.mrf.mxu0 }
0x1d26   :  { %v4834_v62 = vadd.f32 %v4830_v2, %v4754_v60 }
0x1d27   :  { %v5649_v5 = vpop.f32.mrf.mxu0 }
0x1d28   :  { %v4842_v20 = vadd.f32 %v5048_v54, %v4834_v62 }
0x1d2a   :  { %v4843_v63 = vmax.f32 %v4842_v20, 0.0 }
0x1d2c   :  { %5659 = vmatmul.mubr.msk.f32.vlgmr.msra.gmra.mxu0 %vm7279_vm0, %v4843_v63 }
0x1dec   :  { %v4924_v44 = vpop.f32.mrf.mxu0 }
0x1ded   :  { %v4925_v58 = vadd.f32 %v5049_v0, %v4924_v44 }
0x1dee   :  { %v5660_v7 = vpop.f32.mrf.mxu0 }
0x1def   :  { %4928 = vst.msk [vmem:[#allocation23] sm:$0xff] %vm7280_vm13, %v4925_v58 }
0x1df0   :  { %6090 = shalt.err (!%p6087_p13)
}
0x1df1   :  { %4938 = dma.vmem_to_hbm [thread:$0]  %s4936_s8, 128, %s7235_s23, [#allocation4]  }
0x1df2   :  { %6113 = dma.done.wait [#allocation4], 128  }
0x1df3   :  { %6114 = vsyncadd [#allocation4], 4294967168 }
0x1df4   :  { %4942 = vsyncpa [#allocation3], 1 }
0x1df5   :  { %4943 = vsyncpa [#allocation6], 1 }
0x1df6   :  { %4944 = vsyncpa [#allocation9], 1 }
0x1df7   :  { %4945 = vsyncpa [#allocation12], 1 }
0x1df8   :  { %4946 = vsyncpa [#allocation15], 1 }
0x1df9   :  { %4947 = vsyncpa [#allocation18], 1 }
0x1dfa   :  { %4948 = vsyncpa [#allocation21], 1 }
0x1dfb   :  { %4949 = vsyncpa [#allocation4], 1 }

</bundles_post_ra>
